<compile_context>
chip_gen: v7x
topology: tpu7x:2x2x1
jax: 0.10.0
libtpu: 0.0.40
codegen_flags: <defaults>
</compile_context>

<pallas_src>
import functools

import jax
import jax.numpy as jnp
from jax.experimental import pallas as pl
from jax.experimental.pallas import tpu as pltpu

# ----------------------- model hyper-parameters ----------------------------
INPUT_DIM = 2          # forward stacks (x, y) on the last dim
OUTPUT_DIM = 1         # squeeze(-1) in the reference implies output_dim == 1
DEEP_LAYERS = 3        # number of hidden (middle) Linear layers
HIDDEN_DIM = 32        # hidden_layers_dimension
LANE = 128
TILE_N = 8192          # default points per grid step (lane axis), mult of 128


def _round_up(v, m):
    return ((v + m - 1) // m) * m


def _pick_tile(n, tile_n):
    """Pick a lane-aligned tile: >=2 grid steps when possible (v7x megacore),
    then even the tile out across steps so padding in the last step is <128/step."""
    n_lanes = _round_up(max(int(n), 1), LANE)
    # cap so the grid has at least 2 steps when there are enough points
    tile0 = min(int(tile_n), max(LANE, _round_up(pl.cdiv(n_lanes, 2), LANE)))
    g = pl.cdiv(n_lanes, tile0)
    # even out: same number of steps, minimal per-step padding
    tile = max(LANE, _round_up(pl.cdiv(n_lanes, g), LANE))
    return tile, pl.cdiv(n_lanes, tile)


# ----------------------------- Pallas kernel --------------------------------
def _mlp_kernel(x_ref, y_ref, wx_ref, wy_ref, bi_ref, wm_ref, bm_ref,
                wot_ref, bo_ref, o_ref, *, deep_layers, act_dtype):
    # Transposed layout: points on the lane axis, hidden units on sublanes.
    x = x_ref[0]                          # (1, TILE_N) lane-dense, f32
    y = y_ref[0]                          # (1, TILE_N), f32

    # Input layer (contraction K=2): VPU broadcast-FMAs, no degenerate matmul.
    pre = wx_ref[...] * x + wy_ref[...] * y + bi_ref[...]        # (H, T) f32
    h = jnp.tanh(pre.astype(act_dtype))                          # (H, T) act

    # Middle layers: (H,H) @ (H,TILE_N) keeps the MXU output fully lane-dense.
    # Weights arrive pre-cast to act_dtype; accumulate in f32, tanh in act_dtype.
    for l in range(deep_layers):
        pre = jnp.dot(wm_ref[l], h, preferred_element_type=jnp.float32) \
              + bm_ref[l]                                        # (H, T) f32
        h = jnp.tanh(pre.astype(act_dtype))

    # Output layer (H -> 1): MXU matmul against (1, H) transposed weight.
    out = jnp.dot(wot_ref[...], h, preferred_element_type=jnp.float32) \
          + bo_ref[...]                                          # (1, T) f32

    # Boundary factor: out * (x - 1) * x * (y - 1) * y   (f32)
    o_ref[0] = out * (x - 1.0) * x * (y - 1.0) * y


# ------------------------------- wrapper -------------------------------------
def neural_network_forward(x, y, params, *, tile_n=TILE_N,
                           act_dtype=jnp.float32):
    """x, y: float32 [N].  Returns float32 [N].

    act_dtype=jnp.bfloat16 enables the bf16 activation/tanh path (v6e/v7x
    lever, ~2x EUP throughput); numerics then only match f32 to ~1e-2.
    """
    n = x.shape[0]
    tile, g = _pick_tile(n, tile_n)
    n_pad = g * tile
    if n_pad != n:
        # Zero padding is safe: the boundary factor (x-1)x(y-1)y is 0 there
        # and the wrapper slices the pad region off anyway.
        x = jnp.pad(x, (0, n_pad - n))
        y = jnp.pad(y, (0, n_pad - n))
    x3 = x.reshape(g, 1, tile)                  # lane-dense point slabs
    y3 = y.reshape(g, 1, tile)

    w_in, b_in, w_mid, b_mid, w_out, b_out = params
    H, L = HIDDEN_DIM, DEEP_LAYERS
    # Re-layout the tiny weights (<20 KB total) for the transposed compute;
    # these wrapper reshapes/transposes are free plumbing.
    wx = w_in[0].reshape(H, 1)                          # column for x (f32)
    wy = w_in[1].reshape(H, 1)                          # column for y (f32)
    bi = b_in.reshape(H, 1)                             # f32
    wm = jnp.swapaxes(w_mid, 1, 2).astype(act_dtype)    # (L, H, H): W^T
    bm = b_mid.reshape(L, H, 1)                         # f32
    wot = w_out.reshape(1, H).astype(act_dtype)         # (1, H): W_out^T
    bo = b_out.reshape(1, 1)                            # f32

    out = pl.pallas_call(
        functools.partial(_mlp_kernel, deep_layers=L, act_dtype=act_dtype),
        out_shape=jax.ShapeDtypeStruct((g, 1, tile), jnp.float32),
        grid=(g,),
        in_specs=[
            pl.BlockSpec((1, 1, tile), lambda i: (i, 0, 0)),   # x slab
            pl.BlockSpec((1, 1, tile), lambda i: (i, 0, 0)),   # y slab
            pl.BlockSpec((H, 1), lambda i: (0, 0)),            # w_in[:, x]
            pl.BlockSpec((H, 1), lambda i: (0, 0)),            # w_in[:, y]
            pl.BlockSpec((H, 1), lambda i: (0, 0)),            # b_in
            pl.BlockSpec((L, H, H), lambda i: (0, 0, 0)),      # w_mid^T
            pl.BlockSpec((L, H, 1), lambda i: (0, 0, 0)),      # b_mid
            pl.BlockSpec((1, H), lambda i: (0, 0)),            # w_out^T
            pl.BlockSpec((1, 1), lambda i: (0, 0)),            # b_out
        ],
        out_specs=pl.BlockSpec((1, 1, tile), lambda i: (i, 0, 0)),
        compiler_params=pltpu.CompilerParams(
            dimension_semantics=("parallel",),
            vmem_limit_bytes=32 * 1024 * 1024),
    )(x3, y3, wx, wy, bi, wm, bm, wot, bo)

    return out.reshape(n_pad)[:n]               # squeeze(-1) + unpad


# --------------------- deterministic parameter init --------------------------
def _xavier_uniform(key, shape):
    fan_in, fan_out = shape[-2], shape[-1]
    bound = jnp.sqrt(6.0 / (fan_in + fan_out))
    return jax.random.uniform(key, shape, jnp.float32, -bound, bound)


def init_params(key):
    ks = jax.random.split(key, 6)
    w_in = _xavier_uniform(ks[0], (INPUT_DIM, HIDDEN_DIM))
    b_in = jax.random.uniform(ks[1], (HIDDEN_DIM,), jnp.float32,
                              -1.0 / jnp.sqrt(INPUT_DIM), 1.0 / jnp.sqrt(INPUT_DIM))
    w_mid = _xavier_uniform(ks[2], (DEEP_LAYERS, HIDDEN_DIM, HIDDEN_DIM))
    b_mid = jax.random.uniform(ks[3], (DEEP_LAYERS, HIDDEN_DIM), jnp.float32,
                               -1.0 / jnp.sqrt(HIDDEN_DIM), 1.0 / jnp.sqrt(HIDDEN_DIM))
    w_out = _xavier_uniform(ks[4], (HIDDEN_DIM, OUTPUT_DIM))
    b_out = jax.random.uniform(ks[5], (OUTPUT_DIM,), jnp.float32,
                               -1.0 / jnp.sqrt(HIDDEN_DIM), 1.0 / jnp.sqrt(HIDDEN_DIM))
    return (w_in, b_in, w_mid, b_mid, w_out, b_out)


# --------------------------- pure-JAX reference -------------------------------
def reference_forward(x, y, params):
    w_in, b_in, w_mid, b_mid, w_out, b_out = params
    inp = jnp.stack([x, y], axis=-1)
    h = jnp.tanh(inp @ w_in + b_in)
    for l in range(DEEP_LAYERS):
        h = jnp.tanh(h @ w_mid[l] + b_mid[l])
    out = (h @ w_out + b_out)[..., 0]
    return out * (x - 1.0) * x * (y - 1.0) * y


if __name__ == "__main__":
    key = jax.random.PRNGKey(0)
    k_p, k_x, k_y = jax.random.split(key, 3)
    params = init_params(k_p)

    # --- main check: f32 path, N large enough for a 2-step grid (both cores)
    N = 8192
    x = jax.random.uniform(k_x, (N,), jnp.float32)   # points in [0, 1)
    y = jax.random.uniform(k_y, (N,), jnp.float32)

    out = jax.block_until_ready(neural_network_forward(x, y, params))
    ref = reference_forward(x, y, params)
    assert out.shape == (N,)
    err = float(jnp.max(jnp.abs(out - ref)))
    assert err < 5e-5, f"f32 mismatch vs reference, max abs err = {err}"

    # --- bf16 activation path (v6e/v7x EUP lever); relaxed tolerance
    out_bf16 = jax.block_until_ready(
        neural_network_forward(x, y, params, act_dtype=jnp.bfloat16))
    err_bf16 = float(jnp.max(jnp.abs(out_bf16 - ref)))
    assert err_bf16 < 2e-2, f"bf16 mismatch vs reference, max abs err = {err_bf16}"

    # --- ragged N: exercise adaptive tile pick + zero-pad slicing
    Nr = 3000
    xr, yr = x[:Nr], y[:Nr]
    out_r = jax.block_until_ready(neural_network_forward(xr, yr, params))
    ref_r = reference_forward(xr, yr, params)
    assert out_r.shape == (Nr,)
    err_r = float(jnp.max(jnp.abs(out_r - ref_r)))
    assert err_r < 5e-5, f"ragged-N mismatch vs reference, max abs err = {err_r}"

    print("KERNEL_OK")
</pallas_src>

<mosaic_0001>
module attributes {stable_mosaic.version = 11 : i64} {
  func.func @_mlp_kernel(%arg0: i32, %arg1: memref<1x1x4096xf32, #tpu.memory_space<vmem>>, %arg2: memref<1x1x4096xf32, #tpu.memory_space<vmem>>, %arg3: memref<32x1xf32, #tpu.memory_space<vmem>>, %arg4: memref<32x1xf32, #tpu.memory_space<vmem>>, %arg5: memref<32x1xf32, #tpu.memory_space<vmem>>, %arg6: memref<3x32x32xf32, #tpu.memory_space<vmem>>, %arg7: memref<3x32x1xf32, #tpu.memory_space<vmem>>, %arg8: memref<1x32xf32, #tpu.memory_space<vmem>>, %arg9: memref<1x1xf32, #tpu.memory_space<vmem>>, %arg10: memref<1x1x4096xf32, #tpu.memory_space<vmem>>) attributes {dimension_semantics = [#tpu.dimension_semantics<parallel>], iteration_bounds = array<i64: 2>, scalar_prefetch = 0 : i64, scratch_operands = 0 : i64, tpu.core_type = #tpu.core_type<tc>, window_params = [{transform_indices = @transform_0, window_bounds = array<i64: 1, 1, 4096>}, {transform_indices = @transform_1, window_bounds = array<i64: 1, 1, 4096>}, {pipeline_mode = #tpu.pipeline_mode<synchronous>, transform_indices = @transform_2, window_bounds = array<i64: 32, 1>}, {pipeline_mode = #tpu.pipeline_mode<synchronous>, transform_indices = @transform_3, window_bounds = array<i64: 32, 1>}, {pipeline_mode = #tpu.pipeline_mode<synchronous>, transform_indices = @transform_4, window_bounds = array<i64: 32, 1>}, {pipeline_mode = #tpu.pipeline_mode<synchronous>, transform_indices = @transform_5, window_bounds = array<i64: 3, 32, 32>}, {pipeline_mode = #tpu.pipeline_mode<synchronous>, transform_indices = @transform_6, window_bounds = array<i64: 3, 32, 1>}, {pipeline_mode = #tpu.pipeline_mode<synchronous>, transform_indices = @transform_7, window_bounds = array<i64: 1, 32>}, {pipeline_mode = #tpu.pipeline_mode<synchronous>, transform_indices = @transform_8, window_bounds = array<i64: 1, 1>}, {transform_indices = @transform_9, window_bounds = array<i64: 1, 1, 4096>}]} {
    %c0 = arith.constant 0 : index
    %c0_0 = arith.constant 0 : index
    %c0_1 = arith.constant 0 : index
    %0 = vector.load %arg1[%c0, %c0_0, %c0_1] : memref<1x1x4096xf32, #tpu.memory_space<vmem>>, vector<1x1x4096xf32>
    %1 = vector.shape_cast %0 : vector<1x1x4096xf32> to vector<1x4096xf32>
    %c0_2 = arith.constant 0 : index
    %c0_3 = arith.constant 0 : index
    %c0_4 = arith.constant 0 : index
    %2 = vector.load %arg2[%c0_2, %c0_3, %c0_4] : memref<1x1x4096xf32, #tpu.memory_space<vmem>>, vector<1x1x4096xf32>
    %3 = vector.shape_cast %2 : vector<1x1x4096xf32> to vector<1x4096xf32>
    %c0_5 = arith.constant 0 : index
    %c0_6 = arith.constant 0 : index
    %4 = vector.load %arg3[%c0_5, %c0_6] : memref<32x1xf32, #tpu.memory_space<vmem>>, vector<32x1xf32>
    %5 = vector.broadcast %4 : vector<32x1xf32> to vector<32x4096xf32>
    %6 = vector.broadcast %1 : vector<1x4096xf32> to vector<32x4096xf32>
    %7 = arith.mulf %5, %6 : vector<32x4096xf32>
    %c0_7 = arith.constant 0 : index
    %c0_8 = arith.constant 0 : index
    %8 = vector.load %arg4[%c0_7, %c0_8] : memref<32x1xf32, #tpu.memory_space<vmem>>, vector<32x1xf32>
    %9 = vector.broadcast %8 : vector<32x1xf32> to vector<32x4096xf32>
    %10 = vector.broadcast %3 : vector<1x4096xf32> to vector<32x4096xf32>
    %11 = arith.mulf %9, %10 : vector<32x4096xf32>
    %12 = arith.addf %7, %11 : vector<32x4096xf32>
    %c0_9 = arith.constant 0 : index
    %c0_10 = arith.constant 0 : index
    %13 = vector.load %arg5[%c0_9, %c0_10] : memref<32x1xf32, #tpu.memory_space<vmem>>, vector<32x1xf32>
    %14 = vector.broadcast %13 : vector<32x1xf32> to vector<32x4096xf32>
    %15 = arith.addf %12, %14 : vector<32x4096xf32>
    %16 = math.tanh %15 : vector<32x4096xf32>
    %c0_11 = arith.constant 0 : index
    %c0_12 = arith.constant 0 : index
    %c0_13 = arith.constant 0 : index
    %17 = vector.load %arg6[%c0_11, %c0_12, %c0_13] : memref<3x32x32xf32, #tpu.memory_space<vmem>>, vector<1x32x32xf32>
    %18 = vector.shape_cast %17 : vector<1x32x32xf32> to vector<32x32xf32>
    %cst = arith.constant dense<0.000000e+00> : vector<32x4096xf32>
    %19 = tpu.matmul %18, %16, %cst {dimension_numbers = #tpu.dot_dimension_numbers<[1], [0], [0], [1], [0, 0, 1, 1], [], []>} : vector<32x32xf32>, vector<32x4096xf32>, vector<32x4096xf32> -> vector<32x4096xf32>
    %c0_14 = arith.constant 0 : index
    %c0_15 = arith.constant 0 : index
    %c0_16 = arith.constant 0 : index
    %20 = vector.load %arg7[%c0_14, %c0_15, %c0_16] : memref<3x32x1xf32, #tpu.memory_space<vmem>>, vector<1x32x1xf32>
    %21 = vector.shape_cast %20 : vector<1x32x1xf32> to vector<32x1xf32>
    %22 = vector.broadcast %21 : vector<32x1xf32> to vector<32x4096xf32>
    %23 = arith.addf %19, %22 : vector<32x4096xf32>
    %24 = math.tanh %23 : vector<32x4096xf32>
    %c1 = arith.constant 1 : index
    %c0_17 = arith.constant 0 : index
    %c0_18 = arith.constant 0 : index
    %25 = vector.load %arg6[%c1, %c0_17, %c0_18] : memref<3x32x32xf32, #tpu.memory_space<vmem>>, vector<1x32x32xf32>
    %26 = vector.shape_cast %25 : vector<1x32x32xf32> to vector<32x32xf32>
    %cst_19 = arith.constant dense<0.000000e+00> : vector<32x4096xf32>
    %27 = tpu.matmul %26, %24, %cst_19 {dimension_numbers = #tpu.dot_dimension_numbers<[1], [0], [0], [1], [0, 0, 1, 1], [], []>} : vector<32x32xf32>, vector<32x4096xf32>, vector<32x4096xf32> -> vector<32x4096xf32>
    %c1_20 = arith.constant 1 : index
    %c0_21 = arith.constant 0 : index
    %c0_22 = arith.constant 0 : index
    %28 = vector.load %arg7[%c1_20, %c0_21, %c0_22] : memref<3x32x1xf32, #tpu.memory_space<vmem>>, vector<1x32x1xf32>
    %29 = vector.shape_cast %28 : vector<1x32x1xf32> to vector<32x1xf32>
    %30 = vector.broadcast %29 : vector<32x1xf32> to vector<32x4096xf32>
    %31 = arith.addf %27, %30 : vector<32x4096xf32>
    %32 = math.tanh %31 : vector<32x4096xf32>
    %c2 = arith.constant 2 : index
    %c0_23 = arith.constant 0 : index
    %c0_24 = arith.constant 0 : index
    %33 = vector.load %arg6[%c2, %c0_23, %c0_24] : memref<3x32x32xf32, #tpu.memory_space<vmem>>, vector<1x32x32xf32>
    %34 = vector.shape_cast %33 : vector<1x32x32xf32> to vector<32x32xf32>
    %cst_25 = arith.constant dense<0.000000e+00> : vector<32x4096xf32>
    %35 = tpu.matmul %34, %32, %cst_25 {dimension_numbers = #tpu.dot_dimension_numbers<[1], [0], [0], [1], [0, 0, 1, 1], [], []>} : vector<32x32xf32>, vector<32x4096xf32>, vector<32x4096xf32> -> vector<32x4096xf32>
    %c2_26 = arith.constant 2 : index
    %c0_27 = arith.constant 0 : index
    %c0_28 = arith.constant 0 : index
    %36 = vector.load %arg7[%c2_26, %c0_27, %c0_28] : memref<3x32x1xf32, #tpu.memory_space<vmem>>, vector<1x32x1xf32>
    %37 = vector.shape_cast %36 : vector<1x32x1xf32> to vector<32x1xf32>
    %38 = vector.broadcast %37 : vector<32x1xf32> to vector<32x4096xf32>
    %39 = arith.addf %35, %38 : vector<32x4096xf32>
    %40 = math.tanh %39 : vector<32x4096xf32>
    %c0_29 = arith.constant 0 : index
    %c0_30 = arith.constant 0 : index
    %41 = vector.load %arg8[%c0_29, %c0_30] : memref<1x32xf32, #tpu.memory_space<vmem>>, vector<1x32xf32>
    %cst_31 = arith.constant dense<0.000000e+00> : vector<1x4096xf32>
    %42 = tpu.matmul %41, %40, %cst_31 {dimension_numbers = #tpu.dot_dimension_numbers<[1], [0], [0], [1], [0, 0, 1, 1], [], []>} : vector<1x32xf32>, vector<32x4096xf32>, vector<1x4096xf32> -> vector<1x4096xf32>
    %c0_32 = arith.constant 0 : index
    %c0_33 = arith.constant 0 : index
    %43 = vector.load %arg9[%c0_32, %c0_33] : memref<1x1xf32, #tpu.memory_space<vmem>>, vector<1x1xf32>
    %44 = vector.broadcast %43 : vector<1x1xf32> to vector<1x4096xf32>
    %45 = arith.addf %42, %44 : vector<1x4096xf32>
    %cst_34 = arith.constant 1.000000e+00 : f32
    %46 = vector.broadcast %cst_34 : f32 to vector<1x4096xf32>
    %47 = arith.subf %1, %46 : vector<1x4096xf32>
    %48 = arith.mulf %45, %47 : vector<1x4096xf32>
    %49 = arith.mulf %48, %1 : vector<1x4096xf32>
    %cst_35 = arith.constant 1.000000e+00 : f32
    %50 = vector.broadcast %cst_35 : f32 to vector<1x4096xf32>
    %51 = arith.subf %3, %50 : vector<1x4096xf32>
    %52 = arith.mulf %49, %51 : vector<1x4096xf32>
    %53 = arith.mulf %52, %3 : vector<1x4096xf32>
    %c0_36 = arith.constant 0 : index
    %c0_37 = arith.constant 0 : index
    %c0_38 = arith.constant 0 : index
    %54 = vector.load %arg10[%c0_36, %c0_37, %c0_38] : memref<1x1x4096xf32, #tpu.memory_space<vmem>>, vector<1x1x4096xf32>
    %55 = vector.shape_cast %54 : vector<1x1x4096xf32> to vector<1x4096xf32>
    %56 = vector.shape_cast %53 : vector<1x4096xf32> to vector<1x1x4096xf32>
    tpu.vector_store %arg10[%c0_36, %c0_37, %c0_38], %56 {strides = array<i32>} : memref<1x1x4096xf32, #tpu.memory_space<vmem>>, vector<1x1x4096xf32>,
    return
  }
  func.func @transform_0(%arg0: i32) -> (i32, i32, i32) {
    %c0_i32 = arith.constant 0 : i32
    %c0_i32_0 = arith.constant 0 : i32
    %c0_i32_1 = arith.constant 0 : i32
    return %arg0, %c0_i32, %c0_i32_0 : i32, i32, i32
  }
  func.func @transform_1(%arg0: i32) -> (i32, i32, i32) {
    %c0_i32 = arith.constant 0 : i32
    %c0_i32_0 = arith.constant 0 : i32
    %c0_i32_1 = arith.constant 0 : i32
    return %arg0, %c0_i32, %c0_i32_0 : i32, i32, i32
  }
  func.func @transform_2(%arg0: i32) -> (i32, i32) {
    %c0_i32 = arith.constant 0 : i32
    %c0_i32_0 = arith.constant 0 : i32
    %c0_i32_1 = arith.constant 0 : i32
    return %c0_i32, %c0_i32_0 : i32, i32
  }
  func.func @transform_3(%arg0: i32) -> (i32, i32) {
    %c0_i32 = arith.constant 0 : i32
    %c0_i32_0 = arith.constant 0 : i32
    %c0_i32_1 = arith.constant 0 : i32
    return %c0_i32, %c0_i32_0 : i32, i32
  }
  func.func @transform_4(%arg0: i32) -> (i32, i32) {
    %c0_i32 = arith.constant 0 : i32
    %c0_i32_0 = arith.constant 0 : i32
    %c0_i32_1 = arith.constant 0 : i32
    return %c0_i32, %c0_i32_0 : i32, i32
  }
  func.func @transform_5(%arg0: i32) -> (i32, i32, i32) {
    %c0_i32 = arith.constant 0 : i32
    %c0_i32_0 = arith.constant 0 : i32
    %c0_i32_1 = arith.constant 0 : i32
    %c0_i32_2 = arith.constant 0 : i32
    return %c0_i32, %c0_i32_0, %c0_i32_1 : i32, i32, i32
  }
  func.func @transform_6(%arg0: i32) -> (i32, i32, i32) {
    %c0_i32 = arith.constant 0 : i32
    %c0_i32_0 = arith.constant 0 : i32
    %c0_i32_1 = arith.constant 0 : i32
    %c0_i32_2 = arith.constant 0 : i32
    return %c0_i32, %c0_i32_0, %c0_i32_1 : i32, i32, i32
  }
  func.func @transform_7(%arg0: i32) -> (i32, i32) {
    %c0_i32 = arith.constant 0 : i32
    %c0_i32_0 = arith.constant 0 : i32
    %c0_i32_1 = arith.constant 0 : i32
    return %c0_i32, %c0_i32_0 : i32, i32
  }
  func.func @transform_8(%arg0: i32) -> (i32, i32) {
    %c0_i32 = arith.constant 0 : i32
    %c0_i32_0 = arith.constant 0 : i32
    %c0_i32_1 = arith.constant 0 : i32
    return %c0_i32, %c0_i32_0 : i32, i32
  }
  func.func @transform_9(%arg0: i32) -> (i32, i32, i32) {
    %c0_i32 = arith.constant 0 : i32
    %c0_i32_0 = arith.constant 0 : i32
    %c0_i32_1 = arith.constant 0 : i32
    return %arg0, %c0_i32, %c0_i32_0 : i32, i32, i32
  }
}

</mosaic_0001>

<bundles_post_ra>
// kernel: tpu_custom_call.1
= control target key start
LH: loop header
LB: loop body
LE: loop exit
PB: predicated region body
PF: predicated region fallthrough
CT: control target
= control target key end

     0   :  { %s12767_s0 = inlined_call_operand.vmem [shape: f32[2,1,4096], index: 0, kind: input, shape index: {}]   ;;  %s12768_s1 = inlined_call_operand.hbm [shape: f32[2,1,4096], index: 1, kind: input, shape index: {}]   ;;  %s12769_s2 = inlined_call_operand.vmem [shape: f32[32,1], index: 2, kind: input, shape index: {}]   ;;  %s12770_s3 = inlined_call_operand.vmem [shape: f32[32,1], index: 3, kind: input, shape index: {}]   ;;  %s12771_s4 = inlined_call_operand.vmem [shape: f32[32,1], index: 4, kind: input, shape index: {}]   ;;  %s12772_s5 = inlined_call_operand.vmem [shape: f32[3,32,32], index: 5, kind: input, shape index: {}]   ;;  %s12773_s6 = inlined_call_operand.vmem [shape: f32[3,32,1], index: 6, kind: input, shape index: {}]   ;;  %s12774_s7 = inlined_call_operand.vmem [shape: f32[1,32], index: 7, kind: input, shape index: {}]   ;;  %s12775_s8 = inlined_call_operand.<no memory space> [shape: f32[1,1], index: 8, kind: input, shape index: {}]   ;;  %s12776_s9 = inlined_call_operand.hbm [shape: f32[2,1,4096], index: 9, kind: output, shape index: {}]  }
   0x1   :  { %v14_v0 = vstv %s12775_s8 }
   0x2   :  { %15 = vst [vmem:[#allocation2] sm:$0x1] %v14_v0 }
   0x3   :  { %16 = vsyncpa [#allocation4], 0 }
   0x4   :  { %18 = vsyncpa [#allocation4 + $0x1], 0 }
   0x5   :  { %19 = vsyncpa [#allocation5], 0 }
   0x6   :  { %21 = vsyncpa [#allocation5 + $0x1], 0  ;;  %s10159_s11 = smov 0   ;;  %s10161_s12 = smov 0  }
   0x7   :  { %s10163_s13 = smov 0   ;;  %s10165_s14 = smov 0  }
   0x8 LB: > { %s10180_s8 = sadd.s32 4294967295, %s10099_s14   ;;  %s8144_s15 = sadd.s32 4294967294, %s10099_s14   ;;  %s10099_s14 = sphi %s10165_s14, %s13029_s14   ;;  %s10095_s13 = sphi %s10163_s13, %s13028_s13   ;;  %s10091_s12 = sphi %s10161_s12, %s13027_s12   ;;  %s10087_s11 = sphi %s10159_s11, %s13026_s11  }
   0x9   : > { %s10184_s16 = sadd.s32 1, %s10099_s14   ;;  %s60_s17 = sadd.s32 1, %s10095_s13 }
   0xa   : > { %s57_s18 = ssub.s32 %s10099_s14, %s10184_s16  ;;  %p67_p0 = scmp.ne.s32.totalorder %s10095_s13, %s10091_s12 }
   0xb   : > { %p58_p1 = scmp.eq.s32.totalorder %s57_s18, 0  ;;  %p68_p2 = scmp.eq.s32.totalorder %s10099_s14, 0 }
   0xc   : > { %p73_p3 = scmp.ne.s32.totalorder %s10091_s12, %s10087_s11  ;;  %p74_p4 = scmp.eq.s32.totalorder %s10180_s8, 0 }
   0xd   : > { %s10196_s19 = scalar_select %p58_p1, %s10095_s13, %s60_s17  }
   0xe   : > { %p10198_p5 = por %p68_p2, %p67_p0  ;;  %p10202_p6 = por %p74_p4, %p73_p3 }
   0xf   : > { %p244_p7 = scmp.eq.s32.totalorder %s10180_s8, 1  ;;  %p250_p8 = scmp.eq.s32.totalorder %s8144_s15, 1 }
  0x10   : > { %p8917_p10 = scmp.lt.s32.totalorder %s10099_s14, 2  ;;  %s298_s24 = sand.u32 1, %s10095_s13  }
  0x11   : > { %p10209_p11 = por %p244_p7, %p67_p0  ;;  %p10213_p12 = por %p250_p8, %p73_p3 }
  0x12   : > { %s8391_s25 = sshll.u32 %s10099_s14, 9  ;;  %s8147_s26 = sshll.u32 %s298_s24, 5 }
  0x13   : > { %s12875_s22 = scalar_select %p10209_p11, 1, 0 }
  0x14   : > { %s12876_s23 = scalar_select %p10213_p12, 1, 0 }
  0x15   : > { %s10222_s29 = scalar_lea.hbm %s12768_s1, %s8391_s25  ;;  %s302_s30 = scalar_lea.vmem [#allocation3], %s8147_s26 }
  0x16   : > { %s310_s10 = sshll.u32 %s302_s30, 4  ;;  %p10226_p13 = pnand %p8917_p10, %p10198_p5  ;;  %s10230_s10 = int_to_ptr.vmem [resolvable:$true] %s310_s10 }
  0x17   : > { %s299_s17 = scalar_lea.sflag [#allocation4], %s298_s24  ;;  %s10003_s18 = scalar_lea.hbm %s10222_s29, 512 }
  0x18   : > { %p10004_p2 = scmp.ne.s32.totalorder %s10222_s29, %s10003_s18  ;;  %p10005_p3 = pneg %p10226_p13 }
  0x19   : > { %s10008_s26 = scalar_lea.hbm %s12768_s1, 1024  ;;  %p10009_p5 = scmp.lt.u32.totalorder %s10222_s29, %s12768_s1 }
  0x1a   : > { %p10006_p4 = pnand %p10005_p3, %p10004_p2  ;;  %p10010_p8 = scmp.lt.u32.totalorder %s10008_s26, %s10003_s18 }
  0x1b   : > { %p10012_p9 = scmp.lt.u32.totalorder %s10003_s18, %s10222_s29 }
  0x1c   : > { %p10007_p7 = pneg %p10006_p4  ;;  %p10011_p10 = por %p10010_p8, %p10009_p5 }
  0x1e   : > { %p10013_p0 = por %p10012_p9, %p10011_p10 }
  0x20   : > { %p10014_p1 = pnand %p10013_p0, %p10007_p7 }
  0x22   : > { %10017 = shalt.err (!%p10014_p1)
}
  0x23   : > { %s10018_s24 = scalar_lea.vmem %s10230_s10, 512  ;;  %s10101_s30 = smov [#allocation3]  }
  0x24   : > { %p10019_p2 = scmp.ne.s32.totalorder %s10230_s10, %s10018_s24  ;;  %s10023_s20 = sshll.u32 %s10101_s30, 4  ;;  %s10024_s20 = int_to_ptr.vmem [resolvable:$false] %s10023_s20 }
  0x25   : > { %s10025_s25 = scalar_lea.vmem %s10024_s20, 1024  ;;  %p10026_p11 = scmp.lt.s32.totalorder %s10230_s10, %s10024_s20 }
  0x26   : > { %p10021_p4 = pnand %p10019_p2, %p10005_p3  ;;  %p10027_p5 = scmp.lt.s32.totalorder %s10025_s25, %s10018_s24 }
  0x28   : > { %p10022_p12 = pneg %p10021_p4  ;;  %p10028_p8 = por %p10027_p5, %p10026_p11 }
  0x2a   : > { %p10029_p9 = pnand %p10028_p8, %p10022_p12 }
  0x2c   : > { %10032 = shalt.err (!%p10029_p9)
}
  0x2d   : > { %8912 = dma.hbm_to_vmem [thread:$0]  (!%p10226_p13), %s10222_s29, 512, %s10230_s10, %s299_s17  }
  0x2e   : > { %p12878_p0 = scmp.lt.s32.totalorder %s10099_s14, 3  ;;  %p12879_p1 = scmp.ge.s32.totalorder %s10099_s14, 1 }
  0x30   : > { %p316_p3 = pnand %p12879_p1, %p12878_p0 }
  0x32   : > { %319 = sbr.rel (%p316_p3) target bundleno = 1370 (0x55a), region = 56 }
  0x39   : > { %s10264_s18 = sand.u32 1, %s10091_s12  }
  0x3a   : > { %s8151_s26 = sshll.u32 %s10264_s18, 5  ;;  %s322_s27 = scalar_lea.sflag [#allocation4], %s10264_s18 }
  0x3b   : > { %s10270_s15 = scalar_lea.vmem [#allocation3], %s8151_s26 }
  0x3c   : > { %10078 = dma.done.wait (%p10202_p6), %s322_s27, 512  }
  0x3d   : > { %10080 = vsyncadd (%p10202_p6), %s322_s27, 4294966784  ;;  %v10102_v1 = vmov 0   ;;  %v692_v2 = vld [vmem:[%s12770_s3] sm:$0xff]  ;;  %v693_v4 = vld [vmem:[%s12770_s3 + $0x8] sm:$0xff]  ;;  %v12778_v27 = vmov 0.0   ;;  %p364_p6 = scmp.lt.s32.totalorder %s10180_s8, 1  ;;  %v404_v28 = vlaneseq }
  0x3e   : > { %8955 = vset.pattern.permute.xlu1 %v10102_v1  ;;  %8954 = vset.pattern.permute.xlu0 %v10102_v1  ;;  %v376_v3 = vld [vmem:[%s12769_s2] sm:$0xff]  ;;  %v377_v5 = vld [vmem:[%s12769_s2 + $0x8] sm:$0xff]  ;;  %v379_v6 = vld [vmem:[%s12769_s2 + $0x18] sm:$0xff]  ;;  %vm1444_vm0 = vcmask 261120   ;;  %s12538_s29 = scalar_lea.vmem [#allocation6], %s8151_s26  ;;  %s8392_s26 = sshll.u32 %s10180_s8, 9 }
  0x3f   : > { %698 = vperm.xlu1 %8955, %v692_v2   ;;  %382 = vperm.xlu0 %8954, %v376_v3   ;;  %v378_v7 = vld [vmem:[%s12769_s2 + $0x10] sm:$0xff]  ;;  %v695_v8 = vld [vmem:[%s12770_s3 + $0x18] sm:$0xff]  ;;  %v1137_v10 = vld [vmem:[%s12771_s4 + $0x8] sm:$0xff]  ;;  %s365_s25 = scalar_select %p364_p6, %s10180_s8, 1  ;;  %v10352_v29 = vshrl.u32 %v404_v28, 7 }
  0x40   : > { %v694_v9 = vld [vmem:[%s12770_s3 + $0x10] sm:$0xff]  ;;  %v1136_v11 = vld [vmem:[%s12771_s4] sm:$0xff]  ;;  %v1139_v12 = vld [vmem:[%s12771_s4 + $0x18] sm:$0xff]  ;;  %1521 = vmatprep.mubr.f32.mxu0 %v12778_v27  ;;  %1610 = vmatprep.mubr.f32.mxu1 %v12778_v27  ;;  %s12722_s28 = scalar_lea.hbm %s12776_s9, %s8392_s26  ;;  %s8048_s24 = scalar_lea.sflag [#allocation5], %s10264_s18 }
  0x41   : > { %v1138_v13 = vld [vmem:[%s12771_s4 + $0x10] sm:$0xff]  ;;  %v1421_v14 = vld [vmem:[%s12773_s6 + $0x8] sm:$0xff]  ;;  %v1420_v15 = vld [vmem:[%s12773_s6] sm:$0xff]  ;;  %s8153_s27 = sshll.u32 %s365_s25, 5  ;;  %12880 = vst [vmem:[#allocation9_spill] sm:$0xff] %v10352_v29  ;;  %v10360_v30 = vsub.s32 1, %v10352_v29 }
  0x42   : > { %v1423_v16 = vld [vmem:[%s12773_s6 + $0x18] sm:$0xff]  ;;  %v1422_v17 = vld [vmem:[%s12773_s6 + $0x10] sm:$0xff]  ;;  %v8223_v18 = vld [vmem:[%s12773_s6 + $0x28] sm:$0xff]  ;;  %s10357_s17 = scalar_lea.vmem %s12767_s0, %s8153_s27  ;;  %v10364_v32 = vsub.s32 3, %v10352_v29  ;;  %v10367_v33 = vsub.s32 0, %v10352_v29  ;;  %v10371_v35 = vsub.s32 2, %v10352_v29 }
  0x43   : > { %703 = vperm.xlu1 %8955, %v693_v4   ;;  %387 = vperm.xlu0 %8954, %v377_v5   ;;  %v8222_v19 = vld [vmem:[%s12773_s6 + $0x20] sm:$0xff]  ;;  %v8225_v20 = vld [vmem:[%s12773_s6 + $0x38] sm:$0xff]  ;;  %v8224_v21 = vld [vmem:[%s12773_s6 + $0x30] sm:$0xff]  ;;  %12881 = vst [vmem:[#allocation10_spill] sm:$0xff] %v10360_v30  ;;  %v10374_v36 = vsub.s32 5, %v10352_v29  ;;  %v10377_v37 = vsub.s32 7, %v10352_v29 }
  0x44   : > { %v8295_v22 = vld [vmem:[%s12773_s6 + $0x48] sm:$0xff]  ;;  %v8294_v23 = vld [vmem:[%s12773_s6 + $0x40] sm:$0xff]  ;;  %v8297_v24 = vld [vmem:[%s12773_s6 + $0x58] sm:$0xff]  ;;  %12882 = vst [vmem:[#allocation11_spill] sm:$0xff] %v10364_v32  ;;  %v10380_v38 = vsub.s32 4, %v10352_v29  ;;  %v10386_v40 = vsub.s32 6, %v10352_v29 }
  0x45   : > { %v8296_v25 = vld [vmem:[%s12773_s6 + $0x50] sm:$0xff]  ;;  %v6198_v26 = vld [vmem:[#allocation2] sm:$0x1]  ;;  %12883 = vst [vmem:[#allocation12_spill] sm:$0xff] %v10367_v33  ;;  %v372_v34 = vld [vmem:[%s10270_s15] sm:$0xff]  ;;  %p13023_p12 = scmp.ne.s32.totalorder %s12875_s22, 0 }
  0x46   : > { %v368_v31 = vld [vmem:[%s10357_s17] sm:$0xff]  ;;  %12884 = vst [vmem:[#allocation13_spill] sm:$0xff] %v10371_v35  ;;  %12885 = vst [vmem:[#allocation14_spill] sm:$0xff] %v10374_v36  ;;  %v10389_v41 = vrot.slane %v372_v34, %v10360_v30  ;;  %v10395_v43 = vrot.slane %v372_v34, %v10364_v32  ;;  %v369_v45 = vld [vmem:[%s10357_s17 + $0x8] sm:$0xff]  ;;  %v10402_v46 = vrot.slane %v372_v34, %v10367_v33  ;;  %s10105_s8 = smov [#allocation6]  }
  0x47   : > { %397 = vperm.xlu1 %8955, %v379_v6   ;;  %392 = vperm.xlu0 %8954, %v378_v7   ;;  %12886 = vst [vmem:[#allocation15_spill] sm:$0xff] %v10377_v37  ;;  %12887 = vst [vmem:[#allocation16_spill] sm:$0xff] %v10380_v38  ;;  %v10383_v39 = vrot.slane %v368_v31, %v10360_v30  ;;  %v10392_v42 = vrot.slane %v368_v31, %v10364_v32  ;;  %v373_v50 = vld [vmem:[%s10270_s15 + $0x8] sm:$0xff]  ;;  %v374_v4 = vld [vmem:[%s10270_s15 + $0x10] sm:$0xff]  ;;  %s10037_s20 = sshll.u32 %s10105_s8, 4  ;;  %s10038_s20 = int_to_ptr.vmem [resolvable:$false] %s10037_s20 }
  0x48   : > { %12889 = vst [vmem:[#allocation18_spill] sm:$0xff] %v10386_v40  ;;  %12890 = vst [vmem:[#allocation19_spill] sm:$0xff] %v10389_v41  ;;  %v10398_v44 = vrot.slane %v368_v31, %v10367_v33  ;;  %v10405_v47 = vrot.slane %v368_v31, %v10371_v35  ;;  %v10408_v48 = vrot.slane %v372_v34, %v10371_v35  ;;  %v370_v63 = vld [vmem:[%s10357_s17 + $0x10] sm:$0xff]  ;;  %s10039_s21 = scalar_lea.vmem %s10038_s20, 1024 }
  0x49   : > { %12888 = vst [vmem:[#allocation17_spill] sm:$0xff] %v10383_v39  ;;  %12891 = vst [vmem:[#allocation20_spill] sm:$0xff] %v10392_v42  ;;  %v10411_v49 = vrot.slane %v368_v31, %v10374_v36  ;;  %v10415_v51 = vrot.slane %v372_v34, %v10374_v36  ;;  %v10418_v52 = vrot.slane %v368_v31, %v10377_v37 }
  0x4a   : > { %12892 = vst [vmem:[#allocation21_spill] sm:$0xff] %v10395_v43  ;;  %12893 = vst [vmem:[#allocation22_spill] sm:$0xff] %v10398_v44  ;;  %v10421_v53 = vrot.slane %v372_v34, %v10377_v37  ;;  %v10424_v54 = vrot.slane %v368_v31, %v10380_v38  ;;  %v10427_v55 = vrot.slane %v372_v34, %v10380_v38 }
  0x4b   : > { %713 = vperm.xlu1 %8955, %v695_v8   ;;  %708 = vperm.xlu0 %8954, %v694_v9   ;;  %12894 = vst [vmem:[#allocation23_spill] sm:$0xff] %v10402_v46  ;;  %12895 = vst [vmem:[#allocation24_spill] sm:$0xff] %v10405_v47  ;;  %v10430_v56 = vrot.slane %v368_v31, %v10386_v40  ;;  %v10433_v57 = vrot.slane %v372_v34, %v10386_v40 }
  0x4c   : > { %v10436_v58 = vrot.slane %v369_v45, %v10360_v30  ;;  %v10439_v59 = vrot.slane %v373_v50, %v10360_v30  ;;  %v10442_v60 = vrot.slane %v369_v45, %v10364_v32  ;;  %v10445_v61 = vrot.slane %v373_v50, %v10364_v32 }
  0x4d   : > { %v10448_v62 = vrot.slane %v369_v45, %v10367_v33  ;;  %v10452_v0 = vrot.slane %v373_v50, %v10367_v33  ;;  %v10455_v1 = vrot.slane %v369_v45, %v10371_v35  ;;  %v10458_v2 = vrot.slane %v373_v50, %v10371_v35 }
  0x4e   : > { %12896 = vst [vmem:[#allocation25_spill] sm:$0xff] %v10439_v59  ;;  %12897 = vst [vmem:[#allocation26_spill] sm:$0xff] %v10442_v60  ;;  %v10461_v3 = vrot.slane %v369_v45, %v10374_v36  ;;  %v10465_v5 = vrot.slane %v373_v50, %v10374_v36  ;;  %v10468_v6 = vrot.slane %v369_v45, %v10377_v37 }
  0x4f   : > { %1147 = vperm.xlu1 %8955, %v1137_v10   ;;  %1142 = vperm.xlu0 %8954, %v1136_v11   ;;  %12898 = vst [vmem:[#allocation27_spill] sm:$0xff] %v10445_v61  ;;  %12899 = vst [vmem:[#allocation28_spill] sm:$0xff] %v10448_v62  ;;  %v10471_v7 = vrot.slane %v373_v50, %v10377_v37  ;;  %v10474_v8 = vrot.slane %v369_v45, %v10380_v38 }
  0x50   : > { %12900 = vst [vmem:[#allocation29_spill] sm:$0xff] %v10452_v0  ;;  %12901 = vst [vmem:[#allocation30_spill] sm:$0xff] %v10455_v1  ;;  %v10477_v9 = vrot.slane %v373_v50, %v10380_v38  ;;  %v10480_v10 = vrot.slane %v369_v45, %v10386_v40  ;;  %v10483_v11 = vrot.slane %v373_v50, %v10386_v40  ;;  %v375_v50 = vld [vmem:[%s10270_s15 + $0x18] sm:$0xff] }
  0x51   : > { %12902 = vst [vmem:[#allocation31_spill] sm:$0xff] %v10458_v2  ;;  %12903 = vst [vmem:[#allocation32_spill] sm:$0xff] %v10461_v3  ;;  %v10530_v31 = vrot.slane %v374_v4, %v10380_v38  ;;  %v10533_v34 = vrot.slane %v370_v63, %v10386_v40  ;;  %v10536_v45 = vrot.slane %v374_v4, %v10386_v40 }
  0x52   : > { %12904 = vst [vmem:[#allocation33_spill] sm:$0xff] %v10465_v5  ;;  %12905 = vst [vmem:[#allocation34_spill] sm:$0xff] %v10468_v6 }
  0x53   : > { %1157 = vperm.xlu1 %8955, %v1139_v12   ;;  %1152 = vperm.xlu0 %8954, %v1138_v13   ;;  %12906 = vst [vmem:[#allocation35_spill] sm:$0xff] %v10471_v7  ;;  %12907 = vst [vmem:[#allocation36_spill] sm:$0xff] %v10474_v8  ;;  %v10486_v12 = vrot.slane %v370_v63, %v10360_v30  ;;  %v10489_v13 = vrot.slane %v374_v4, %v10360_v30 }
  0x54   : > { %12908 = vst [vmem:[#allocation37_spill] sm:$0xff] %v10477_v9  ;;  %12909 = vst [vmem:[#allocation38_spill] sm:$0xff] %v10480_v10 }
  0x55   : > { %12910 = vst [vmem:[#allocation39_spill] sm:$0xff] %v10483_v11  ;;  %12911 = vst [vmem:[#allocation40_spill] sm:$0xff] %v10486_v12 }
  0x56   : > { %12912 = vst [vmem:[#allocation41_spill] sm:$0xff] %v10489_v13  ;;  %12924 = vst [vmem:[#allocation53_spill] sm:$0xff] %v10530_v31 }
  0x57   : > { %1431 = vperm.xlu1 %8955, %v1421_v14   ;;  %1426 = vperm.xlu0 %8954, %v1420_v15   ;;  %v10492_v14 = vrot.slane %v370_v63, %v10364_v32  ;;  %v10495_v15 = vrot.slane %v374_v4, %v10364_v32  ;;  %12925 = vst [vmem:[#allocation54_spill] sm:$0xff] %v10533_v34  ;;  %12926 = vst [vmem:[#allocation55_spill] sm:$0xff] %v10536_v45 }
  0x59   : > { %12913 = vst [vmem:[#allocation42_spill] sm:$0xff] %v10492_v14  ;;  %12914 = vst [vmem:[#allocation43_spill] sm:$0xff] %v10495_v15 }
  0x5b   : > { %1441 = vperm.xlu1 %8955, %v1423_v16   ;;  %1436 = vperm.xlu0 %8954, %v1422_v17   ;;  %v10498_v16 = vrot.slane %v370_v63, %v10367_v33  ;;  %v371_v17 = vld [vmem:[%s10357_s17 + $0x18] sm:$0xff] }
  0x5c   : > { %v10540_v27 = vrot.slane %v371_v17, %v10360_v30 }
  0x5d   : > { %12915 = vst [vmem:[#allocation44_spill] sm:$0xff] %v10498_v16 }
  0x5e   : > { %12927 = vst [vmem:[#allocation56_spill] sm:$0xff] %v10540_v27  ;;  %v10565_v27 = vrot.slane %v375_v50, %v10360_v30 }
  0x5f   : > { %3026 = vperm.xlu1 %8955, %v8223_v18   ;;  %3021 = vperm.xlu0 %8954, %v8222_v19   ;;  %v10502_v18 = vrot.slane %v374_v4, %v10367_v33  ;;  %v10505_v19 = vrot.slane %v370_v63, %v10371_v35 }
  0x60   : > { %12928 = vst [vmem:[#allocation57_spill] sm:$0xff] %v10565_v27 }
  0x61   : > { %12916 = vst [vmem:[#allocation45_spill] sm:$0xff] %v10502_v18  ;;  %12917 = vst [vmem:[#allocation46_spill] sm:$0xff] %v10505_v19 }
  0x63   : > { %3036 = vperm.xlu1 %8955, %v8225_v20   ;;  %3031 = vperm.xlu0 %8954, %v8224_v21   ;;  %v10508_v20 = vrot.slane %v374_v4, %v10371_v35  ;;  %v10511_v21 = vrot.slane %v370_v63, %v10374_v36 }
  0x65   : > { %12918 = vst [vmem:[#allocation47_spill] sm:$0xff] %v10508_v20  ;;  %12919 = vst [vmem:[#allocation48_spill] sm:$0xff] %v10511_v21 }
  0x67   : > { %4620 = vperm.xlu1 %8955, %v8295_v22   ;;  %4615 = vperm.xlu0 %8954, %v8294_v23   ;;  %v10514_v22 = vrot.slane %v374_v4, %v10374_v36  ;;  %v10517_v23 = vrot.slane %v370_v63, %v10377_v37 }
  0x69   : > { %12920 = vst [vmem:[#allocation49_spill] sm:$0xff] %v10514_v22  ;;  %12921 = vst [vmem:[#allocation50_spill] sm:$0xff] %v10517_v23 }
  0x6b   : > { %4630 = vperm.xlu1 %8955, %v8297_v24   ;;  %4625 = vperm.xlu0 %8954, %v8296_v25   ;;  %v10520_v24 = vrot.slane %v374_v4, %v10377_v37  ;;  %v10523_v25 = vrot.slane %v370_v63, %v10380_v38 }
  0x6d   : > { %12922 = vst [vmem:[#allocation51_spill] sm:$0xff] %v10520_v24  ;;  %12923 = vst [vmem:[#allocation52_spill] sm:$0xff] %v10523_v25 }
  0x6f   : > { %6201 = vperm.xlu0 %8954, %v6198_v26  }
  0xbe   : > { %v10525_v26 = vpop.permute.xlu1 %698  ;;  %v10527_v28 = vpop.permute.xlu0 %382 }
  0xbf   : > { %v565_v29 = vmul.f32 %v10383_v39, %v10527_v28  ;;  %v881_v37 = vmul.f32 %v10389_v41, %v10525_v26  ;;  %v567_v38 = vmul.f32 %v10392_v42, %v10527_v28  ;;  %v883_v63 = vmul.f32 %v10395_v43, %v10525_v26 }
  0xc0   : > { %v564_v4 = vmul.f32 %v10398_v44, %v10527_v28  ;;  %v880_v40 = vmul.f32 %v10402_v46, %v10525_v26  ;;  %v566_v17 = vmul.f32 %v10405_v47, %v10527_v28  ;;  %v882_v36 = vmul.f32 %v10408_v48, %v10525_v26 }
  0xc1   : > { %v10558_v35 = vadd.f32 %v881_v37, %v565_v29  ;;  %v10560_v33 = vadd.f32 %v883_v63, %v567_v38  ;;  %v569_v32 = vmul.f32 %v10411_v49, %v10527_v28  ;;  %v885_v29 = vmul.f32 %v10415_v51, %v10525_v26 }
  0xc2   : > { %v10567_v45 = vpop.permute.xlu1 %703  ;;  %v10569_v34 = vpop.permute.xlu0 %387  ;;  %v10571_v31 = vadd.f32 %v880_v40, %v564_v4  ;;  %v10573_v25 = vadd.f32 %v882_v36, %v566_v17  ;;  %v571_v37 = vmul.f32 %v10418_v52, %v10527_v28  ;;  %v887_v22 = vmul.f32 %v10421_v53, %v10525_v26 }
  0xc3   : > { %v597_v38 = vmul.f32 %v10383_v39, %v10569_v34  ;;  %v913_v50 = vmul.f32 %v10389_v41, %v10567_v45  ;;  %v599_v63 = vmul.f32 %v10392_v42, %v10569_v34  ;;  %v915_v40 = vmul.f32 %v10395_v43, %v10567_v45 }
  0xc4   : > { %v596_v36 = vmul.f32 %v10398_v44, %v10569_v34  ;;  %v912_v4 = vmul.f32 %v10402_v46, %v10567_v45  ;;  %v598_v17 = vmul.f32 %v10405_v47, %v10569_v34  ;;  %v914_v30 = vmul.f32 %v10408_v48, %v10567_v45 }
  0xc5   : > { %v1041_v27 = vadd.f32 %v913_v50, %v597_v38  ;;  %v601_v24 = vmul.f32 %v10411_v49, %v10569_v34  ;;  %v917_v23 = vmul.f32 %v10415_v51, %v10567_v45  ;;  %v1043_v19 = vadd.f32 %v915_v40, %v599_v63 }
  0xc6   : > { %v10601_v21 = vpop.permute.xlu1 %397  ;;  %v10603_v20 = vpop.permute.xlu0 %392  ;;  %v1040_v18 = vadd.f32 %v912_v4, %v596_v36  ;;  %v1042_v16 = vadd.f32 %v914_v30, %v598_v17  ;;  %v1013_v15 = vadd.f32 %v885_v29, %v569_v32  ;;  %v603_v13 = vmul.f32 %v10418_v52, %v10569_v34 }
  0xc7   : > { %v629_v38 = vmul.f32 %v10383_v39, %v10603_v20  ;;  %v661_v50 = vmul.f32 %v10383_v39, %v10601_v21  ;;  %v631_v14 = vmul.f32 %v10392_v42, %v10603_v20  ;;  %v663_v12 = vmul.f32 %v10392_v42, %v10601_v21 }
  0xc8   : > { %v628_v63 = vmul.f32 %v10398_v44, %v10603_v20  ;;  %v660_v30 = vmul.f32 %v10398_v44, %v10601_v21  ;;  %v630_v32 = vmul.f32 %v10405_v47, %v10603_v20  ;;  %v662_v29 = vmul.f32 %v10405_v47, %v10601_v21 }
  0xc9   : > { %v1045_v40 = vadd.f32 %v917_v23, %v601_v24  ;;  %v919_v36 = vmul.f32 %v10421_v53, %v10567_v45  ;;  %v1015_v4 = vadd.f32 %v887_v22, %v571_v37  ;;  %v568_v39 = vmul.f32 %v10424_v54, %v10527_v28 }
  0xca   : > { %v10625_v17 = vpop.permute.xlu1 %713  ;;  %v10627_v42 = vpop.permute.xlu0 %708  ;;  %v600_v44 = vmul.f32 %v10424_v54, %v10569_v34  ;;  %v884_v11 = vmul.f32 %v10427_v55, %v10525_v26  ;;  %v916_v23 = vmul.f32 %v10427_v55, %v10567_v45  ;;  %v570_v3 = vmul.f32 %v10430_v56, %v10527_v28 }
  0xcb   : > { %v945_v24 = vmul.f32 %v10389_v41, %v10627_v42  ;;  %v977_v22 = vmul.f32 %v10389_v41, %v10625_v17  ;;  %v947_v37 = vmul.f32 %v10395_v43, %v10627_v42  ;;  %v979_v47 = vmul.f32 %v10395_v43, %v10625_v17 }
  0xcc   : > { %v944_v10 = vmul.f32 %v10402_v46, %v10627_v42  ;;  %v976_v9 = vmul.f32 %v10402_v46, %v10625_v17  ;;  %v946_v8 = vmul.f32 %v10408_v48, %v10627_v42  ;;  %v978_v7 = vmul.f32 %v10408_v48, %v10625_v17 }
  0xcd   : > { %v1073_v6 = vadd.f32 %v945_v24, %v629_v38  ;;  %v1105_v41 = vadd.f32 %v977_v22, %v661_v50  ;;  %v1075_v5 = vadd.f32 %v947_v37, %v631_v14  ;;  %v1107_v1 = vadd.f32 %v979_v47, %v663_v12 }
  0xce   : > { %v10655_v2 = vpop.permute.xlu1 %1147  ;;  %v10657_v43 = vpop.permute.xlu0 %1142  ;;  %v1072_v0 = vadd.f32 %v944_v10, %v628_v63  ;;  %v1104_v62 = vadd.f32 %v976_v9, %v660_v30  ;;  %v1074_v46 = vadd.f32 %v946_v8, %v630_v32  ;;  %v1106_v14 = vadd.f32 %v978_v7, %v662_v29 }
  0xcf   : > { %v1161_v61 = vadd.f32 %v10657_v43, %v10558_v35  ;;  %v1193_v60 = vadd.f32 %v10655_v2, %v1041_v27  ;;  %v1163_v38 = vadd.f32 %v10657_v43, %v10560_v33  ;;  %v1195_v50 = vadd.f32 %v10655_v2, %v1043_v19 }
  0xd0   : > { %v1160_v24 = vadd.f32 %v10657_v43, %v10571_v31  ;;  %v1192_v22 = vadd.f32 %v10655_v2, %v1040_v18  ;;  %v1162_v47 = vadd.f32 %v10657_v43, %v10573_v25  ;;  %v1194_v8 = vadd.f32 %v10655_v2, %v1042_v16 }
  0xd1   : > { %8956 = vtanh.f32 %v1161_v61  ;;  %v10672_v35 = vadd.f32 %v10657_v43, %v1013_v15  ;;  %v10675_v27 = vadd.f32 %v10655_v2, %v1045_v40  ;;  %v1047_v9 = vadd.f32 %v919_v36, %v603_v13 }
  0xd2   : > { %v10677_v33 = vpop.permute.xlu1 %1157  ;;  %v10679_v7 = vpop.permute.xlu0 %1152  ;;  %8958 = vtanh.f32 %v1193_v60  ;;  %v10682_v10 = vadd.f32 %v10657_v43, %v1015_v4  ;;  %v1012_v12 = vadd.f32 %v884_v11, %v568_v39  ;;  %v1044_v15 = vadd.f32 %v916_v23, %v600_v44 }
  0xd3   : > { %8960 = vtanh.f32 %v1163_v38  ;;  %v1225_v61 = vadd.f32 %v10679_v7, %v1073_v6  ;;  %v1257_v16 = vadd.f32 %v10677_v33, %v1105_v41  ;;  %v1227_v18 = vadd.f32 %v10679_v7, %v1075_v5 }
  0xd4   : > { %8962 = vtanh.f32 %v1195_v50  ;;  %v1259_v19 = vadd.f32 %v10677_v33, %v1107_v1  ;;  %v1224_v25 = vadd.f32 %v10679_v7, %v1072_v0  ;;  %v1256_v60 = vadd.f32 %v10677_v33, %v1104_v62 }
  0xd5   : > { %8964 = vtanh.f32 %v1160_v24  ;;  %v1226_v13 = vadd.f32 %v10679_v7, %v1074_v46  ;;  %v1258_v39 = vadd.f32 %v10677_v33, %v1106_v14  ;;  %v10693_v6 = vadd.f32 %v10655_v2, %v1047_v9 }
  0xd6   : > { %8966 = vtanh.f32 %v1192_v22  ;;  %v10696_v41 = vadd.f32 %v10657_v43, %v1012_v12  ;;  %v602_v44 = vmul.f32 %v10430_v56, %v10569_v34  ;;  %v886_v0 = vmul.f32 %v10433_v57, %v10525_v26 }
  0xd7   : > { %8968 = vtanh.f32 %v1162_v47  ;;  %v918_v62 = vmul.f32 %v10433_v57, %v10567_v45  ;;  %v633_v46 = vmul.f32 %v10411_v49, %v10603_v20  ;;  %v665_v1 = vmul.f32 %v10411_v49, %v10601_v21 }
  0xd8   : > { %8970 = vtanh.f32 %v1194_v8  ;;  %v949_v5 = vmul.f32 %v10415_v51, %v10627_v42  ;;  %v981_v11 = vmul.f32 %v10415_v51, %v10625_v17  ;;  %v10713_v31 = vadd.f32 %v10655_v2, %v1044_v15 }
  0xd9   : > { %8972 = vtanh.f32 %v1225_v61  ;;  %v1014_v63 = vadd.f32 %v886_v0, %v570_v3  ;;  %v1046_v30 = vadd.f32 %v918_v62, %v602_v44  ;;  %v635_v40 = vmul.f32 %v10418_v52, %v10603_v20 }
  0xda   : > { %8974 = vtanh.f32 %v1257_v16  ;;  %v1077_v32 = vadd.f32 %v949_v5, %v633_v46  ;;  %v1109_v29 = vadd.f32 %v981_v11, %v665_v1  ;;  %v667_v23 = vmul.f32 %v10418_v52, %v10601_v21 }
  0xdb   : > { %v8957_v36 = vpop.eup %8956  ;;  %8976 = vtanh.f32 %v1227_v18  ;;  %v10718_v4 = vadd.f32 %v10657_v43, %v1014_v63  ;;  %v951_v37 = vmul.f32 %v10421_v53, %v10627_v42  ;;  %v10725_v3 = vadd.f32 %v10655_v2, %v1046_v30 }
  0xdc   : > { %v8959_v38 = vpop.eup %8958  ;;  %8978 = vtanh.f32 %v1259_v19  ;;  %v10728_v14 = vadd.f32 %v10679_v7, %v1077_v32  ;;  %v983_v50 = vmul.f32 %v10421_v53, %v10625_v17  ;;  %v10733_v47 = vadd.f32 %v10677_v33, %v1109_v29 }
  0xdd   : > { %v8961_v24 = vpop.eup %8960  ;;  %v8393_v22 = vpack.c.bf16 %v8959_v38, %v8957_v36  ;;  %8980 = vtanh.f32 %v1224_v25  ;;  %v1079_v8 = vadd.f32 %v951_v37, %v635_v40  ;;  %v632_v61 = vmul.f32 %v10424_v54, %v10603_v20 }
  0xde   : > { %v8963_v9 = vpop.eup %8962  ;;  %8982 = vtanh.f32 %v1256_v60  ;;  %v1111_v12 = vadd.f32 %v983_v50, %v667_v23  ;;  %v948_v16 = vmul.f32 %v10427_v55, %v10627_v42  ;;  %v664_v19 = vmul.f32 %v10424_v54, %v10601_v21 }
  0xdf   : > { %v8965_v15 = vpop.eup %8964  ;;  %8394 = vmatprep.subr.bf16.mxu0 %v8393_v22  ;;  %v8401_v18 = vpack.c.bf16 %v8963_v9, %v8961_v24  ;;  %8984 = vtanh.f32 %v1226_v13  ;;  %v980_v25 = vmul.f32 %v10427_v55, %v10625_v17  ;;  %v1231_v60 = vadd.f32 %v10679_v7, %v1079_v8  ;;  %v12929_v9 = vld [vmem:[#allocation26_spill] sm:$0xff] }
  0xe0   : > { %v8967_v44 = vpop.eup %8966  ;;  %8986 = vtanh.f32 %v1258_v39  ;;  %v10745_v0 = vadd.f32 %v10677_v33, %v1111_v12  ;;  %v1076_v62 = vadd.f32 %v948_v16, %v632_v61  ;;  %v634_v5 = vmul.f32 %v10430_v56, %v10603_v20 }
  0xe1   : > { %v8969_v46 = vpop.eup %8968  ;;  %8402 = vmatprep.subr.bf16.mxu1 %v8401_v18  ;;  %v8395_v1 = vpack.c.bf16 %v8967_v44, %v8965_v15  ;;  %8988 = vtanh.f32 %v10672_v35  ;;  %v1108_v13 = vadd.f32 %v980_v25, %v664_v19  ;;  %v666_v39 = vmul.f32 %v10430_v56, %v10601_v21 }
  0xe2   : > { %v8971_v11 = vpop.eup %8970  ;;  %8990 = vtanh.f32 %v10675_v27  ;;  %v950_v63 = vmul.f32 %v10433_v57, %v10627_v42  ;;  %v982_v30 = vmul.f32 %v10433_v57, %v10625_v17  ;;  %v1228_v35 = vadd.f32 %v10679_v7, %v1076_v62 }
  0xe3   : > { %v8973_v32 = vpop.eup %8972  ;;  %8396 = vmatpush1.bf16.msra.mxu0 %v8395_v1  ;;  %v8403_v29 = vpack.c.bf16 %v8971_v11, %v8969_v46  ;;  %8992 = vtanh.f32 %v10682_v10  ;;  %v573_v27 = vmul.f32 %v10436_v58, %v10527_v28  ;;  %v1260_v36 = vadd.f32 %v10677_v33, %v1108_v13  ;;  %v12931_v11 = vld [vmem:[#allocation28_spill] sm:$0xff] }
  0xe4   : > { %v8975_v40 = vpop.eup %8974  ;;  %8994 = vtanh.f32 %v10693_v6  ;;  %v1078_v23 = vadd.f32 %v950_v63, %v634_v5  ;;  %v605_v37 = vmul.f32 %v10436_v58, %v10569_v34  ;;  %v889_v10 = vmul.f32 %v10439_v59, %v10525_v26 }
  0xe5   : > { %v8977_v38 = vpop.eup %8976  ;;  %8404 = vmatpush1.bf16.msra.mxu1 %v8403_v29  ;;  %v8397_v50 = vpack.c.bf16 %v8975_v40, %v8973_v32  ;;  %8996 = vtanh.f32 %v10696_v41  ;;  %v921_v24 = vmul.f32 %v10439_v59, %v10567_v45  ;;  %v1110_v6 = vadd.f32 %v982_v30, %v666_v39 }
  0xe6   : > { %v8979_v22 = vpop.eup %8978  ;;  %8998 = vtanh.f32 %v10713_v31  ;;  %v1230_v8 = vadd.f32 %v10679_v7, %v1078_v23  ;;  %v575_v12 = vmul.f32 %v12929_v9, %v10527_v28  ;;  %v1017_v41 = vadd.f32 %v889_v10, %v573_v27  ;;  %v12930_v31 = vld [vmem:[#allocation27_spill] sm:$0xff]  ;;  %v12933_v10 = vld [vmem:[#allocation30_spill] sm:$0xff] }
  0xe7   : > { %v8981_v61 = vpop.eup %8980  ;;  %8398 = vmatprep.subr.bf16.mxu0 %v8397_v50  ;;  %v8405_v16 = vpack.c.bf16 %v8979_v22, %v8977_v38  ;;  %9000 = vtanh.f32 %v10718_v4  ;;  %v1049_v15 = vadd.f32 %v921_v24, %v605_v37  ;;  %v607_v19 = vmul.f32 %v12929_v9, %v10569_v34 }
  0xe8   : > { %v8983_v18 = vpop.eup %8982  ;;  %9002 = vtanh.f32 %v10725_v3  ;;  %v891_v25 = vmul.f32 %v12930_v31, %v10525_v26  ;;  %v923_v44 = vmul.f32 %v12930_v31, %v10567_v45  ;;  %v1262_v4 = vadd.f32 %v10677_v33, %v1110_v6 }
  0xe9   : > { %v8985_v62 = vpop.eup %8984  ;;  %8406 = vmatprep.subr.bf16.mxu1 %v8405_v16  ;;  %v8399_v46 = vpack.c.bf16 %v8983_v18, %v8981_v61  ;;  %9004 = vtanh.f32 %v10728_v14  ;;  %v1169_v1 = vadd.f32 %v10657_v43, %v1017_v41  ;;  %v1201_v3 = vadd.f32 %v10655_v2, %v1049_v15  ;;  %v10792_v14 = vld [vmem:[%s12772_s5] sm:$0xff]  ;;  %v10814_v15 = vld [vmem:[%s12772_s5 + $0x8] sm:$0xff] }
  0xea   : > { %v8987_v13 = vpop.eup %8986  ;;  %9006 = vtanh.f32 %v10733_v47  ;;  %v1019_v5 = vadd.f32 %v891_v25, %v575_v12  ;;  %v572_v39 = vmul.f32 %v12931_v11, %v10527_v28  ;;  %v604_v32 = vmul.f32 %v12931_v11, %v10569_v34  ;;  %v12932_v47 = vld [vmem:[#allocation29_spill] sm:$0xff]  ;;  %v12934_v12 = vld [vmem:[#allocation31_spill] sm:$0xff] }
  0xeb   : > { %v8989_v63 = vpop.eup %8988  ;;  %8400 = vmatpush1.bf16.msra.mxu0 %v8399_v46  ;;  %v8407_v30 = vpack.c.bf16 %v8987_v13, %v8985_v62  ;;  %9008 = vtanh.f32 %v1231_v60  ;;  %v888_v29 = vmul.f32 %v12932_v47, %v10525_v26  ;;  %v1051_v40 = vadd.f32 %v923_v44, %v607_v19 }
  0xec   : > { %v8991_v27 = vpop.eup %8990  ;;  %9010 = vtanh.f32 %v10745_v0  ;;  %v1171_v23 = vadd.f32 %v10657_v43, %v1019_v5  ;;  %v920_v37 = vmul.f32 %v12932_v47, %v10567_v45  ;;  %v574_v24 = vmul.f32 %v12933_v10, %v10527_v28 }
  0xed   : > { %v8993_v38 = vpop.eup %8992  ;;  %8408 = vmatpush1.bf16.msra.mxu1 %v8407_v30  ;;  %v8409_v50 = vpack.c.bf16 %v8991_v27, %v8989_v63  ;;  %9012 = vtanh.f32 %v1228_v35  ;;  %v1016_v60 = vadd.f32 %v888_v29, %v572_v39  ;;  %v606_v6 = vmul.f32 %v12933_v10, %v10569_v34  ;;  %v10837_v29 = vld [vmem:[%s12772_s5 + $0x10] sm:$0xff] }
  0xee   : > { %v8995_v22 = vpop.eup %8994  ;;  %8154 = vmatmul.mubr.msk.f32.vlgmr.msra.gmra.mrb[0].mxu0 %vm1444_vm0, %v10792_v14  ;;  %9014 = vtanh.f32 %v1260_v36  ;;  %v1048_v0 = vadd.f32 %v920_v37, %v604_v32  ;;  %v890_v61 = vmul.f32 %v12934_v12, %v10525_v26  ;;  %v12935_v35 = vmov 0.0  }
  0xef   : > { %v8997_v16 = vpop.eup %8996  ;;  %8410 = vmatprep.subr.bf16.mxu0 %v8409_v50  ;;  %v8417_v41 = vpack.c.bf16 %v8995_v22, %v8993_v38  ;;  %1527 = vmatprep.mubr.f32.mxu0 %v12935_v35  ;;  %9016 = vtanh.f32 %v1230_v8  ;;  %v1203_v36 = vadd.f32 %v10655_v2, %v1051_v40  ;;  %v1168_v18 = vadd.f32 %v10657_v43, %v1016_v60 }
  0xf0   : > { %v8999_v19 = vpop.eup %8998  ;;  %8158 = vmatmul.mubr.msk.f32.vlgmr.msra.gmra.mrb[0].mxu1 %vm1444_vm0, %v10792_v14  ;;  %9018 = vtanh.f32 %v1262_v4  ;;  %v1200_v25 = vadd.f32 %v10655_v2, %v1048_v0  ;;  %v922_v44 = vmul.f32 %v12934_v12, %v10567_v45  ;;  %v1018_v62 = vadd.f32 %v890_v61, %v574_v24 }
  0xf1   : > { %v9001_v46 = vpop.eup %9000  ;;  %8418 = vmatprep.subr.bf16.mxu1 %v8417_v41  ;;  %v8411_v13 = vpack.c.bf16 %v8999_v19, %v8997_v16  ;;  %1616 = vmatprep.mubr.f32.mxu1 %v12935_v35  ;;  %9020 = vtanh.f32 %v1169_v1  ;;  %v637_v8 = vmul.f32 %v10436_v58, %v10603_v20  ;;  %v669_v5 = vmul.f32 %v10436_v58, %v10601_v21 }
  0xf2   : > { %v9003_v39 = vpop.eup %9002  ;;  %8155 = vmatmul.mubr.msk.f32.gmra.mrb[2].mxu0 %vm1444_vm0, %v10814_v15  ;;  %9022 = vtanh.f32 %v1201_v3  ;;  %v1050_v4 = vadd.f32 %v922_v44, %v606_v6  ;;  %v1170_v63 = vadd.f32 %v10657_v43, %v1018_v62  ;;  %v953_v30 = vmul.f32 %v10439_v59, %v10627_v42 }
  0xf3   : > { %v9005_v32 = vpop.eup %9004  ;;  %8412 = vmatpush1.bf16.msra.mxu0 %v8411_v13  ;;  %v8419_v1 = vpack.c.bf16 %v9003_v39, %v9001_v46  ;;  %9024 = vtanh.f32 %v1171_v23  ;;  %1533 = vmatprep.mubr.f32.mxu0 %v12935_v35  ;;  %v985_v3 = vmul.f32 %v10439_v59, %v10625_v17  ;;  %v639_v27 = vmul.f32 %v12929_v9, %v10603_v20 }
  0xf4   : > { %v9007_v40 = vpop.eup %9006  ;;  %8159 = vmatmul.mubr.msk.f32.gmra.mrb[2].mxu1 %vm1444_vm0, %v10814_v15  ;;  %9026 = vtanh.f32 %v1203_v36  ;;  %v1202_v23 = vadd.f32 %v10655_v2, %v1050_v4  ;;  %v1081_v37 = vadd.f32 %v953_v30, %v637_v8  ;;  %v671_v38 = vmul.f32 %v12929_v9, %v10601_v21 }
  0xf5   : > { %v9009_v50 = vpop.eup %9008  ;;  %8420 = vmatpush1.bf16.msra.mxu1 %v8419_v1  ;;  %v8413_v60 = vpack.c.bf16 %v9007_v40, %v9005_v32  ;;  %1622 = vmatprep.mubr.f32.mxu1 %v12935_v35  ;;  %9028 = vtanh.f32 %v1168_v18  ;;  %v1113_v24 = vadd.f32 %v985_v3, %v669_v5  ;;  %v955_v22 = vmul.f32 %v12930_v31, %v10627_v42  ;;  %v10862_v18 = vld [vmem:[%s12772_s5 + $0x18] sm:$0xff] }
  0xf6   : > { %v9011_v0 = vpop.eup %9010  ;;  %8156 = vmatmul.mubr.msk.f32.gmra.mrb[4].mxu0 %vm1444_vm0, %v10837_v29  ;;  %9030 = vtanh.f32 %v1200_v25  ;;  %v1233_v6 = vadd.f32 %v10679_v7, %v1081_v37  ;;  %v987_v61 = vmul.f32 %v12930_v31, %v10625_v17  ;;  %v636_v16 = vmul.f32 %v12931_v11, %v10603_v20 }
  0xf7   : > { %v9013_v41 = vpop.eup %9012  ;;  %8414 = vmatprep.subr.bf16.mxu0 %v8413_v60  ;;  %v8421_v36 = vpack.c.bf16 %v9011_v0, %v9009_v50  ;;  %1539 = vmatprep.mubr.f32.mxu0 %v12935_v35  ;;  %9032 = vtanh.f32 %v1170_v63  ;;  %v1265_v19 = vadd.f32 %v10677_v33, %v1113_v24  ;;  %v1083_v25 = vadd.f32 %v955_v22, %v639_v27 }
  0xf8   : > { %v9015_v44 = vpop.eup %9014  ;;  %8160 = vmatmul.mubr.msk.f32.gmra.mrb[4].mxu1 %vm1444_vm0, %v10837_v29  ;;  %9034 = vtanh.f32 %v1202_v23  ;;  %v1115_v62 = vadd.f32 %v987_v61, %v671_v38  ;;  %v668_v46 = vmul.f32 %v12931_v11, %v10601_v21  ;;  %v952_v13 = vmul.f32 %v12932_v47, %v10627_v42 }
  0xf9   : > { %v9017_v8 = vpop.eup %9016  ;;  %8422 = vmatprep.subr.bf16.mxu1 %v8421_v36  ;;  %v8415_v5 = vpack.c.bf16 %v9015_v44, %v9013_v41  ;;  %1628 = vmatprep.mubr.f32.mxu1 %v12935_v35  ;;  %9036 = vtanh.f32 %v1233_v6  ;;  %v1235_v39 = vadd.f32 %v10679_v7, %v1083_v25  ;;  %v984_v4 = vmul.f32 %v12932_v47, %v10625_v17  ;;  %v12936_v6 = vld [vmem:[#allocation32_spill] sm:$0xff] }
  0xfa   : > { %v9019_v63 = vpop.eup %9018  ;;  %8157 = vmatmul.mubr.msk.f32.gmra.mrb[6].mxu0 %vm1444_vm0, %v10862_v18  ;;  %9038 = vtanh.f32 %v1265_v19  ;;  %v1267_v30 = vadd.f32 %v10677_v33, %v1115_v62  ;;  %v1080_v32 = vadd.f32 %v952_v13, %v636_v16  ;;  %v638_v1 = vmul.f32 %v12933_v10, %v10603_v20  ;;  %v12937_v62 = vld [vmem:[#allocation33_spill] sm:$0xff] }
  0xfb   : > { %v9021_v3 = vpop.eup %9020  ;;  %8416 = vmatpush1.bf16.msra.mxu0 %v8415_v5  ;;  %v8423_v27 = vpack.c.bf16 %v9019_v63, %v9017_v8  ;;  %1699 = vmatprep.mubr.f32.mxu0 %v12935_v35  ;;  %9040 = vtanh.f32 %v1235_v39  ;;  %v1112_v40 = vadd.f32 %v984_v4, %v668_v46  ;;  %v670_v23 = vmul.f32 %v12933_v10, %v10601_v21  ;;  %v12938_v4 = vld [vmem:[#allocation34_spill] sm:$0xff] }
  0xfc   : > { %v9023_v37 = vpop.eup %9022  ;;  %8161 = vmatmul.mubr.msk.f32.gmra.mrb[6].mxu1 %vm1444_vm0, %v10862_v18  ;;  %9042 = vtanh.f32 %v1267_v30  ;;  %v1232_v38 = vadd.f32 %v10679_v7, %v1080_v32  ;;  %v954_v50 = vmul.f32 %v12934_v12, %v10627_v42  ;;  %v986_v60 = vmul.f32 %v12934_v12, %v10625_v17 }
  0xfd   : > { %v9025_v24 = vpop.eup %9024  ;;  %8424 = vmatpush1.bf16.msra.mxu1 %v8423_v27  ;;  %v8425_v22 = vpack.c.bf16 %v9023_v37, %v9021_v3  ;;  %1788 = vmatprep.mubr.f32.mxu1 %v12935_v35  ;;  %v1264_v0 = vadd.f32 %v10677_v33, %v1112_v40  ;;  %v577_v61 = vmul.f32 %v12936_v6, %v10527_v28 }
  0xfe   : > { %v9027_v16 = vpop.eup %9026  ;;  %8162 = vmatmul.mubr.msk.f32.vlgmr.msra.gmra.mrb[8].mxu0 %vm1444_vm0, %v10792_v14  ;;  %9044 = vtanh.f32 %v1232_v38  ;;  %v1082_v41 = vadd.f32 %v954_v50, %v638_v1  ;;  %v1114_v36 = vadd.f32 %v986_v60, %v670_v23  ;;  %v609_v19 = vmul.f32 %v12936_v6, %v10569_v34  ;;  %v12939_v23 = vld [vmem:[#allocation35_spill] sm:$0xff]  ;;  %v12940_v50 = vld [vmem:[#allocation36_spill] sm:$0xff] }
  0xff   : > { %v9029_v25 = vpop.eup %9028  ;;  %8426 = vmatprep.subr.bf16.mxu0 %v8425_v22  ;;  %v8433_v44 = vpack.c.bf16 %v9027_v16, %v9025_v24  ;;  %1705 = vmatprep.mubr.f32.mxu0 %v12935_v35  ;;  %9046 = vtanh.f32 %v1264_v0  ;;  %v893_v46 = vmul.f32 %v12937_v62, %v10525_v26  ;;  %v925_v13 = vmul.f32 %v12937_v62, %v10567_v45 }
 0x100   : > { %v9031_v8 = vpop.eup %9030  ;;  %8166 = vmatmul.mubr.msk.f32.vlgmr.msra.gmra.mrb[8].mxu1 %vm1444_vm0, %v10792_v14  ;;  %v1234_v5 = vadd.f32 %v10679_v7, %v1082_v41  ;;  %v1266_v39 = vadd.f32 %v10677_v33, %v1114_v36  ;;  %v579_v63 = vmul.f32 %v12938_v4, %v10527_v28  ;;  %v611_v30 = vmul.f32 %v12938_v4, %v10569_v34 }
 0x101   : > { %v9033_v32 = vpop.eup %9032  ;;  %8434 = vmatprep.subr.bf16.mxu1 %v8433_v44  ;;  %v8427_v1 = vpack.c.bf16 %v9031_v8, %v9029_v25  ;;  %1794 = vmatprep.mubr.f32.mxu1 %v12935_v35  ;;  %v1021_v3 = vadd.f32 %v893_v46, %v577_v61  ;;  %v1053_v27 = vadd.f32 %v925_v13, %v609_v19  ;;  %v12941_v25 = vld [vmem:[#allocation37_spill] sm:$0xff] }
 0x102   : > { %v9035_v40 = vpop.eup %9034  ;;  %8163 = vmatmul.mubr.msk.f32.gmra.mrb[10].mxu0 %vm1444_vm0, %v10814_v15  ;;  %9048 = vtanh.f32 %v1234_v5  ;;  %v895_v37 = vmul.f32 %v12939_v23, %v10525_v26  ;;  %v927_v38 = vmul.f32 %v12939_v23, %v10567_v45  ;;  %v576_v60 = vmul.f32 %v12940_v50, %v10527_v28  ;;  %v12942_v5 = vld [vmem:[#allocation38_spill] sm:$0xff] }
 0x103   : > { %v9037_v24 = vpop.eup %9036  ;;  %8428 = vmatpush1.bf16.msra.mxu0 %v8427_v1  ;;  %v8435_v22 = vpack.c.bf16 %v9035_v40, %v9033_v32  ;;  %9050 = vtanh.f32 %v1266_v39  ;;  %v1173_v0 = vadd.f32 %v10657_v43, %v1021_v3  ;;  %v1205_v61 = vadd.f32 %v10655_v2, %v1053_v27  ;;  %1711 = vmatprep.mubr.f32.mxu0 %v12935_v35 }
 0x104   : > { %v9039_v16 = vpop.eup %9038  ;;  %8167 = vmatmul.mubr.msk.f32.gmra.mrb[10].mxu1 %vm1444_vm0, %v10814_v15  ;;  %v1023_v41 = vadd.f32 %v895_v37, %v579_v63  ;;  %v1055_v36 = vadd.f32 %v927_v38, %v611_v30  ;;  %v608_v19 = vmul.f32 %v12940_v50, %v10569_v34  ;;  %v892_v44 = vmul.f32 %v12941_v25, %v10525_v26 }
 0x105   : > { %v9041_v46 = vpop.eup %9040  ;;  %8436 = vmatpush1.bf16.msra.mxu1 %v8435_v22  ;;  %v8429_v13 = vpack.c.bf16 %v9039_v16, %v9037_v24  ;;  %9052 = vtanh.f32 %v1173_v0  ;;  %1800 = vmatprep.mubr.f32.mxu1 %v12935_v35  ;;  %v924_v8 = vmul.f32 %v12941_v25, %v10567_v45  ;;  %v578_v39 = vmul.f32 %v12942_v5, %v10527_v28  ;;  %v12943_v24 = vld [vmem:[#allocation39_spill] sm:$0xff] }
 0x106   : > { %v9043_v63 = vpop.eup %9042  ;;  %9054 = vtanh.f32 %v1205_v61  ;;  %v1175_v30 = vadd.f32 %v10657_v43, %v1023_v41  ;;  %v1207_v32 = vadd.f32 %v10655_v2, %v1055_v36  ;;  %8164 = vmatmul.mubr.msk.f32.gmra.mrb[12].mxu0 %vm1444_vm0, %v10837_v29  ;;  %v1020_v1 = vadd.f32 %v892_v44, %v576_v60 }
 0x107   : > { %8430 = vmatprep.subr.bf16.mxu0 %v8429_v13  ;;  %v8437_v3 = vpack.c.bf16 %v9043_v63, %v9041_v46  ;;  %1717 = vmatprep.mubr.f32.mxu0 %v12935_v35  ;;  %v1052_v27 = vadd.f32 %v924_v8, %v608_v19  ;;  %v610_v40 = vmul.f32 %v12942_v5, %v10569_v34 }
 0x108   : > { %v9045_v37 = vpop.eup %9044  ;;  %9056 = vtanh.f32 %v1175_v30  ;;  %8168 = vmatmul.mubr.msk.f32.gmra.mrb[12].mxu1 %vm1444_vm0, %v10837_v29  ;;  %v1172_v38 = vadd.f32 %v10657_v43, %v1020_v1  ;;  %v894_v22 = vmul.f32 %v12943_v24, %v10525_v26  ;;  %v926_v60 = vmul.f32 %v12943_v24, %v10567_v45 }
 0x109   : > { %v9047_v0 = vpop.eup %9046  ;;  %8438 = vmatprep.subr.bf16.mxu1 %v8437_v3  ;;  %9058 = vtanh.f32 %v1207_v32  ;;  %1806 = vmatprep.mubr.f32.mxu1 %v12935_v35  ;;  %v1204_v61 = vadd.f32 %v10655_v2, %v1052_v27  ;;  %v641_v16 = vmul.f32 %v12936_v6, %v10603_v20  ;;  %v673_v41 = vmul.f32 %v12936_v6, %v10601_v21 }
 0x10a   : > { %v8431_v36 = vpack.c.bf16 %v9047_v0, %v9045_v37  ;;  %8165 = vmatmul.mubr.msk.f32.gmra.mrb[14].mxu0 %vm1444_vm0, %v10862_v18  ;;  %9060 = vtanh.f32 %v1172_v38  ;;  %v1022_v19 = vadd.f32 %v894_v22, %v578_v39  ;;  %v1054_v44 = vadd.f32 %v926_v60, %v610_v40 }
 0x10b   : > { %1877 = vmatprep.mubr.f32.mxu0 %v12935_v35  ;;  %9062 = vtanh.f32 %v1204_v61  ;;  %v957_v46 = vmul.f32 %v12937_v62, %v10627_v42  ;;  %v989_v13 = vmul.f32 %v12937_v62, %v10625_v17  ;;  %v643_v8 = vmul.f32 %v12938_v4, %v10603_v20 }
 0x10c   : > { %v9049_v63 = vpop.eup %9048  ;;  %8432 = vmatpush1.bf16.msra.mxu0 %v8431_v36  ;;  %8169 = vmatmul.mubr.msk.f32.gmra.mrb[14].mxu1 %vm1444_vm0, %v10862_v18  ;;  %v1174_v39 = vadd.f32 %v10657_v43, %v1022_v19  ;;  %v1206_v30 = vadd.f32 %v10655_v2, %v1054_v44  ;;  %v675_v32 = vmul.f32 %v12938_v4, %v10601_v21 }
 0x10d   : > { %v9051_v1 = vpop.eup %9050  ;;  %1966 = vmatprep.mubr.f32.mxu1 %v12935_v35  ;;  %v1085_v3 = vadd.f32 %v957_v46, %v641_v16  ;;  %v1117_v27 = vadd.f32 %v989_v13, %v673_v41  ;;  %v959_v40 = vmul.f32 %v12939_v23, %v10627_v42  ;;  %v991_v37 = vmul.f32 %v12939_v23, %v10625_v17  ;;  %v12949_v23 = vld [vmem:[#allocation45_spill] sm:$0xff] }
 0x10e   : > { %v8439_v38 = vpack.c.bf16 %v9051_v1, %v9049_v63  ;;  %9064 = vtanh.f32 %v1174_v39  ;;  %v640_v22 = vmul.f32 %v12940_v50, %v10603_v20  ;;  %v672_v60 = vmul.f32 %v12940_v50, %v10601_v21 }
 0x10f   : > { %v9053_v0 = vpop.eup %9052  ;;  %8170 = vmatmul.mubr.msk.f32.vlgmr.msra.gmra.mrb[16].mxu0 %vm1444_vm0, %v10792_v14  ;;  %9066 = vtanh.f32 %v1206_v30  ;;  %v1237_v61 = vadd.f32 %v10679_v7, %v1085_v3  ;;  %v1269_v16 = vadd.f32 %v10677_v33, %v1117_v27  ;;  %v1087_v41 = vadd.f32 %v959_v40, %v643_v8 }
 0x110   : > { %v9055_v36 = vpop.eup %9054  ;;  %8440 = vmatpush1.bf16.msra.mxu1 %v8439_v38  ;;  %v1119_v19 = vadd.f32 %v991_v37, %v675_v32  ;;  %1883 = vmatprep.mubr.f32.mxu0 %v12935_v35  ;;  %v956_v44 = vmul.f32 %v12941_v25, %v10627_v42  ;;  %v988_v46 = vmul.f32 %v12941_v25, %v10625_v17 }
 0x111   : > { %v8441_v13 = vpack.c.bf16 %v9055_v36, %v9053_v0  ;;  %9068 = vtanh.f32 %v1237_v61  ;;  %v1239_v63 = vadd.f32 %v10679_v7, %v1087_v41  ;;  %v642_v39 = vmul.f32 %v12942_v5, %v10603_v20  ;;  %v12944_v36 = vld [vmem:[#allocation40_spill] sm:$0xff] }
 0x112   : > { %v9057_v30 = vpop.eup %9056  ;;  %9070 = vtanh.f32 %v1269_v16  ;;  %v1271_v8 = vadd.f32 %v10677_v33, %v1119_v19  ;;  %v1084_v32 = vadd.f32 %v956_v44, %v640_v22  ;;  %v1116_v1 = vadd.f32 %v988_v46, %v672_v60 }
 0x113   : > { %v9059_v3 = vpop.eup %9058  ;;  %8442 = vmatprep.subr.bf16.mxu0 %v8441_v13  ;;  %8174 = vmatmul.mubr.msk.f32.vlgmr.msra.gmra.mrb[16].mxu1 %vm1444_vm0, %v10792_v14  ;;  %9072 = vtanh.f32 %v1239_v63  ;;  %v674_v27 = vmul.f32 %v12942_v5, %v10601_v21  ;;  %v958_v40 = vmul.f32 %v12943_v24, %v10627_v42  ;;  %v990_v37 = vmul.f32 %v12943_v24, %v10625_v17  ;;  %v12945_v13 = vld [vmem:[#allocation41_spill] sm:$0xff] }
 0x114   : > { %v9061_v38 = vpop.eup %9060  ;;  %v8449_v0 = vpack.c.bf16 %v9059_v3, %v9057_v30  ;;  %9074 = vtanh.f32 %v1271_v8  ;;  %1972 = vmatprep.mubr.f32.mxu1 %v12935_v35  ;;  %8171 = vmatmul.mubr.msk.f32.gmra.mrb[18].mxu0 %vm1444_vm0, %v10814_v15  ;;  %v1236_v22 = vadd.f32 %v10679_v7, %v1084_v32  ;;  %v1268_v60 = vadd.f32 %v10677_v33, %v1116_v1  ;;  %v12946_v32 = vld [vmem:[#allocation42_spill] sm:$0xff] }
 0x115   : > { %v9063_v61 = vpop.eup %9062  ;;  %v1086_v16 = vadd.f32 %v958_v40, %v642_v39  ;;  %v1118_v41 = vadd.f32 %v990_v37, %v674_v27  ;;  %v581_v19 = vmul.f32 %v12944_v36, %v10527_v28  ;;  %v613_v44 = vmul.f32 %v12944_v36, %v10569_v34  ;;  %1889 = vmatprep.mubr.f32.mxu0 %v12935_v35 }
 0x116   : > { %8450 = vmatprep.subr.bf16.mxu1 %v8449_v0  ;;  %v8443_v46 = vpack.c.bf16 %v9063_v61, %v9061_v38  ;;  %9076 = vtanh.f32 %v1236_v22  ;;  %v897_v63 = vmul.f32 %v12945_v13, %v10525_v26  ;;  %v929_v30 = vmul.f32 %v12945_v13, %v10567_v45  ;;  %v12947_v38 = vld [vmem:[#allocation43_spill] sm:$0xff]  ;;  %v12948_v61 = vld [vmem:[#allocation44_spill] sm:$0xff] }
 0x117   : > { %8175 = vmatmul.mubr.msk.f32.gmra.mrb[18].mxu1 %vm1444_vm0, %v10814_v15  ;;  %9078 = vtanh.f32 %v1268_v60  ;;  %v1238_v39 = vadd.f32 %v10679_v7, %v1086_v16  ;;  %v1270_v8 = vadd.f32 %v10677_v33, %v1118_v41  ;;  %v583_v1 = vmul.f32 %v12946_v32, %v10527_v28 }
 0x118   : > { %v9065_v3 = vpop.eup %9064  ;;  %8444 = vmatpush1.bf16.msra.mxu0 %v8443_v46  ;;  %v1025_v27 = vadd.f32 %v897_v63, %v581_v19  ;;  %v1057_v40 = vadd.f32 %v929_v30, %v613_v44  ;;  %v615_v37 = vmul.f32 %v12946_v32, %v10569_v34  ;;  %v899_v0 = vmul.f32 %v12947_v38, %v10525_v26 }
 0x119   : > { %v9067_v22 = vpop.eup %9066  ;;  %9080 = vtanh.f32 %v1238_v39  ;;  %v931_v60 = vmul.f32 %v12947_v38, %v10567_v45  ;;  %1978 = vmatprep.mubr.f32.mxu1 %v12935_v35  ;;  %8172 = vmatmul.mubr.msk.f32.gmra.mrb[20].mxu0 %vm1444_vm0, %v10837_v29  ;;  %v580_v16 = vmul.f32 %v12948_v61, %v10527_v28  ;;  %v612_v41 = vmul.f32 %v12948_v61, %v10569_v34 }
 0x11a   : > { %v8451_v19 = vpack.c.bf16 %v9067_v22, %v9065_v3  ;;  %9082 = vtanh.f32 %v1270_v8  ;;  %v1177_v44 = vadd.f32 %v10657_v43, %v1025_v27  ;;  %v1209_v46 = vadd.f32 %v10655_v2, %v1057_v40  ;;  %1895 = vmatprep.mubr.f32.mxu0 %v12935_v35  ;;  %v12950_v8 = vld [vmem:[#allocation46_spill] sm:$0xff]  ;;  %v12951_v40 = vld [vmem:[#allocation47_spill] sm:$0xff] }
 0x11b   : > { %v9069_v63 = vpop.eup %9068  ;;  %v1027_v30 = vadd.f32 %v899_v0, %v583_v1  ;;  %v1059_v39 = vadd.f32 %v931_v60, %v615_v37  ;;  %8176 = vmatmul.mubr.msk.f32.gmra.mrb[20].mxu1 %vm1444_vm0, %v10837_v29  ;;  %v896_v24 = vmul.f32 %v12949_v23, %v10525_v26  ;;  %v928_v62 = vmul.f32 %v12949_v23, %v10567_v45 }
 0x11c   : > { %v9071_v3 = vpop.eup %9070  ;;  %8452 = vmatpush1.bf16.msra.mxu1 %v8451_v19  ;;  %9084 = vtanh.f32 %v1177_v44  ;;  %1984 = vmatprep.mubr.f32.mxu1 %v12935_v35  ;;  %v582_v27 = vmul.f32 %v12950_v8, %v10527_v28  ;;  %v614_v1 = vmul.f32 %v12950_v8, %v10569_v34  ;;  %v898_v37 = vmul.f32 %v12951_v40, %v10525_v26 }
 0x11d   : > { %v9073_v0 = vpop.eup %9072  ;;  %v8445_v22 = vpack.c.bf16 %v9071_v3, %v9069_v63  ;;  %9086 = vtanh.f32 %v1209_v46  ;;  %v1179_v60 = vadd.f32 %v10657_v43, %v1027_v30  ;;  %v1211_v25 = vadd.f32 %v10655_v2, %v1059_v39  ;;  %8173 = vmatmul.mubr.msk.f32.gmra.mrb[22].mxu0 %vm1444_vm0, %v10862_v18 }
 0x11e   : > { %v9075_v19 = vpop.eup %9074  ;;  %2055 = vmatprep.mubr.f32.mxu0 %v12935_v35  ;;  %v1024_v44 = vadd.f32 %v896_v24, %v580_v16  ;;  %v1056_v4 = vadd.f32 %v928_v62, %v612_v41  ;;  %v930_v5 = vmul.f32 %v12951_v40, %v10567_v45  ;;  %v1026_v6 = vadd.f32 %v898_v37, %v582_v27 }
 0x11f   : > { %8446 = vmatprep.subr.bf16.mxu0 %v8445_v22  ;;  %v8453_v50 = vpack.c.bf16 %v9075_v19, %v9073_v0  ;;  %9088 = vtanh.f32 %v1179_v60  ;;  %8177 = vmatmul.mubr.msk.f32.gmra.mrb[22].mxu1 %vm1444_vm0, %v10862_v18  ;;  %v645_v46 = vmul.f32 %v12944_v36, %v10603_v20  ;;  %v677_v63 = vmul.f32 %v12944_v36, %v10601_v21 }
 0x120   : > { %v9077_v30 = vpop.eup %9076  ;;  %9090 = vtanh.f32 %v1211_v25  ;;  %2144 = vmatprep.mubr.f32.mxu1 %v12935_v35  ;;  %v1176_v62 = vadd.f32 %v10657_v43, %v1024_v44  ;;  %v1208_v24 = vadd.f32 %v10655_v2, %v1056_v4  ;;  %v1058_v16 = vadd.f32 %v930_v5, %v614_v1 }
 0x121   : > { %v9079_v41 = vpop.eup %9078  ;;  %8454 = vmatprep.subr.bf16.mxu1 %v8453_v50  ;;  %v1178_v39 = vadd.f32 %v10657_v43, %v1026_v6  ;;  %v961_v3 = vmul.f32 %v12945_v13, %v10627_v42  ;;  %v993_v27 = vmul.f32 %v12945_v13, %v10625_v17  ;;  %v647_v25 = vmul.f32 %v12946_v32, %v10603_v20 }
 0x122   : > { %v8447_v37 = vpack.c.bf16 %v9079_v41, %v9077_v30  ;;  %9092 = vtanh.f32 %v1176_v62  ;;  %v1210_v0 = vadd.f32 %v10655_v2, %v1058_v16  ;;  %v679_v4 = vmul.f32 %v12946_v32, %v10601_v21 }
 0x123   : > { %v9081_v5 = vpop.eup %9080  ;;  %9094 = vtanh.f32 %v1208_v24  ;;  %v1089_v50 = vadd.f32 %v961_v3, %v645_v46  ;;  %v1121_v6 = vadd.f32 %v993_v27, %v677_v63  ;;  %v963_v1 = vmul.f32 %v12947_v38, %v10627_v42 }
 0x124   : > { %v9083_v22 = vpop.eup %9082  ;;  %8448 = vmatpush1.bf16.msra.mxu0 %v8447_v37  ;;  %9096 = vtanh.f32 %v1178_v39  ;;  %v995_v60 = vmul.f32 %v12947_v38, %v10625_v17  ;;  %v644_v19 = vmul.f32 %v12948_v61, %v10603_v20  ;;  %v676_v44 = vmul.f32 %v12948_v61, %v10601_v21 }
 0x125   : > { %v8455_v30 = vpack.c.bf16 %v9083_v22, %v9081_v5  ;;  %9098 = vtanh.f32 %v1210_v0  ;;  %v1241_v46 = vadd.f32 %v10679_v7, %v1089_v50  ;;  %v1273_v63 = vadd.f32 %v10677_v33, %v1121_v6 }
 0x126   : > { %v9085_v62 = vpop.eup %9084  ;;  %v1091_v24 = vadd.f32 %v963_v1, %v647_v25  ;;  %v1123_v16 = vadd.f32 %v995_v60, %v679_v4  ;;  %v960_v41 = vmul.f32 %v12949_v23, %v10627_v42  ;;  %v992_v39 = vmul.f32 %v12949_v23, %v10625_v17 }
 0x127   : > { %v9087_v3 = vpop.eup %9086  ;;  %8456 = vmatpush1.bf16.msra.mxu1 %v8455_v30  ;;  %8178 = vmatmul.mubr.msk.f32.vlgmr.msra.gmra.mrb[24].mxu0 %vm1444_vm0, %v10792_v14  ;;  %9100 = vtanh.f32 %v1241_v46  ;;  %v646_v27 = vmul.f32 %v12950_v8, %v10603_v20  ;;  %v678_v37 = vmul.f32 %v12950_v8, %v10601_v21  ;;  %v962_v25 = vmul.f32 %v12951_v40, %v10627_v42  ;;  %v12952_v46 = vld [vmem:[#allocation48_spill] sm:$0xff] }
 0x128   : > { %v8457_v0 = vpack.c.bf16 %v9087_v3, %v9085_v62  ;;  %9102 = vtanh.f32 %v1273_v63  ;;  %v1243_v4 = vadd.f32 %v10679_v7, %v1091_v24  ;;  %v1275_v5 = vadd.f32 %v10677_v33, %v1123_v16  ;;  %2061 = vmatprep.mubr.f32.mxu0 %v12935_v35  ;;  %v12953_v24 = vld [vmem:[#allocation49_spill] sm:$0xff] }
 0x129   : > { %v9089_v50 = vpop.eup %9088  ;;  %v1088_v6 = vadd.f32 %v960_v41, %v644_v19  ;;  %v1120_v1 = vadd.f32 %v992_v39, %v676_v44  ;;  %v994_v22 = vmul.f32 %v12951_v40, %v10625_v17  ;;  %v1090_v60 = vadd.f32 %v962_v25, %v646_v27 }
 0x12a   : > { %v9091_v30 = vpop.eup %9090  ;;  %8458 = vmatprep.subr.bf16.mxu0 %v8457_v0  ;;  %8182 = vmatmul.mubr.msk.f32.vlgmr.msra.gmra.mrb[24].mxu1 %vm1444_vm0, %v10792_v14  ;;  %9104 = vtanh.f32 %v1243_v4  ;;  %v585_v63 = vmul.f32 %v12952_v46, %v10527_v28  ;;  %v617_v62 = vmul.f32 %v12952_v46, %v10569_v34  ;;  %v901_v19 = vmul.f32 %v12953_v24, %v10525_v26 }
 0x12b   : > { %v8465_v44 = vpack.c.bf16 %v9091_v30, %v9089_v50  ;;  %9106 = vtanh.f32 %v1275_v5  ;;  %2150 = vmatprep.mubr.f32.mxu1 %v12935_v35  ;;  %8179 = vmatmul.mubr.msk.f32.gmra.mrb[26].mxu0 %vm1444_vm0, %v10814_v15  ;;  %v1240_v16 = vadd.f32 %v10679_v7, %v1088_v6  ;;  %v1272_v41 = vadd.f32 %v10677_v33, %v1120_v1  ;;  %v12954_v5 = vld [vmem:[#allocation50_spill] sm:$0xff]  ;;  %v12955_v1 = vld [vmem:[#allocation51_spill] sm:$0xff] }
 0x12c   : > { %v9093_v39 = vpop.eup %9092  ;;  %v1122_v3 = vadd.f32 %v994_v22, %v678_v37  ;;  %v1242_v27 = vadd.f32 %v10679_v7, %v1090_v60  ;;  %v933_v25 = vmul.f32 %v12953_v24, %v10567_v45  ;;  %v1029_v0 = vadd.f32 %v901_v19, %v585_v63  ;;  %2067 = vmatprep.mubr.f32.mxu0 %v12935_v35 }
 0x12d   : > { %v9095_v4 = vpop.eup %9094  ;;  %8466 = vmatprep.subr.bf16.mxu1 %v8465_v44  ;;  %9108 = vtanh.f32 %v1240_v16  ;;  %v587_v50 = vmul.f32 %v12954_v5, %v10527_v28  ;;  %v619_v6 = vmul.f32 %v12954_v5, %v10569_v34  ;;  %v903_v37 = vmul.f32 %v12955_v1, %v10525_v26 }
 0x12e   : > { %v9097_v22 = vpop.eup %9096  ;;  %v8459_v60 = vpack.c.bf16 %v9095_v4, %v9093_v39  ;;  %8183 = vmatmul.mubr.msk.f32.gmra.mrb[26].mxu1 %vm1444_vm0, %v10814_v15  ;;  %9110 = vtanh.f32 %v1272_v41  ;;  %v1274_v30 = vadd.f32 %v10677_v33, %v1122_v3  ;;  %v1061_v63 = vadd.f32 %v933_v25, %v617_v62  ;;  %v12956_v62 = vld [vmem:[#allocation52_spill] sm:$0xff] }
 0x12f   : > { %v9099_v19 = vpop.eup %9098  ;;  %9112 = vtanh.f32 %v1242_v27  ;;  %v1181_v44 = vadd.f32 %v10657_v43, %v1029_v0  ;;  %v935_v16 = vmul.f32 %v12955_v1, %v10567_v45  ;;  %v1031_v38 = vadd.f32 %v903_v37, %v587_v50  ;;  %2156 = vmatprep.mubr.f32.mxu1 %v12935_v35  ;;  %8180 = vmatmul.mubr.msk.f32.gmra.mrb[28].mxu0 %vm1444_vm0, %v10837_v29  ;;  %v12957_v37 = vld [vmem:[#allocation53_spill] sm:$0xff] }
 0x130   : > { %8460 = vmatpush1.bf16.msra.mxu0 %v8459_v60  ;;  %v8467_v39 = vpack.c.bf16 %v9099_v19, %v9097_v22  ;;  %9114 = vtanh.f32 %v1274_v30  ;;  %v1213_v41 = vadd.f32 %v10655_v2, %v1061_v63  ;;  %2073 = vmatprep.mubr.f32.mxu0 %v12935_v35  ;;  %v584_v3 = vmul.f32 %v12956_v62, %v10527_v28  ;;  %v12958_v30 = vld [vmem:[#allocation54_spill] sm:$0xff] }
 0x131   : > { %v9101_v27 = vpop.eup %9100  ;;  %9116 = vtanh.f32 %v1181_v44  ;;  %v1063_v25 = vadd.f32 %v935_v16, %v619_v6  ;;  %v1183_v0 = vadd.f32 %v10657_v43, %v1031_v38  ;;  %v616_v4 = vmul.f32 %v12956_v62, %v10569_v34 }
 0x132   : > { %v9103_v50 = vpop.eup %9102  ;;  %8468 = vmatpush1.bf16.msra.mxu1 %v8467_v39  ;;  %9118 = vtanh.f32 %v1213_v41  ;;  %v900_v22 = vmul.f32 %v12957_v37, %v10525_v26  ;;  %v932_v60 = vmul.f32 %v12957_v37, %v10567_v45  ;;  %v586_v63 = vmul.f32 %v12958_v30, %v10527_v28  ;;  %v12959_v41 = vld [vmem:[#allocation55_spill] sm:$0xff] }
 0x133   : > { %v8461_v19 = vpack.c.bf16 %v9103_v50, %v9101_v27  ;;  %v1215_v6 = vadd.f32 %v10655_v2, %v1063_v25  ;;  %9120 = vtanh.f32 %v1183_v0  ;;  %8184 = vmatmul.mubr.msk.f32.gmra.mrb[28].mxu1 %vm1444_vm0, %v10837_v29  ;;  %8181 = vmatmul.mubr.msk.f32.gmra.mrb[30].mxu0 %vm1444_vm0, %v10862_v18  ;;  %v618_v38 = vmul.f32 %v12958_v30, %v10569_v34 }
 0x134   : > { %v9105_v44 = vpop.eup %9104  ;;  %2162 = vmatprep.mubr.f32.mxu1 %v12935_v35  ;;  %2233 = vmatprep.mubr.f32.mxu0 %v12935_v35  ;;  %v1028_v16 = vadd.f32 %v900_v22, %v584_v3  ;;  %v1060_v39 = vadd.f32 %v932_v60, %v616_v4  ;;  %v902_v27 = vmul.f32 %v12959_v41, %v10525_v26 }
 0x135   : > { %v9107_v25 = vpop.eup %9106  ;;  %8462 = vmatprep.subr.bf16.mxu0 %v8461_v19  ;;  %9122 = vtanh.f32 %v1215_v6  ;;  %v934_v0 = vmul.f32 %v12959_v41, %v10567_v45  ;;  %v649_v50 = vmul.f32 %v12952_v46, %v10603_v20  ;;  %v681_v40 = vmul.f32 %v12952_v46, %v10601_v21 }
 0x136   : > { %v8469_v13 = vpack.c.bf16 %v9107_v25, %v9105_v44  ;;  %v1180_v23 = vadd.f32 %v10657_v43, %v1028_v16  ;;  %v1212_v3 = vadd.f32 %v10655_v2, %v1060_v39  ;;  %v1030_v4 = vadd.f32 %v902_v27, %v586_v63 }
 0x137   : > { %v9109_v22 = vpop.eup %9108  ;;  %8185 = vmatmul.mubr.msk.f32.gmra.mrb[30].mxu1 %vm1444_vm0, %v10862_v18  ;;  %v1062_v60 = vadd.f32 %v934_v0, %v618_v38  ;;  %v965_v19 = vmul.f32 %v12953_v24, %v10627_v42  ;;  %v997_v6 = vmul.f32 %v12953_v24, %v10625_v17  ;;  %v651_v46 = vmul.f32 %v12954_v5, %v10603_v20 }
 0x138   : > { %v9111_v44 = vpop.eup %9110  ;;  %8470 = vmatprep.subr.bf16.mxu1 %v8469_v13  ;;  %2322 = vmatprep.mubr.f32.mxu1 %v12935_v35  ;;  %9124 = vtanh.f32 %v1180_v23  ;;  %v1182_v63 = vadd.f32 %v10657_v43, %v1030_v4  ;;  %v683_v16 = vmul.f32 %v12954_v5, %v10601_v21  ;;  %v967_v38 = vmul.f32 %v12955_v1, %v10627_v42 }
 0x139   : > { %v9113_v39 = vpop.eup %9112  ;;  %v8463_v27 = vpack.c.bf16 %v9111_v44, %v9109_v22  ;;  %9126 = vtanh.f32 %v1212_v3  ;;  %v1214_v25 = vadd.f32 %v10655_v2, %v1062_v60  ;;  %v1093_v0 = vadd.f32 %v965_v19, %v649_v50 }
 0x13a   : > { %v9115_v24 = vpop.eup %9114  ;;  %9128 = vtanh.f32 %v1182_v63  ;;  %v1125_v13 = vadd.f32 %v997_v6, %v681_v40  ;;  %v999_v23 = vmul.f32 %v12955_v1, %v10625_v17  ;;  %v1095_v32 = vadd.f32 %v967_v38, %v651_v46 }
 0x13b   : > { %v9117_v4 = vpop.eup %9116  ;;  %8464 = vmatpush1.bf16.msra.mxu0 %v8463_v27  ;;  %v8471_v8 = vpack.c.bf16 %v9115_v24, %v9113_v39  ;;  %9130 = vtanh.f32 %v1214_v25  ;;  %v1245_v5 = vadd.f32 %v10679_v7, %v1093_v0  ;;  %v648_v22 = vmul.f32 %v12956_v62, %v10603_v20  ;;  %v12960_v0 = vld [vmem:[#allocation56_spill] sm:$0xff] }
 0x13c   : > { %v9119_v3 = vpop.eup %9118  ;;  %v1277_v60 = vadd.f32 %v10677_v33, %v1125_v13  ;;  %v1127_v50 = vadd.f32 %v999_v23, %v683_v16  ;;  %v1247_v19 = vadd.f32 %v10679_v7, %v1095_v32  ;;  %v680_v40 = vmul.f32 %v12956_v62, %v10601_v21 }
 0x13d   : > { %v9121_v6 = vpop.eup %9120  ;;  %8472 = vmatpush1.bf16.msra.mxu1 %v8471_v8  ;;  %v8473_v46 = vpack.c.bf16 %v9119_v3, %v9117_v4  ;;  %9132 = vtanh.f32 %v1245_v5  ;;  %v964_v24 = vmul.f32 %v12957_v37, %v10627_v42  ;;  %v996_v44 = vmul.f32 %v12957_v37, %v10625_v17 }
 0x13e   : > { %8186 = vmatmul.mubr.msk.f32.vlgmr.msra.gmra.mrb[32].mxu0 %vm1444_vm0, %v10792_v14  ;;  %9134 = vtanh.f32 %v1277_v60  ;;  %v1279_v63 = vadd.f32 %v10677_v33, %v1127_v50  ;;  %v650_v32 = vmul.f32 %v12958_v30, %v10603_v20  ;;  %v682_v8 = vmul.f32 %v12958_v30, %v10601_v21  ;;  %v12961_v50 = vld [vmem:[#allocation57_spill] sm:$0xff] }
 0x13f   : > { %v9123_v16 = vpop.eup %9122  ;;  %8474 = vmatprep.subr.bf16.mxu0 %v8473_v46  ;;  %9136 = vtanh.f32 %v1247_v19  ;;  %2239 = vmatprep.mubr.f32.mxu0 %v12935_v35  ;;  %v1092_v5 = vadd.f32 %v964_v24, %v648_v22  ;;  %v1124_v38 = vadd.f32 %v996_v44, %v680_v40  ;;  %v966_v39 = vmul.f32 %v12959_v41, %v10627_v42  ;;  %v11222_v24 = vld [vmem:[%s10357_s17 + $0x18] sm:$0xff] }
 0x140   : > { %v8481_v27 = vpack.c.bf16 %v9123_v16, %v9121_v6  ;;  %8190 = vmatmul.mubr.msk.f32.vlgmr.msra.gmra.mrb[32].mxu1 %vm1444_vm0, %v10792_v14  ;;  %9138 = vtanh.f32 %v1279_v63  ;;  %v998_v25 = vmul.f32 %v12959_v41, %v10625_v17  ;;  %v589_v13 = vmul.f32 %v12960_v0, %v10527_v28  ;;  %v12962_v44 = vld [vmem:[#allocation11_spill] sm:$0xff] }
 0x141   : > { %2328 = vmatprep.mubr.f32.mxu1 %v12935_v35  ;;  %v1244_v23 = vadd.f32 %v10679_v7, %v1092_v5  ;;  %v1276_v4 = vadd.f32 %v10677_v33, %v1124_v38  ;;  %v1094_v22 = vadd.f32 %v966_v39, %v650_v32  ;;  %v621_v3 = vmul.f32 %v12960_v0, %v10569_v34  ;;  %v11229_v32 = vld [vmem:[%s10270_s15 + $0x18] sm:$0xff] }
 0x142   : > { %v9125_v14 = vpop.eup %9124  ;;  %8482 = vmatprep.subr.bf16.mxu1 %v8481_v27  ;;  %8187 = vmatmul.mubr.msk.f32.gmra.mrb[34].mxu0 %vm1444_vm0, %v10814_v15  ;;  %v1126_v60 = vadd.f32 %v998_v25, %v682_v8  ;;  %v905_v19 = vmul.f32 %v12961_v50, %v10525_v26  ;;  %v937_v40 = vmul.f32 %v12961_v50, %v10567_v45 }
 0x143   : > { %v9127_v6 = vpop.eup %9126  ;;  %9140 = vtanh.f32 %v1244_v23  ;;  %v1246_v46 = vadd.f32 %v10679_v7, %v1094_v22  ;;  %v11226_v63 = vrot.slane %v11222_v24, %v12962_v44  ;;  %v11233_v8 = vrot.slane %v11229_v32, %v12962_v44  ;;  %2245 = vmatprep.mubr.f32.mxu0 %v12935_v35 }
 0x144   : > { %v9129_v16 = vpop.eup %9128  ;;  %v8475_v5 = vpack.c.bf16 %v9127_v6, %v9125_v14  ;;  %8191 = vmatmul.mubr.msk.f32.gmra.mrb[34].mxu1 %vm1444_vm0, %v10814_v15  ;;  %9142 = vtanh.f32 %v1276_v4  ;;  %v1278_v38 = vadd.f32 %v10677_v33, %v1126_v60  ;;  %v1033_v39 = vadd.f32 %v905_v19, %v589_v13  ;;  %v12965_v19 = vld [vmem:[#allocation12_spill] sm:$0xff] }
 0x145   : > { %12963 = vst [vmem:[#allocation26_spill] sm:$0xff] %v11226_v63  ;;  %12964 = vst [vmem:[#allocation28_spill] sm:$0xff] %v11233_v8  ;;  %v9131_v27 = vpop.eup %9130  ;;  %9144 = vtanh.f32 %v1246_v46  ;;  %v1065_v25 = vadd.f32 %v937_v40, %v621_v3  ;;  %v591_v23 = vmul.f32 %v11226_v63, %v10527_v28  ;;  %v623_v22 = vmul.f32 %v11226_v63, %v10569_v34 }
 0x146   : > { %2334 = vmatprep.mubr.f32.mxu1 %v12935_v35  ;;  %8476 = vmatpush1.bf16.msra.mxu0 %v8475_v5  ;;  %v8483_v14 = vpack.c.bf16 %v9131_v27, %v9129_v16  ;;  %9146 = vtanh.f32 %v1278_v38  ;;  %v1185_v15 = vadd.f32 %v10657_v43, %v1033_v39  ;;  %v907_v4 = vmul.f32 %v11233_v8, %v10525_v26  ;;  %v12968_v5 = vld [vmem:[#allocation13_spill] sm:$0xff] }
 0x147   : > { %v9133_v13 = vpop.eup %9132  ;;  %v1217_v60 = vadd.f32 %v10655_v2, %v1065_v25  ;;  %v939_v3 = vmul.f32 %v11233_v8, %v10567_v45  ;;  %8188 = vmatmul.mubr.msk.f32.gmra.mrb[36].mxu0 %vm1444_vm0, %v10837_v29  ;;  %v11254_v40 = vrot.slane %v11222_v24, %v12965_v19  ;;  %v11258_v6 = vrot.slane %v11229_v32, %v12965_v19 }
 0x148   : > { %v9135_v46 = vpop.eup %9134  ;;  %8484 = vmatpush1.bf16.msra.mxu1 %v8483_v14  ;;  %9148 = vtanh.f32 %v1185_v15  ;;  %v1035_v16 = vadd.f32 %v907_v4, %v591_v23  ;;  %2251 = vmatprep.mubr.f32.mxu0 %v12935_v35  ;;  %v11263_v38 = vrot.slane %v11222_v24, %v12968_v5  ;;  %v11267_v39 = vrot.slane %v11229_v32, %v12968_v5 }
 0x149   : > { %12966 = vst [vmem:[#allocation29_spill] sm:$0xff] %v11254_v40  ;;  %12967 = vst [vmem:[#allocation30_spill] sm:$0xff] %v11258_v6  ;;  %v9137_v27 = vpop.eup %9136  ;;  %v8477_v25 = vpack.c.bf16 %v9135_v46, %v9133_v13  ;;  %9150 = vtanh.f32 %v1217_v60  ;;  %v1067_v1 = vadd.f32 %v939_v3, %v623_v22  ;;  %8192 = vmatmul.mubr.msk.f32.gmra.mrb[36].mxu1 %vm1444_vm0, %v10837_v29 }
 0x14a   : > { %12969 = vst [vmem:[#allocation11_spill] sm:$0xff] %v11263_v38  ;;  %12970 = vst [vmem:[#allocation12_spill] sm:$0xff] %v11267_v39  ;;  %v588_v23 = vmul.f32 %v11254_v40, %v10527_v28  ;;  %v9139_v14 = vpop.eup %9138  ;;  %v1187_v15 = vadd.f32 %v10657_v43, %v1035_v16  ;;  %2340 = vmatprep.mubr.f32.mxu1 %v12935_v35  ;;  %v620_v4 = vmul.f32 %v11254_v40, %v10569_v34 }
 0x14b   : > { %v904_v41 = vmul.f32 %v11258_v6, %v10525_v26  ;;  %v936_v22 = vmul.f32 %v11258_v6, %v10567_v45  ;;  %8478 = vmatprep.subr.bf16.mxu0 %v8477_v25  ;;  %v8485_v13 = vpack.c.bf16 %v9139_v14, %v9137_v27  ;;  %v1219_v29 = vadd.f32 %v10655_v2, %v1067_v1 }
 0x14c   : > { %8189 = vmatmul.mubr.msk.f32.gmra.mrb[38].mxu0 %vm1444_vm0, %v10862_v18  ;;  %v590_v60 = vmul.f32 %v11263_v38, %v10527_v28  ;;  %9152 = vtanh.f32 %v1187_v15  ;;  %v622_v16 = vmul.f32 %v11263_v38, %v10569_v34  ;;  %v906_v1 = vmul.f32 %v11267_v39, %v10525_v26 }
 0x14d   : > { %2411 = vmatprep.mubr.f32.mxu0 %v12935_v35  ;;  %v1032_v3 = vadd.f32 %v904_v41, %v588_v23  ;;  %v1064_v46 = vadd.f32 %v936_v22, %v620_v4  ;;  %v9141_v37 = vpop.eup %9140  ;;  %8486 = vmatprep.subr.bf16.mxu1 %v8485_v13  ;;  %9154 = vtanh.f32 %v1219_v29  ;;  %v938_v27 = vmul.f32 %v11267_v39, %v10567_v45 }
 0x14e   : > { %8193 = vmatmul.mubr.msk.f32.gmra.mrb[38].mxu1 %vm1444_vm0, %v10862_v18  ;;  %v653_v25 = vmul.f32 %v12960_v0, %v10603_v20  ;;  %v9143_v41 = vpop.eup %9142  ;;  %v685_v15 = vmul.f32 %v12960_v0, %v10601_v21  ;;  %v969_v18 = vmul.f32 %v12961_v50, %v10627_v42  ;;  %v1034_v13 = vadd.f32 %v906_v1, %v590_v60 }
 0x14f   : > { %2500 = vmatprep.mubr.f32.mxu1 %v12935_v35  ;;  %v1184_v23 = vadd.f32 %v10657_v43, %v1032_v3  ;;  %v1216_v14 = vadd.f32 %v10655_v2, %v1064_v46  ;;  %v9145_v4 = vpop.eup %9144  ;;  %v8479_v22 = vpack.c.bf16 %v9143_v41, %v9141_v37  ;;  %v1066_v29 = vadd.f32 %v938_v27, %v622_v16 }
 0x150   : > { %v1001_v30 = vmul.f32 %v12961_v50, %v10625_v17  ;;  %v9147_v62 = vpop.eup %9146  ;;  %v1097_v36 = vadd.f32 %v969_v18, %v653_v25  ;;  %v655_v3 = vmul.f32 %v11226_v63, %v10603_v20  ;;  %v687_v46 = vmul.f32 %v11226_v63, %v10601_v21 }
 0x151   : > { %9156 = vtanh.f32 %v1184_v23  ;;  %8480 = vmatpush1.bf16.msra.mxu0 %v8479_v22  ;;  %v8487_v0 = vpack.c.bf16 %v9147_v62, %v9145_v4  ;;  %v1186_v61 = vadd.f32 %v10657_v43, %v1034_v13  ;;  %v1218_v37 = vadd.f32 %v10655_v2, %v1066_v29 }
 0x152   : > { %9158 = vtanh.f32 %v1216_v14  ;;  %v9149_v60 = vpop.eup %9148  ;;  %v1129_v16 = vadd.f32 %v1001_v30, %v685_v15  ;;  %v1249_v1 = vadd.f32 %v10679_v7, %v1097_v36  ;;  %v971_v27 = vmul.f32 %v11233_v8, %v10627_v42  ;;  %v11326_v36 = vld [vmem:[%s12772_s5] sm:$0xff] }
 0x153   : > { %v1003_v25 = vmul.f32 %v11233_v8, %v10625_v17  ;;  %v9151_v41 = vpop.eup %9150  ;;  %8488 = vmatpush1.bf16.msra.mxu1 %v8487_v0  ;;  %9160 = vtanh.f32 %v1186_v61  ;;  %v652_v62 = vmul.f32 %v11254_v40, %v10603_v20  ;;  %v684_v23 = vmul.f32 %v11254_v40, %v10601_v21 }
 0x154   : > { %v968_v30 = vmul.f32 %v11258_v6, %v10627_v42  ;;  %v8489_v14 = vpack.c.bf16 %v9151_v41, %v9149_v60  ;;  %8194 = vmatmul.mubr.msk.f32.vlgmr.msra.gmra.mrb[40].mxu0 %vm1444_vm0, %v11326_v36  ;;  %9162 = vtanh.f32 %v1218_v37  ;;  %v1281_v61 = vadd.f32 %v10677_v33, %v1129_v16 }
 0x155   : > { %v1099_v0 = vadd.f32 %v971_v27, %v655_v3  ;;  %9164 = vtanh.f32 %v1249_v1  ;;  %v1131_v15 = vadd.f32 %v1003_v25, %v687_v46  ;;  %2417 = vmatprep.mubr.f32.mxu0 %v12935_v35  ;;  %v1000_v18 = vmul.f32 %v11258_v6, %v10625_v17  ;;  %v11349_v25 = vld [vmem:[%s12772_s5 + $0x8] sm:$0xff]  ;;  %v11414_v6 = vld [vmem:[%s12772_s5 + $0x18] sm:$0xff] }
 0x156   : > { %v1096_v4 = vadd.f32 %v968_v30, %v652_v62  ;;  %v9153_v22 = vpop.eup %9152  ;;  %8490 = vmatprep.subr.bf16.mxu0 %v8489_v14  ;;  %8198 = vmatmul.mubr.msk.f32.vlgmr.msra.gmra.mrb[40].mxu1 %vm1444_vm0, %v11326_v36  ;;  %9166 = vtanh.f32 %v1281_v61  ;;  %v654_v29 = vmul.f32 %v11263_v38, %v10603_v20  ;;  %v686_v3 = vmul.f32 %v11263_v38, %v10601_v21  ;;  %v12971_v62 = vld [vmem:[#allocation14_spill] sm:$0xff] }
 0x157   : > { %v1251_v13 = vadd.f32 %v10679_v7, %v1099_v0  ;;  %v9155_v46 = vpop.eup %9154  ;;  %v1283_v37 = vadd.f32 %v10677_v33, %v1131_v15  ;;  %2506 = vmatprep.mubr.f32.mxu1 %v12935_v35  ;;  %v1128_v60 = vadd.f32 %v1000_v18, %v684_v23  ;;  %v970_v1 = vmul.f32 %v11267_v39, %v10627_v42 }
 0x158   : > { %v1248_v16 = vadd.f32 %v10679_v7, %v1096_v4  ;;  %v8497_v27 = vpack.c.bf16 %v9155_v46, %v9153_v22  ;;  %8195 = vmatmul.mubr.msk.f32.gmra.mrb[42].mxu0 %vm1444_vm0, %v11349_v25  ;;  %v1002_v41 = vmul.f32 %v11267_v39, %v10625_v17  ;;  %v11357_v23 = vrot.slane %v11222_v24, %v12971_v62 }
 0x159   : > { %9168 = vtanh.f32 %v1251_v13  ;;  %v1280_v30 = vadd.f32 %v10677_v33, %v1128_v60  ;;  %v1098_v14 = vadd.f32 %v970_v1, %v654_v29  ;;  %v11362_v61 = vrot.slane %v11229_v32, %v12971_v62  ;;  %2423 = vmatprep.mubr.f32.mxu0 %v12935_v35  ;;  %v12974_v60 = vld [vmem:[#allocation15_spill] sm:$0xff] }
 0x15a   : > { %12972 = vst [vmem:[#allocation13_spill] sm:$0xff] %v11357_v23  ;;  %9170 = vtanh.f32 %v1283_v37  ;;  %8498 = vmatprep.subr.bf16.mxu1 %v8497_v27  ;;  %8199 = vmatmul.mubr.msk.f32.gmra.mrb[42].mxu1 %vm1444_vm0, %v11349_v25  ;;  %v1130_v15 = vadd.f32 %v1002_v41, %v686_v3  ;;  %v593_v18 = vmul.f32 %v11357_v23, %v10527_v28  ;;  %v11389_v27 = vld [vmem:[%s12772_s5 + $0x10] sm:$0xff] }
 0x15b   : > { %12973 = vst [vmem:[#allocation14_spill] sm:$0xff] %v11362_v61  ;;  %v9157_v0 = vpop.eup %9156  ;;  %9172 = vtanh.f32 %v1248_v16  ;;  %v625_v4 = vmul.f32 %v11357_v23, %v10569_v34  ;;  %v1250_v13 = vadd.f32 %v10679_v7, %v1098_v14  ;;  %v909_v29 = vmul.f32 %v11362_v61, %v10525_v26  ;;  %2512 = vmatprep.mubr.f32.mxu1 %v12935_v35 }
 0x15c   : > { %v9159_v22 = vpop.eup %9158  ;;  %9174 = vtanh.f32 %v1280_v30  ;;  %v941_v46 = vmul.f32 %v11362_v61, %v10567_v45  ;;  %v1282_v3 = vadd.f32 %v10677_v33, %v1130_v15  ;;  %v11380_v16 = vrot.slane %v11222_v24, %v12974_v60  ;;  %8196 = vmatmul.mubr.msk.f32.gmra.mrb[44].mxu0 %vm1444_vm0, %v11389_v27 }
 0x15d   : > { %v8491_v37 = vpack.c.bf16 %v9159_v22, %v9157_v0  ;;  %v11384_v1 = vrot.slane %v11229_v32, %v12974_v60  ;;  %v9161_v41 = vpop.eup %9160  ;;  %9176 = vtanh.f32 %v1250_v13  ;;  %v1037_v30 = vadd.f32 %v909_v29, %v593_v18  ;;  %2429 = vmatprep.mubr.f32.mxu0 %v12935_v35  ;;  %v12975_v0 = vld [vmem:[#allocation16_spill] sm:$0xff] }
 0x15e   : > { %v1069_v14 = vadd.f32 %v941_v46, %v625_v4  ;;  %v11396_v15 = vrot.slane %v11222_v24, %v12975_v0  ;;  %v9163_v22 = vpop.eup %9162  ;;  %9178 = vtanh.f32 %v1282_v3  ;;  %v595_v8 = vmul.f32 %v11380_v16, %v10527_v28  ;;  %8200 = vmatmul.mubr.msk.f32.gmra.mrb[44].mxu1 %vm1444_vm0, %v11389_v27 }
 0x15f   : > { %8492 = vmatpush1.bf16.msra.mxu0 %v8491_v37  ;;  %v627_v39 = vmul.f32 %v11380_v16, %v10569_v34  ;;  %v911_v13 = vmul.f32 %v11384_v1, %v10525_v26  ;;  %v9165_v18 = vpop.eup %9164  ;;  %v8499_v4 = vpack.c.bf16 %v9163_v22, %v9161_v41  ;;  %v1189_v29 = vadd.f32 %v10657_v43, %v1037_v30 }
 0x160   : > { %v1221_v46 = vadd.f32 %v10655_v2, %v1069_v14  ;;  %v943_v37 = vmul.f32 %v11384_v1, %v10567_v45  ;;  %2518 = vmatprep.mubr.f32.mxu1 %v12935_v35  ;;  %v9167_v3 = vpop.eup %9166  ;;  %8197 = vmatmul.mubr.msk.f32.gmra.mrb[46].mxu0 %vm1444_vm0, %v11414_v6  ;;  %v592_v41 = vmul.f32 %v11396_v15, %v10527_v28 }
 0x161   : > { %v1039_v50 = vadd.f32 %v911_v13, %v595_v8  ;;  %v624_v30 = vmul.f32 %v11396_v15, %v10569_v34  ;;  %v11424_v14 = vrot.slane %v11229_v32, %v12975_v0  ;;  %8500 = vmatpush1.bf16.msra.mxu1 %v8499_v4  ;;  %v8493_v8 = vpack.c.bf16 %v9167_v3, %v9165_v18  ;;  %v12976_v13 = vld [vmem:[#allocation18_spill] sm:$0xff] }
 0x162   : > { %9180 = vtanh.f32 %v1189_v29  ;;  %v1071_v22 = vadd.f32 %v943_v37, %v627_v39  ;;  %2589 = vmatprep.mubr.f32.mxu0 %v12935_v35  ;;  %v11429_v63 = vrot.slane %v11222_v24, %v12976_v13  ;;  %8201 = vmatmul.mubr.msk.f32.gmra.mrb[46].mxu1 %vm1444_vm0, %v11414_v6 }
 0x163   : > { %v9169_v38 = vpop.eup %9168  ;;  %9182 = vtanh.f32 %v1221_v46  ;;  %v1191_v40 = vadd.f32 %v10657_v43, %v1039_v50  ;;  %v908_v31 = vmul.f32 %v11424_v14, %v10525_v26  ;;  %v940_v18 = vmul.f32 %v11424_v14, %v10567_v45  ;;  %8494 = vmatprep.subr.bf16.mxu0 %v8493_v8  ;;  %2678 = vmatprep.mubr.f32.mxu1 %v12935_v35 }
 0x164   : > { %v9171_v39 = vpop.eup %9170  ;;  %v1223_v4 = vadd.f32 %v10655_v2, %v1071_v22  ;;  %v594_v24 = vmul.f32 %v11429_v63, %v10527_v28  ;;  %v626_v50 = vmul.f32 %v11429_v63, %v10569_v34  ;;  %v11446_v8 = vrot.slane %v11229_v32, %v12976_v13 }
 0x165   : > { %v9173_v29 = vpop.eup %9172  ;;  %v8501_v46 = vpack.c.bf16 %v9171_v39, %v9169_v38  ;;  %9184 = vtanh.f32 %v1191_v40  ;;  %v1036_v37 = vadd.f32 %v908_v31, %v592_v41  ;;  %v1068_v3 = vadd.f32 %v940_v18, %v624_v30 }
 0x166   : > { %v9175_v12 = vpop.eup %9174  ;;  %9186 = vtanh.f32 %v1223_v4  ;;  %v657_v22 = vmul.f32 %v11357_v23, %v10603_v20  ;;  %v689_v28 = vmul.f32 %v11357_v23, %v10601_v21  ;;  %v973_v31 = vmul.f32 %v11362_v61, %v10627_v42 }
 0x167   : > { %8502 = vmatprep.subr.bf16.mxu1 %v8501_v46  ;;  %v8495_v59 = vpack.c.bf16 %v9175_v12, %v9173_v29  ;;  %v1188_v34 = vadd.f32 %v10657_v43, %v1036_v37  ;;  %v1220_v40 = vadd.f32 %v10655_v2, %v1068_v3  ;;  %v9177_v38 = vpop.eup %9176  ;;  %v910_v32 = vmul.f32 %v11446_v8, %v10525_v26 }
 0x168   : > { %v942_v41 = vmul.f32 %v11446_v8, %v10567_v45  ;;  %v1005_v30 = vmul.f32 %v11362_v61, %v10625_v17  ;;  %v659_v12 = vmul.f32 %v11380_v16, %v10603_v20  ;;  %v9179_v18 = vpop.eup %9178  ;;  %v1101_v39 = vadd.f32 %v973_v31, %v657_v22 }
 0x169   : > { %8496 = vmatpush1.bf16.msra.mxu0 %v8495_v59  ;;  %9188 = vtanh.f32 %v1188_v34  ;;  %v691_v4 = vmul.f32 %v11380_v16, %v10601_v21  ;;  %v975_v29 = vmul.f32 %v11384_v1, %v10627_v42  ;;  %v8503_v26 = vpack.c.bf16 %v9179_v18, %v9177_v38 }
 0x16a   : > { %9190 = vtanh.f32 %v1220_v40  ;;  %v1038_v46 = vadd.f32 %v910_v32, %v594_v24  ;;  %v1070_v45 = vadd.f32 %v942_v41, %v626_v50  ;;  %v1133_v37 = vadd.f32 %v1005_v30, %v689_v28 }
 0x16b   : > { %v1253_v3 = vadd.f32 %v10679_v7, %v1101_v39  ;;  %v1007_v61 = vmul.f32 %v11384_v1, %v10625_v17  ;;  %v1103_v23 = vadd.f32 %v975_v29, %v659_v12  ;;  %8504 = vmatpush1.bf16.msra.mxu1 %v8503_v26  ;;  %v656_v24 = vmul.f32 %v11396_v15, %v10603_v20 }
 0x16c   : > { %v9181_v59 = vpop.eup %9180  ;;  %8202 = vmatmul.mubr.msk.f32.vlgmr.msra.gmra.mrb[48].mxu0 %vm1444_vm0, %v11326_v36  ;;  %v1190_v22 = vadd.f32 %v10657_v43, %v1038_v46  ;;  %v1222_v34 = vadd.f32 %v10655_v2, %v1070_v45  ;;  %v1285_v28 = vadd.f32 %v10677_v33, %v1133_v37  ;;  %v688_v32 = vmul.f32 %v11396_v15, %v10601_v21 }
 0x16d   : > { %v9183_v50 = vpop.eup %9182  ;;  %9192 = vtanh.f32 %v1253_v3  ;;  %v1135_v40 = vadd.f32 %v1007_v61, %v691_v4  ;;  %v1255_v31 = vadd.f32 %v10679_v7, %v1103_v23  ;;  %2595 = vmatprep.mubr.f32.mxu0 %v12935_v35  ;;  %v972_v43 = vmul.f32 %v11424_v14, %v10627_v42 }
 0x16e   : > { %v8505_v38 = vpack.c.bf16 %v9183_v50, %v9181_v59  ;;  %9194 = vtanh.f32 %v1190_v22  ;;  %8206 = vmatmul.mubr.msk.f32.vlgmr.msra.gmra.mrb[48].mxu1 %vm1444_vm0, %v11326_v36  ;;  %v1004_v23 = vmul.f32 %v11424_v14, %v10625_v17  ;;  %v658_v61 = vmul.f32 %v11429_v63, %v10603_v20 }
 0x16f   : > { %v9185_v2 = vpop.eup %9184  ;;  %9196 = vtanh.f32 %v1222_v34  ;;  %v1287_v41 = vadd.f32 %v10677_v33, %v1135_v40  ;;  %2684 = vmatprep.mubr.f32.mxu1 %v12935_v35  ;;  %v1100_v12 = vadd.f32 %v972_v43, %v656_v24  ;;  %v690_v18 = vmul.f32 %v11429_v63, %v10601_v21 }
 0x170   : > { %v9187_v30 = vpop.eup %9186  ;;  %8506 = vmatprep.subr.bf16.mxu0 %v8505_v38  ;;  %9198 = vtanh.f32 %v1285_v28  ;;  %v974_v39 = vmul.f32 %v11446_v8, %v10627_v42  ;;  %8203 = vmatmul.mubr.msk.f32.gmra.mrb[50].mxu0 %vm1444_vm0, %v11349_v25  ;;  %v1132_v29 = vadd.f32 %v1004_v23, %v688_v32  ;;  %v1006_v20 = vmul.f32 %v11446_v8, %v10625_v17 }
 0x171   : > { %v8513_v4 = vpack.c.bf16 %v9187_v30, %v9185_v2  ;;  %9200 = vtanh.f32 %v1255_v31  ;;  %v1252_v26 = vadd.f32 %v10679_v7, %v1100_v12  ;;  %2601 = vmatprep.mubr.f32.mxu0 %v12935_v35 }
 0x172   : > { %9202 = vtanh.f32 %v1287_v41  ;;  %v1102_v46 = vadd.f32 %v974_v39, %v658_v61  ;;  %8207 = vmatmul.mubr.msk.f32.gmra.mrb[50].mxu1 %vm1444_vm0, %v11349_v25  ;;  %v1284_v42 = vadd.f32 %v10677_v33, %v1132_v29  ;;  %v1134_v21 = vadd.f32 %v1006_v20, %v690_v18 }
 0x173   : > { %v9189_v45 = vpop.eup %9188  ;;  %8514 = vmatprep.subr.bf16.mxu1 %v8513_v4  ;;  %9204 = vtanh.f32 %v1252_v26  ;;  %2690 = vmatprep.mubr.f32.mxu1 %v12935_v35  ;;  %v11549_v4 = vpop.permute.xlu1 %1431 }
 0x174   : > { %v9191_v37 = vpop.eup %9190  ;;  %v1254_v3 = vadd.f32 %v10679_v7, %v1102_v46  ;;  %9206 = vtanh.f32 %v1284_v42  ;;  %v1286_v59 = vadd.f32 %v10677_v33, %v1134_v21  ;;  %8204 = vmatmul.mubr.msk.f32.gmra.mrb[52].mxu0 %vm1444_vm0, %v11389_v27 }
 0x175   : > { %v8507_v17 = vpack.c.bf16 %v9191_v37, %v9189_v45  ;;  %2607 = vmatprep.mubr.f32.mxu0 %v12935_v35 }
 0x176   : > { %9208 = vtanh.f32 %v1254_v3  ;;  %8208 = vmatmul.mubr.msk.f32.gmra.mrb[52].mxu1 %vm1444_vm0, %v11389_v27 }
 0x177   : > { %v9193_v22 = vpop.eup %9192  ;;  %8508 = vmatpush1.bf16.msra.mxu0 %v8507_v17  ;;  %9210 = vtanh.f32 %v1286_v59  ;;  %2696 = vmatprep.mubr.f32.mxu1 %v12935_v35 }
 0x178   : > { %v9195_v34 = vpop.eup %9194  ;;  %8205 = vmatmul.mubr.msk.f32.gmra.mrb[54].mxu0 %vm1444_vm0, %v11414_v6 }
 0x179   : > { %v9197_v7 = vpop.eup %9196  ;;  %2767 = vmatprep.mubr.f32.mxu0 %v12935_v35 }
 0x17a   : > { %v9199_v33 = vpop.eup %9198  ;;  %v8515_v24 = vpack.c.bf16 %v9197_v7, %v9195_v34  ;;  %8209 = vmatmul.mubr.msk.f32.gmra.mrb[54].mxu1 %vm1444_vm0, %v11414_v6 }
 0x17b   : > { %v9201_v50 = vpop.eup %9200  ;;  %v8509_v28 = vpack.c.bf16 %v9199_v33, %v9193_v22  ;;  %2856 = vmatprep.mubr.f32.mxu1 %v12935_v35 }
 0x17c   : > { %v9203_v40 = vpop.eup %9202  ;;  %8516 = vmatpush1.bf16.msra.mxu1 %v8515_v24 }
 0x17d   : > { %8510 = vmatprep.subr.bf16.mxu0 %v8509_v28  ;;  %v8517_v31 = vpack.c.bf16 %v9203_v40, %v9201_v50  ;;  %v9205_v38 = vpop.eup %9204  ;;  %v11561_v50 = vpop.permute.xlu1 %1441 }
 0x17e   : > { %v9207_v32 = vpop.eup %9206 }
 0x17f   : > { %8518 = vmatprep.subr.bf16.mxu1 %v8517_v31  ;;  %v8511_v2 = vpack.c.bf16 %v9207_v32, %v9205_v38 }
 0x180   : > { %v9209_v43 = vpop.eup %9208 }
 0x181   : > { %v9211_v41 = vpop.eup %9210  ;;  %8512 = vmatpush1.bf16.msra.mxu0 %v8511_v2 }
 0x182   : > { %v8519_v23 = vpack.c.bf16 %v9211_v41, %v9209_v43 }
 0x184   : > { %8520 = vmatpush1.bf16.msra.mxu1 %v8519_v23  ;;  %8210 = vmatmul.mubr.msk.f32.vlgmr.msra.gmra.mrb[56].mxu0 %vm1444_vm0, %v11326_v36 }
 0x185   : > { %2773 = vmatprep.mubr.f32.mxu0 %v12935_v35 }
 0x187   : > { %8214 = vmatmul.mubr.msk.f32.vlgmr.msra.gmra.mrb[56].mxu1 %vm1444_vm0, %v11326_v36  ;;  %v11544_v36 = vpop.permute.xlu0 %1426 }
 0x188   : > { %2862 = vmatprep.mubr.f32.mxu1 %v12935_v35  ;;  %8211 = vmatmul.mubr.msk.f32.gmra.mrb[58].mxu0 %vm1444_vm0, %v11349_v25 }
 0x189   : > { %2779 = vmatprep.mubr.f32.mxu0 %v12935_v35 }
 0x18b   : > { %8215 = vmatmul.mubr.msk.f32.gmra.mrb[58].mxu1 %vm1444_vm0, %v11349_v25  ;;  %v11555_v37 = vpop.permute.xlu0 %1436 }
 0x18c   : > { %2868 = vmatprep.mubr.f32.mxu1 %v12935_v35  ;;  %8212 = vmatmul.mubr.msk.f32.gmra.mrb[60].mxu0 %vm1444_vm0, %v11389_v27 }
 0x18d   : > { %2785 = vmatprep.mubr.f32.mxu0 %v12935_v35 }
 0x18f   : > { %8216 = vmatmul.mubr.msk.f32.gmra.mrb[60].mxu1 %vm1444_vm0, %v11389_v27 }
 0x190   : > { %2874 = vmatprep.mubr.f32.mxu1 %v12935_v35  ;;  %8213 = vmatmul.mubr.msk.f32.gmra.mrb[62].mxu0 %vm1444_vm0, %v11414_v6 }
 0x191   : > { %3115 = vmatprep.mubr.f32.mxu0 %v12935_v35 }
 0x193   : > { %8217 = vmatmul.mubr.msk.f32.gmra.mrb[62].mxu1 %vm1444_vm0, %v11414_v6 }
 0x194   : > { %3204 = vmatprep.mubr.f32.mxu1 %v12935_v35 }
 0x1c1   : > { %v1523_v25 = vpop.f32.mrb[0].mxu0 }
 0x1c2   : > { %v1524_v61 = vadd.f32 %v1523_v25, %v11544_v36  ;;  %v1525_v30 = vpop.f32.mrb[1].mxu0 }
 0x1c3   : > { %v1612_v12 = vpop.f32.mrb[0].mxu1  ;;  %v1526_v27 = vadd.f32 %v1525_v30, %v11544_v36 }
 0x1c4   : > { %9212 = vtanh.f32 %v1524_v61  ;;  %v1613_v18 = vadd.f32 %v1612_v12, %v11544_v36  ;;  %v1614_v39 = vpop.f32.mrb[1].mxu1 }
 0x1c5   : > { %9214 = vtanh.f32 %v1526_v27  ;;  %v1615_v6 = vadd.f32 %v1614_v39, %v11544_v36  ;;  %v1529_v29 = vpop.f32.mrb[2].mxu0 }
 0x1c6   : > { %9216 = vtanh.f32 %v1613_v18  ;;  %v1530_v20 = vadd.f32 %v1529_v29, %v11549_v4  ;;  %v1531_v26 = vpop.f32.mrb[3].mxu0 }
 0x1c7   : > { %9218 = vtanh.f32 %v1615_v6  ;;  %v1618_v46 = vpop.f32.mrb[2].mxu1  ;;  %v1532_v45 = vadd.f32 %v1531_v26, %v11549_v4 }
 0x1c8   : > { %9220 = vtanh.f32 %v1530_v20  ;;  %v1619_v42 = vadd.f32 %v1618_v46, %v11549_v4  ;;  %v1620_v21 = vpop.f32.mrb[3].mxu1 }
 0x1c9   : > { %9222 = vtanh.f32 %v1532_v45  ;;  %v1621_v3 = vadd.f32 %v1620_v21, %v11549_v4  ;;  %v1535_v17 = vpop.f32.mrb[4].mxu0 }
 0x1ca   : > { %9224 = vtanh.f32 %v1619_v42  ;;  %v1536_v59 = vadd.f32 %v1535_v17, %v11555_v37  ;;  %v1537_v22 = vpop.f32.mrb[5].mxu0 }
 0x1cb   : > { %9226 = vtanh.f32 %v1621_v3  ;;  %v1624_v34 = vpop.f32.mrb[4].mxu1  ;;  %v1538_v7 = vadd.f32 %v1537_v22, %v11555_v37 }
 0x1cc   : > { %9228 = vtanh.f32 %v1536_v59  ;;  %v1625_v33 = vadd.f32 %v1624_v34, %v11555_v37  ;;  %v1626_v24 = vpop.f32.mrb[5].mxu1 }
 0x1cd   : > { %9230 = vtanh.f32 %v1538_v7  ;;  %v1627_v28 = vadd.f32 %v1626_v24, %v11555_v37  ;;  %v1541_v40 = vpop.f32.mrb[6].mxu0 }
 0x1ce   : > { %v9213_v31 = vpop.eup %9212  ;;  %9232 = vtanh.f32 %v1625_v33  ;;  %v1542_v38 = vadd.f32 %v1541_v40, %v11561_v50  ;;  %v1543_v32 = vpop.f32.mrb[7].mxu0 }
 0x1cf   : > { %v9215_v43 = vpop.eup %9214  ;;  %9234 = vtanh.f32 %v1627_v28  ;;  %v1630_v2 = vpop.f32.mrb[6].mxu1  ;;  %v1544_v41 = vadd.f32 %v1543_v32, %v11561_v50 }
 0x1d0   : > { %v9217_v23 = vpop.eup %9216  ;;  %9236 = vtanh.f32 %v1542_v38  ;;  %v1631_v25 = vadd.f32 %v1630_v2, %v11561_v50  ;;  %v1632_v61 = vpop.f32.mrb[7].mxu1 }
 0x1d1   : > { %v9219_v30 = vpop.eup %9218  ;;  %9238 = vtanh.f32 %v1544_v41  ;;  %v1633_v12 = vadd.f32 %v1632_v61, %v11561_v50  ;;  %v1701_v27 = vpop.f32.mrb[8].mxu0 }
 0x1d2   : > { %v9221_v18 = vpop.eup %9220  ;;  %9240 = vtanh.f32 %v1631_v25  ;;  %v1702_v39 = vadd.f32 %v1701_v27, %v11544_v36  ;;  %v1703_v6 = vpop.f32.mrb[9].mxu0 }
 0x1d3   : > { %v9223_v29 = vpop.eup %9222  ;;  %9242 = vtanh.f32 %v1633_v12  ;;  %v1790_v20 = vpop.f32.mrb[8].mxu1  ;;  %v1704_v26 = vadd.f32 %v1703_v6, %v11544_v36  ;;  %v8523_v46 = vpack.c.bf16 %v9221_v18, %v9213_v31 }
 0x1d4   : > { %v9225_v45 = vpop.eup %9224  ;;  %9244 = vtanh.f32 %v1702_v39  ;;  %v1791_v42 = vadd.f32 %v1790_v20, %v11544_v36  ;;  %v1792_v21 = vpop.f32.mrb[9].mxu1  ;;  %v8521_v3 = vpack.c.bf16 %v9223_v29, %v9215_v43 }
 0x1d5   : > { %v9227_v17 = vpop.eup %9226  ;;  %9246 = vtanh.f32 %v1704_v26  ;;  %v1793_v59 = vadd.f32 %v1792_v21, %v11544_v36  ;;  %v1707_v22 = vpop.f32.mrb[10].mxu0  ;;  %v8531_v34 = vpack.c.bf16 %v9225_v45, %v9217_v23 }
 0x1d6   : > { %v9229_v7 = vpop.eup %9228  ;;  %9248 = vtanh.f32 %v1791_v42  ;;  %v1708_v33 = vadd.f32 %v1707_v22, %v11549_v4  ;;  %v1709_v24 = vpop.f32.mrb[11].mxu0  ;;  %8522 = vmatprep.subr.bf16.mxu0 %v8521_v3  ;;  %v8529_v28 = vpack.c.bf16 %v9227_v17, %v9219_v30 }
 0x1d7   : > { %v9231_v40 = vpop.eup %9230  ;;  %9250 = vtanh.f32 %v1793_v59  ;;  %v1796_v31 = vpop.f32.mrb[10].mxu1  ;;  %v1710_v38 = vadd.f32 %v1709_v24, %v11549_v4  ;;  %8524 = vmatpush1.bf16.msra.mxu0 %v8523_v46 }
 0x1d8   : > { %v9233_v32 = vpop.eup %9232  ;;  %9252 = vtanh.f32 %v1708_v33  ;;  %v1797_v43 = vadd.f32 %v1796_v31, %v11549_v4  ;;  %v1798_v2 = vpop.f32.mrb[11].mxu1  ;;  %8530 = vmatprep.subr.bf16.mxu1 %v8529_v28  ;;  %v11585_v28 = vld [vmem:[%s12772_s5 + $0x20] sm:$0xff] }
 0x1d9   : > { %v9235_v41 = vpop.eup %9234  ;;  %9254 = vtanh.f32 %v1710_v38  ;;  %v1799_v23 = vadd.f32 %v1798_v2, %v11549_v4  ;;  %8532 = vmatpush1.bf16.msra.mxu1 %v8531_v34  ;;  %v1713_v25 = vpop.f32.mrb[12].mxu0 }
 0x1da   : > { %v9237_v61 = vpop.eup %9236  ;;  %9256 = vtanh.f32 %v1797_v43  ;;  %v1714_v30 = vadd.f32 %v1713_v25, %v11555_v37  ;;  %v1715_v12 = vpop.f32.mrb[13].mxu0 }
 0x1db   : > { %v9239_v27 = vpop.eup %9238  ;;  %9258 = vtanh.f32 %v1799_v23  ;;  %v1802_v18 = vpop.f32.mrb[12].mxu1  ;;  %v1716_v39 = vadd.f32 %v1715_v12, %v11555_v37  ;;  %v8527_v6 = vpack.c.bf16 %v9237_v61, %v9229_v7 }
 0x1dc   : > { %v9241_v29 = vpop.eup %9240  ;;  %9260 = vtanh.f32 %v1714_v30  ;;  %v1803_v20 = vadd.f32 %v1802_v18, %v11555_v37  ;;  %v1804_v26 = vpop.f32.mrb[13].mxu1  ;;  %v8525_v46 = vpack.c.bf16 %v9239_v27, %v9231_v40  ;;  %v11596_v30 = vld [vmem:[%s12772_s5 + $0x28] sm:$0xff] }
 0x1dd   : > { %v9243_v45 = vpop.eup %9242  ;;  %9262 = vtanh.f32 %v1716_v39  ;;  %v1805_v42 = vadd.f32 %v1804_v26, %v11555_v37  ;;  %v1719_v21 = vpop.f32.mrb[14].mxu0  ;;  %v8535_v3 = vpack.c.bf16 %v9241_v29, %v9233_v32 }
 0x1de   : > { %v9245_v17 = vpop.eup %9244  ;;  %9264 = vtanh.f32 %v1803_v20  ;;  %v1720_v59 = vadd.f32 %v1719_v21, %v11561_v50  ;;  %v1721_v22 = vpop.f32.mrb[15].mxu0  ;;  %8526 = vmatprep.subr.bf16.mxu0 %v8525_v46  ;;  %v8533_v34 = vpack.c.bf16 %v9243_v45, %v9235_v41 }
 0x1df   : > { %v9247_v7 = vpop.eup %9246  ;;  %9266 = vtanh.f32 %v1805_v42  ;;  %v1808_v33 = vpop.f32.mrb[14].mxu1  ;;  %v1722_v24 = vadd.f32 %v1721_v22, %v11561_v50  ;;  %8528 = vmatpush1.bf16.msra.mxu0 %v8527_v6 }
 0x1e0   : > { %v9249_v40 = vpop.eup %9248  ;;  %9268 = vtanh.f32 %v1720_v59  ;;  %v1809_v31 = vadd.f32 %v1808_v33, %v11561_v50  ;;  %v1810_v38 = vpop.f32.mrb[15].mxu1  ;;  %8534 = vmatprep.subr.bf16.mxu1 %v8533_v34 }
 0x1e1   : > { %v9251_v32 = vpop.eup %9250  ;;  %9270 = vtanh.f32 %v1722_v24  ;;  %v1811_v43 = vadd.f32 %v1810_v38, %v11561_v50  ;;  %8536 = vmatpush1.bf16.msra.mxu1 %v8535_v3 }
 0x1e2   : > { %v9253_v2 = vpop.eup %9252  ;;  %9272 = vtanh.f32 %v1809_v31  ;;  %v1879_v41 = vpop.f32.mrb[16].mxu0  ;;  %8226 = vmatmul.mubr.msk.f32.vlgmr.msra.gmra.mrb[64].mxu0 %vm1444_vm0, %v11585_v28 }
 0x1e3   : > { %v9255_v23 = vpop.eup %9254  ;;  %9274 = vtanh.f32 %v1811_v43  ;;  %v1880_v25 = vadd.f32 %v1879_v41, %v11544_v36  ;;  %v1881_v61 = vpop.f32.mrb[17].mxu0  ;;  %3121 = vmatprep.mubr.f32.mxu0 %v12935_v35  ;;  %v8539_v12 = vpack.c.bf16 %v9253_v2, %v9245_v17  ;;  %v11609_v17 = vld [vmem:[%s12772_s5 + $0x30] sm:$0xff]  ;;  %v11624_v2 = vld [vmem:[%s12772_s5 + $0x38] sm:$0xff] }
 0x1e4   : > { %v9257_v27 = vpop.eup %9256  ;;  %v1882_v18 = vadd.f32 %v1881_v61, %v11544_v36  ;;  %8230 = vmatmul.mubr.msk.f32.vlgmr.msra.gmra.mrb[64].mxu1 %vm1444_vm0, %v11585_v28  ;;  %v8537_v39 = vpack.c.bf16 %v9255_v23, %v9247_v7 }
 0x1e5   : > { %v9259_v6 = vpop.eup %9258  ;;  %3210 = vmatprep.mubr.f32.mxu1 %v12935_v35  ;;  %v8547_v29 = vpack.c.bf16 %v9257_v27, %v9249_v40  ;;  %9276 = vtanh.f32 %v1880_v25 }
 0x1e6   : > { %v9261_v20 = vpop.eup %9260  ;;  %v1968_v26 = vpop.f32.mrb[16].mxu1  ;;  %8227 = vmatmul.mubr.msk.f32.gmra.mrb[66].mxu0 %vm1444_vm0, %v11596_v30  ;;  %8538 = vmatprep.subr.bf16.mxu0 %v8537_v39  ;;  %v8545_v46 = vpack.c.bf16 %v9259_v6, %v9251_v32  ;;  %9278 = vtanh.f32 %v1882_v18 }
 0x1e7   : > { %v9263_v45 = vpop.eup %9262  ;;  %v1969_v42 = vadd.f32 %v1968_v26, %v11544_v36  ;;  %v1970_v21 = vpop.f32.mrb[17].mxu1  ;;  %8540 = vmatpush1.bf16.msra.mxu0 %v8539_v12  ;;  %3127 = vmatprep.mubr.f32.mxu0 %v12935_v35 }
 0x1e8   : > { %v1885_v3 = vpop.f32.mrb[18].mxu0  ;;  %v9265_v59 = vpop.eup %9264  ;;  %v1971_v22 = vadd.f32 %v1970_v21, %v11544_v36  ;;  %8231 = vmatmul.mubr.msk.f32.gmra.mrb[66].mxu1 %vm1444_vm0, %v11596_v30  ;;  %8546 = vmatprep.subr.bf16.mxu1 %v8545_v46 }
 0x1e9   : > { %v1886_v34 = vadd.f32 %v1885_v3, %v11549_v4  ;;  %v1887_v7 = vpop.f32.mrb[19].mxu0  ;;  %v9267_v33 = vpop.eup %9266  ;;  %9280 = vtanh.f32 %v1969_v42  ;;  %8548 = vmatpush1.bf16.msra.mxu1 %v8547_v29  ;;  %3216 = vmatprep.mubr.f32.mxu1 %v12935_v35 }
 0x1ea   : > { %v1888_v24 = vadd.f32 %v1887_v7, %v11549_v4  ;;  %v9269_v40 = vpop.eup %9268  ;;  %9282 = vtanh.f32 %v1971_v22  ;;  %v1974_v31 = vpop.f32.mrb[18].mxu1  ;;  %8228 = vmatmul.mubr.msk.f32.gmra.mrb[68].mxu0 %vm1444_vm0, %v11609_v17 }
 0x1eb   : > { %v9271_v38 = vpop.eup %9270  ;;  %9284 = vtanh.f32 %v1886_v34  ;;  %v1975_v32 = vadd.f32 %v1974_v31, %v11549_v4  ;;  %v1976_v43 = vpop.f32.mrb[19].mxu1  ;;  %3133 = vmatprep.mubr.f32.mxu0 %v12935_v35  ;;  %v8543_v41 = vpack.c.bf16 %v9269_v40, %v9261_v20 }
 0x1ec   : > { %v9273_v23 = vpop.eup %9272  ;;  %9286 = vtanh.f32 %v1888_v24  ;;  %v1977_v25 = vadd.f32 %v1976_v43, %v11549_v4  ;;  %v1891_v61 = vpop.f32.mrb[20].mxu0  ;;  %8232 = vmatmul.mubr.msk.f32.gmra.mrb[68].mxu1 %vm1444_vm0, %v11609_v17  ;;  %v8541_v12 = vpack.c.bf16 %v9271_v38, %v9263_v45 }
 0x1ed   : > { %v9275_v27 = vpop.eup %9274  ;;  %9288 = vtanh.f32 %v1975_v32  ;;  %v1892_v18 = vadd.f32 %v1891_v61, %v11555_v37  ;;  %v1893_v39 = vpop.f32.mrb[21].mxu0  ;;  %3222 = vmatprep.mubr.f32.mxu1 %v12935_v35  ;;  %v8551_v6 = vpack.c.bf16 %v9273_v23, %v9265_v59 }
 0x1ee   : > { %9290 = vtanh.f32 %v1977_v25  ;;  %v1980_v29 = vpop.f32.mrb[20].mxu1  ;;  %v1894_v20 = vadd.f32 %v1893_v39, %v11555_v37  ;;  %8229 = vmatmul.mubr.msk.f32.gmra.mrb[70].mxu0 %vm1444_vm0, %v11624_v2  ;;  %8542 = vmatprep.subr.bf16.mxu0 %v8541_v12  ;;  %v8549_v26 = vpack.c.bf16 %v9275_v27, %v9267_v33 }
 0x1ef   : > { %9292 = vtanh.f32 %v1892_v18  ;;  %v1981_v46 = vadd.f32 %v1980_v29, %v11555_v37  ;;  %v1982_v45 = vpop.f32.mrb[21].mxu1  ;;  %8544 = vmatpush1.bf16.msra.mxu0 %v8543_v41  ;;  %3293 = vmatprep.mubr.f32.mxu0 %v12935_v35  ;;  %v9277_v3 = vpop.eup %9276 }
 0x1f0   : > { %9294 = vtanh.f32 %v1894_v20  ;;  %v1983_v42 = vadd.f32 %v1982_v45, %v11555_v37  ;;  %v1897_v21 = vpop.f32.mrb[22].mxu0  ;;  %8233 = vmatmul.mubr.msk.f32.gmra.mrb[70].mxu1 %vm1444_vm0, %v11624_v2  ;;  %8550 = vmatprep.subr.bf16.mxu1 %v8549_v26  ;;  %v9279_v34 = vpop.eup %9278 }
 0x1f1   : > { %9296 = vtanh.f32 %v1981_v46  ;;  %v1898_v59 = vadd.f32 %v1897_v21, %v11561_v50  ;;  %v1899_v22 = vpop.f32.mrb[23].mxu0  ;;  %8552 = vmatpush1.bf16.msra.mxu1 %v8551_v6  ;;  %3382 = vmatprep.mubr.f32.mxu1 %v12935_v35 }
 0x1f2   : > { %9298 = vtanh.f32 %v1983_v42  ;;  %v1986_v7 = vpop.f32.mrb[22].mxu1  ;;  %v1900_v33 = vadd.f32 %v1899_v22, %v11561_v50  ;;  %8234 = vmatmul.mubr.msk.f32.vlgmr.msra.gmra.mrb[72].mxu0 %vm1444_vm0, %v11585_v28 }
 0x1f3   : > { %v9281_v24 = vpop.eup %9280  ;;  %9300 = vtanh.f32 %v1898_v59  ;;  %v1987_v40 = vadd.f32 %v1986_v7, %v11561_v50  ;;  %v1988_v31 = vpop.f32.mrb[23].mxu1  ;;  %3299 = vmatprep.mubr.f32.mxu0 %v12935_v35 }
 0x1f4   : > { %v9283_v38 = vpop.eup %9282  ;;  %9302 = vtanh.f32 %v1900_v33  ;;  %v1989_v32 = vadd.f32 %v1988_v31, %v11561_v50  ;;  %8238 = vmatmul.mubr.msk.f32.vlgmr.msra.gmra.mrb[72].mxu1 %vm1444_vm0, %v11585_v28 }
 0x1f5   : > { %v9285_v43 = vpop.eup %9284  ;;  %9304 = vtanh.f32 %v1987_v40  ;;  %3388 = vmatprep.mubr.f32.mxu1 %v12935_v35 }
 0x1f6   : > { %v9287_v41 = vpop.eup %9286  ;;  %9306 = vtanh.f32 %v1989_v32  ;;  %8235 = vmatmul.mubr.msk.f32.gmra.mrb[74].mxu0 %vm1444_vm0, %v11596_v30  ;;  %v8555_v23 = vpack.c.bf16 %v9285_v43, %v9277_v3 }
 0x1f7   : > { %v9289_v25 = vpop.eup %9288  ;;  %v8553_v61 = vpack.c.bf16 %v9287_v41, %v9279_v34  ;;  %3305 = vmatprep.mubr.f32.mxu0 %v12935_v35 }
 0x1f8   : > { %v9291_v12 = vpop.eup %9290  ;;  %8239 = vmatmul.mubr.msk.f32.gmra.mrb[74].mxu1 %vm1444_vm0, %v11596_v30  ;;  %v8563_v27 = vpack.c.bf16 %v9289_v25, %v9281_v24 }
 0x1f9   : > { %v9293_v18 = vpop.eup %9292  ;;  %8554 = vmatprep.subr.bf16.mxu0 %v8553_v61  ;;  %v8561_v39 = vpack.c.bf16 %v9291_v12, %v9283_v38  ;;  %3394 = vmatprep.mubr.f32.mxu1 %v12935_v35 }
 0x1fa   : > { %v9295_v6 = vpop.eup %9294  ;;  %v2057_v29 = vpop.f32.mrb[24].mxu0  ;;  %8556 = vmatpush1.bf16.msra.mxu0 %v8555_v23 }
 0x1fb   : > { %v9297_v20 = vpop.eup %9296  ;;  %v2058_v26 = vadd.f32 %v2057_v29, %v11544_v36  ;;  %v2059_v46 = vpop.f32.mrb[25].mxu0  ;;  %8562 = vmatprep.subr.bf16.mxu1 %v8561_v39  ;;  %8236 = vmatmul.mubr.msk.f32.gmra.mrb[76].mxu0 %vm1444_vm0, %v11609_v17 }
 0x1fc   : > { %v9299_v45 = vpop.eup %9298  ;;  %v2060_v42 = vadd.f32 %v2059_v46, %v11544_v36  ;;  %8564 = vmatpush1.bf16.msra.mxu1 %v8563_v27  ;;  %3311 = vmatprep.mubr.f32.mxu0 %v12935_v35 }
 0x1fd   : > { %v9301_v21 = vpop.eup %9300  ;;  %v2146_v3 = vpop.f32.mrb[24].mxu1  ;;  %8240 = vmatmul.mubr.msk.f32.gmra.mrb[76].mxu1 %vm1444_vm0, %v11609_v17  ;;  %9308 = vtanh.f32 %v2058_v26 }
 0x1fe   : > { %v9303_v59 = vpop.eup %9302  ;;  %v2147_v22 = vadd.f32 %v2146_v3, %v11544_v36  ;;  %v2148_v34 = vpop.f32.mrb[25].mxu1  ;;  %3400 = vmatprep.mubr.f32.mxu1 %v12935_v35  ;;  %v8559_v33 = vpack.c.bf16 %v9301_v21, %v9293_v18  ;;  %9310 = vtanh.f32 %v2060_v42 }
 0x1ff   : > { %v2063_v7 = vpop.f32.mrb[26].mxu0  ;;  %v9305_v24 = vpop.eup %9304  ;;  %v2149_v40 = vadd.f32 %v2148_v34, %v11544_v36  ;;  %8237 = vmatmul.mubr.msk.f32.gmra.mrb[78].mxu0 %vm1444_vm0, %v11624_v2  ;;  %v8557_v32 = vpack.c.bf16 %v9303_v59, %v9295_v6 }
 0x200   : > { %v2064_v31 = vadd.f32 %v2063_v7, %v11549_v4  ;;  %v2065_v38 = vpop.f32.mrb[27].mxu0  ;;  %v9307_v43 = vpop.eup %9306  ;;  %9312 = vtanh.f32 %v2147_v22  ;;  %v8567_v23 = vpack.c.bf16 %v9305_v24, %v9297_v20  ;;  %3471 = vmatprep.mubr.f32.mxu0 %v12935_v35 }
 0x201   : > { %v2066_v41 = vadd.f32 %v2065_v38, %v11549_v4  ;;  %9314 = vtanh.f32 %v2149_v40  ;;  %v2152_v25 = vpop.f32.mrb[26].mxu1  ;;  %8241 = vmatmul.mubr.msk.f32.gmra.mrb[78].mxu1 %vm1444_vm0, %v11624_v2  ;;  %8558 = vmatprep.subr.bf16.mxu0 %v8557_v32  ;;  %v8565_v61 = vpack.c.bf16 %v9307_v43, %v9299_v45 }
 0x202   : > { %9316 = vtanh.f32 %v2064_v31  ;;  %v2153_v12 = vadd.f32 %v2152_v25, %v11549_v4  ;;  %v2154_v27 = vpop.f32.mrb[27].mxu1  ;;  %v2069_v18 = vpop.f32.mrb[28].mxu0  ;;  %8560 = vmatpush1.bf16.msra.mxu0 %v8559_v33  ;;  %3560 = vmatprep.mubr.f32.mxu1 %v12935_v35 }
 0x203   : > { %9318 = vtanh.f32 %v2066_v41  ;;  %v2155_v39 = vadd.f32 %v2154_v27, %v11549_v4  ;;  %v2070_v6 = vadd.f32 %v2069_v18, %v11555_v37  ;;  %v2071_v29 = vpop.f32.mrb[29].mxu0  ;;  %8566 = vmatprep.subr.bf16.mxu1 %v8565_v61 }
 0x204   : > { %9320 = vtanh.f32 %v2153_v12  ;;  %v2072_v20 = vadd.f32 %v2071_v29, %v11555_v37  ;;  %8568 = vmatpush1.bf16.msra.mxu1 %v8567_v23 }
 0x205   : > { %9322 = vtanh.f32 %v2155_v39  ;;  %8242 = vmatmul.mubr.msk.f32.vlgmr.msra.gmra.mrb[80].mxu0 %vm1444_vm0, %v11585_v28 }
 0x206   : > { %v2158_v26 = vpop.f32.mrb[28].mxu1  ;;  %v2075_v46 = vpop.f32.mrb[30].mxu0  ;;  %3477 = vmatprep.mubr.f32.mxu0 %v12935_v35  ;;  %9324 = vtanh.f32 %v2070_v6 }
 0x207   : > { %v2159_v45 = vadd.f32 %v2158_v26, %v11555_v37  ;;  %v2160_v42 = vpop.f32.mrb[29].mxu1  ;;  %v2076_v21 = vadd.f32 %v2075_v46, %v11561_v50  ;;  %v2077_v3 = vpop.f32.mrb[31].mxu0  ;;  %8246 = vmatmul.mubr.msk.f32.vlgmr.msra.gmra.mrb[80].mxu1 %vm1444_vm0, %v11585_v28  ;;  %9326 = vtanh.f32 %v2072_v20 }
 0x208   : > { %v9309_v59 = vpop.eup %9308  ;;  %v2161_v22 = vadd.f32 %v2160_v42, %v11555_v37  ;;  %v2078_v34 = vadd.f32 %v2077_v3, %v11561_v50  ;;  %3566 = vmatprep.mubr.f32.mxu1 %v12935_v35 }
 0x209   : > { %v9311_v7 = vpop.eup %9310  ;;  %9328 = vtanh.f32 %v2159_v45  ;;  %8243 = vmatmul.mubr.msk.f32.gmra.mrb[82].mxu0 %vm1444_vm0, %v11596_v30 }
 0x20a   : > { %v9313_v33 = vpop.eup %9312  ;;  %9330 = vtanh.f32 %v2161_v22  ;;  %v2164_v24 = vpop.f32.mrb[30].mxu1  ;;  %3483 = vmatprep.mubr.f32.mxu0 %v12935_v35 }
 0x20b   : > { %v9315_v40 = vpop.eup %9314  ;;  %9332 = vtanh.f32 %v2076_v21  ;;  %v2165_v31 = vadd.f32 %v2164_v24, %v11561_v50  ;;  %v2166_v38 = vpop.f32.mrb[31].mxu1  ;;  %8247 = vmatmul.mubr.msk.f32.gmra.mrb[82].mxu1 %vm1444_vm0, %v11596_v30 }
 0x20c   : > { %v9317_v32 = vpop.eup %9316  ;;  %9334 = vtanh.f32 %v2078_v34  ;;  %v2167_v43 = vadd.f32 %v2166_v38, %v11561_v50  ;;  %3572 = vmatprep.mubr.f32.mxu1 %v12935_v35 }
 0x20d   : > { %v9319_v41 = vpop.eup %9318  ;;  %9336 = vtanh.f32 %v2165_v31  ;;  %v8571_v23 = vpack.c.bf16 %v9317_v32, %v9309_v59  ;;  %8244 = vmatmul.mubr.msk.f32.gmra.mrb[84].mxu0 %vm1444_vm0, %v11609_v17 }
 0x20e   : > { %v9321_v25 = vpop.eup %9320  ;;  %9338 = vtanh.f32 %v2167_v43  ;;  %v8569_v61 = vpack.c.bf16 %v9319_v41, %v9311_v7  ;;  %3489 = vmatprep.mubr.f32.mxu0 %v12935_v35 }
 0x20f   : > { %v9323_v12 = vpop.eup %9322  ;;  %v8579_v27 = vpack.c.bf16 %v9321_v25, %v9313_v33  ;;  %8248 = vmatmul.mubr.msk.f32.gmra.mrb[84].mxu1 %vm1444_vm0, %v11609_v17 }
 0x210   : > { %8570 = vmatprep.subr.bf16.mxu0 %v8569_v61  ;;  %v8577_v18 = vpack.c.bf16 %v9323_v12, %v9315_v40  ;;  %3578 = vmatprep.mubr.f32.mxu1 %v12935_v35  ;;  %v9325_v39 = vpop.eup %9324 }
 0x211   : > { %v2235_v6 = vpop.f32.mrb[32].mxu0  ;;  %8572 = vmatpush1.bf16.msra.mxu0 %v8571_v23  ;;  %v9327_v29 = vpop.eup %9326 }
 0x212   : > { %v2236_v20 = vadd.f32 %v2235_v6, %v11544_v36  ;;  %v2237_v26 = vpop.f32.mrb[33].mxu0  ;;  %8578 = vmatprep.subr.bf16.mxu1 %v8577_v18  ;;  %8245 = vmatmul.mubr.msk.f32.gmra.mrb[86].mxu0 %vm1444_vm0, %v11624_v2 }
 0x213   : > { %v9329_v46 = vpop.eup %9328  ;;  %v2324_v45 = vpop.f32.mrb[32].mxu1  ;;  %v2238_v42 = vadd.f32 %v2237_v26, %v11544_v36  ;;  %8580 = vmatpush1.bf16.msra.mxu1 %v8579_v27  ;;  %3649 = vmatprep.mubr.f32.mxu0 %v12935_v35 }
 0x214   : > { %v9331_v21 = vpop.eup %9330  ;;  %9340 = vtanh.f32 %v2236_v20  ;;  %v2325_v3 = vadd.f32 %v2324_v45, %v11544_v36  ;;  %v2326_v59 = vpop.f32.mrb[33].mxu1  ;;  %8249 = vmatmul.mubr.msk.f32.gmra.mrb[86].mxu1 %vm1444_vm0, %v11624_v2 }
 0x215   : > { %v9333_v22 = vpop.eup %9332  ;;  %9342 = vtanh.f32 %v2238_v42  ;;  %v2327_v34 = vadd.f32 %v2326_v59, %v11544_v36  ;;  %v2241_v7 = vpop.f32.mrb[34].mxu0  ;;  %3738 = vmatprep.mubr.f32.mxu1 %v12935_v35 }
 0x216   : > { %v9335_v33 = vpop.eup %9334  ;;  %9344 = vtanh.f32 %v2325_v3  ;;  %v2242_v24 = vadd.f32 %v2241_v7, %v11549_v4  ;;  %v2243_v40 = vpop.f32.mrb[35].mxu0  ;;  %v8575_v31 = vpack.c.bf16 %v9333_v22, %v9325_v39 }
 0x217   : > { %v9337_v38 = vpop.eup %9336  ;;  %9346 = vtanh.f32 %v2327_v34  ;;  %v2330_v32 = vpop.f32.mrb[34].mxu1  ;;  %v2244_v43 = vadd.f32 %v2243_v40, %v11549_v4  ;;  %v8573_v41 = vpack.c.bf16 %v9335_v33, %v9327_v29 }
 0x218   : > { %v9339_v23 = vpop.eup %9338  ;;  %9348 = vtanh.f32 %v2242_v24  ;;  %v2331_v25 = vadd.f32 %v2330_v32, %v11549_v4  ;;  %v2332_v61 = vpop.f32.mrb[35].mxu1  ;;  %v8583_v12 = vpack.c.bf16 %v9337_v38, %v9329_v46 }
 0x219   : > { %9350 = vtanh.f32 %v2244_v43  ;;  %v2333_v27 = vadd.f32 %v2332_v61, %v11549_v4  ;;  %8574 = vmatprep.subr.bf16.mxu0 %v8573_v41  ;;  %v8581_v18 = vpack.c.bf16 %v9339_v23, %v9331_v21 }
 0x21a   : > { %9352 = vtanh.f32 %v2331_v25  ;;  %v2247_v6 = vpop.f32.mrb[36].mxu0  ;;  %8576 = vmatpush1.bf16.msra.mxu0 %v8575_v31 }
 0x21b   : > { %9354 = vtanh.f32 %v2333_v27  ;;  %v2248_v39 = vadd.f32 %v2247_v6, %v11555_v37  ;;  %v2249_v20 = vpop.f32.mrb[37].mxu0  ;;  %8582 = vmatprep.subr.bf16.mxu1 %v8581_v18 }
 0x21c   : > { %v2336_v29 = vpop.f32.mrb[36].mxu1  ;;  %v2250_v26 = vadd.f32 %v2249_v20, %v11555_v37  ;;  %8584 = vmatpush1.bf16.msra.mxu1 %v8583_v12 }
 0x21d   : > { %9356 = vtanh.f32 %v2248_v39  ;;  %v2337_v46 = vadd.f32 %v2336_v29, %v11555_v37  ;;  %v2338_v45 = vpop.f32.mrb[37].mxu1  ;;  %8250 = vmatmul.mubr.msk.f32.vlgmr.msra.gmra.mrb[88].mxu0 %vm1444_vm0, %v11585_v28 }
 0x21e   : > { %v9341_v42 = vpop.eup %9340  ;;  %9358 = vtanh.f32 %v2250_v26  ;;  %v2339_v21 = vadd.f32 %v2338_v45, %v11555_v37  ;;  %3655 = vmatprep.mubr.f32.mxu0 %v12935_v35 }
 0x21f   : > { %v2253_v3 = vpop.f32.mrb[38].mxu0  ;;  %v9343_v59 = vpop.eup %9342  ;;  %9360 = vtanh.f32 %v2337_v46  ;;  %8254 = vmatmul.mubr.msk.f32.vlgmr.msra.gmra.mrb[88].mxu1 %vm1444_vm0, %v11585_v28 }
 0x220   : > { %v2254_v22 = vadd.f32 %v2253_v3, %v11561_v50  ;;  %v2255_v34 = vpop.f32.mrb[39].mxu0  ;;  %v9345_v7 = vpop.eup %9344  ;;  %9362 = vtanh.f32 %v2339_v21  ;;  %3744 = vmatprep.mubr.f32.mxu1 %v12935_v35 }
 0x221   : > { %v2342_v33 = vpop.f32.mrb[38].mxu1  ;;  %v2256_v24 = vadd.f32 %v2255_v34, %v11561_v50  ;;  %v9347_v40 = vpop.eup %9346  ;;  %8251 = vmatmul.mubr.msk.f32.gmra.mrb[90].mxu0 %vm1444_vm0, %v11596_v30 }
 0x222   : > { %9364 = vtanh.f32 %v2254_v22  ;;  %v2343_v31 = vadd.f32 %v2342_v33, %v11561_v50  ;;  %v2344_v38 = vpop.f32.mrb[39].mxu1  ;;  %v9349_v32 = vpop.eup %9348  ;;  %3661 = vmatprep.mubr.f32.mxu0 %v12935_v35 }
 0x223   : > { %9366 = vtanh.f32 %v2256_v24  ;;  %v2345_v43 = vadd.f32 %v2344_v38, %v11561_v50  ;;  %v9351_v41 = vpop.eup %9350  ;;  %8255 = vmatmul.mubr.msk.f32.gmra.mrb[90].mxu1 %vm1444_vm0, %v11596_v30  ;;  %v8587_v23 = vpack.c.bf16 %v9349_v32, %v9341_v42 }
 0x224   : > { %9368 = vtanh.f32 %v2343_v31  ;;  %v9353_v25 = vpop.eup %9352  ;;  %v8585_v61 = vpack.c.bf16 %v9351_v41, %v9343_v59  ;;  %3750 = vmatprep.mubr.f32.mxu1 %v12935_v35 }
 0x225   : > { %9370 = vtanh.f32 %v2345_v43  ;;  %v9355_v12 = vpop.eup %9354  ;;  %v8595_v27 = vpack.c.bf16 %v9353_v25, %v9345_v7  ;;  %8252 = vmatmul.mubr.msk.f32.gmra.mrb[92].mxu0 %vm1444_vm0, %v11609_v17 }
 0x226   : > { %8586 = vmatprep.subr.bf16.mxu0 %v8585_v61  ;;  %v8593_v18 = vpack.c.bf16 %v9355_v12, %v9347_v40  ;;  %3667 = vmatprep.mubr.f32.mxu0 %v12935_v35 }
 0x227   : > { %v9357_v6 = vpop.eup %9356  ;;  %v2413_v39 = vpop.f32.mrb[40].mxu0  ;;  %8588 = vmatpush1.bf16.msra.mxu0 %v8587_v23  ;;  %8256 = vmatmul.mubr.msk.f32.gmra.mrb[92].mxu1 %vm1444_vm0, %v11609_v17 }
 0x228   : > { %v9359_v20 = vpop.eup %9358  ;;  %v2414_v29 = vadd.f32 %v2413_v39, %v11544_v36  ;;  %v2415_v26 = vpop.f32.mrb[41].mxu0  ;;  %8594 = vmatprep.subr.bf16.mxu1 %v8593_v18  ;;  %3756 = vmatprep.mubr.f32.mxu1 %v12935_v35 }
 0x229   : > { %v9361_v46 = vpop.eup %9360  ;;  %v2502_v45 = vpop.f32.mrb[40].mxu1  ;;  %v2416_v42 = vadd.f32 %v2415_v26, %v11544_v36  ;;  %8596 = vmatpush1.bf16.msra.mxu1 %v8595_v27  ;;  %8253 = vmatmul.mubr.msk.f32.gmra.mrb[94].mxu0 %vm1444_vm0, %v11624_v2 }
 0x22a   : > { %v9363_v21 = vpop.eup %9362  ;;  %9372 = vtanh.f32 %v2414_v29  ;;  %v2503_v3 = vadd.f32 %v2502_v45, %v11544_v36  ;;  %v2504_v59 = vpop.f32.mrb[41].mxu1  ;;  %3827 = vmatprep.mubr.f32.mxu0 %v12935_v35 }
 0x22b   : > { %9374 = vtanh.f32 %v2416_v42  ;;  %v2505_v34 = vadd.f32 %v2504_v59, %v11544_v36  ;;  %v2419_v7 = vpop.f32.mrb[42].mxu0  ;;  %8257 = vmatmul.mubr.msk.f32.gmra.mrb[94].mxu1 %vm1444_vm0, %v11624_v2 }
 0x22c   : > { %v9365_v22 = vpop.eup %9364  ;;  %9376 = vtanh.f32 %v2503_v3  ;;  %v2420_v24 = vadd.f32 %v2419_v7, %v11549_v4  ;;  %v2421_v40 = vpop.f32.mrb[43].mxu0  ;;  %3916 = vmatprep.mubr.f32.mxu1 %v12935_v35 }
 0x22d   : > { %v9367_v33 = vpop.eup %9366  ;;  %v8591_v31 = vpack.c.bf16 %v9365_v22, %v9357_v6  ;;  %9378 = vtanh.f32 %v2505_v34  ;;  %v2508_v32 = vpop.f32.mrb[42].mxu1  ;;  %v2422_v43 = vadd.f32 %v2421_v40, %v11549_v4 }
 0x22e   : > { %v9369_v38 = vpop.eup %9368  ;;  %v8589_v41 = vpack.c.bf16 %v9367_v33, %v9359_v20  ;;  %9380 = vtanh.f32 %v2420_v24  ;;  %v2509_v25 = vadd.f32 %v2508_v32, %v11549_v4  ;;  %v2510_v61 = vpop.f32.mrb[43].mxu1 }
 0x22f   : > { %v9371_v23 = vpop.eup %9370  ;;  %v8599_v12 = vpack.c.bf16 %v9369_v38, %v9361_v46  ;;  %9382 = vtanh.f32 %v2422_v43  ;;  %v2511_v27 = vadd.f32 %v2510_v61, %v11549_v4  ;;  %v2425_v18 = vpop.f32.mrb[44].mxu0 }
 0x230   : > { %8590 = vmatprep.subr.bf16.mxu0 %v8589_v41  ;;  %v8597_v6 = vpack.c.bf16 %v9371_v23, %v9363_v21  ;;  %9384 = vtanh.f32 %v2509_v25  ;;  %v2426_v39 = vadd.f32 %v2425_v18, %v11555_v37  ;;  %v2427_v29 = vpop.f32.mrb[45].mxu0 }
 0x231   : > { %8592 = vmatpush1.bf16.msra.mxu0 %v8591_v31  ;;  %9386 = vtanh.f32 %v2511_v27  ;;  %v2514_v26 = vpop.f32.mrb[44].mxu1  ;;  %v2428_v20 = vadd.f32 %v2427_v29, %v11555_v37 }
 0x232   : > { %8598 = vmatprep.subr.bf16.mxu1 %v8597_v6  ;;  %9388 = vtanh.f32 %v2426_v39  ;;  %v2515_v45 = vadd.f32 %v2514_v26, %v11555_v37  ;;  %v2516_v46 = vpop.f32.mrb[45].mxu1 }
 0x233   : > { %8600 = vmatpush1.bf16.msra.mxu1 %v8599_v12  ;;  %9390 = vtanh.f32 %v2428_v20  ;;  %v2517_v42 = vadd.f32 %v2516_v46, %v11555_v37  ;;  %v2431_v3 = vpop.f32.mrb[46].mxu0 }
 0x234   : > { %8258 = vmatmul.mubr.msk.f32.vlgmr.msra.gmra.mrb[96].mxu0 %vm1444_vm0, %v11585_v28  ;;  %v9373_v21 = vpop.eup %9372  ;;  %9392 = vtanh.f32 %v2515_v45  ;;  %v2432_v59 = vadd.f32 %v2431_v3, %v11561_v50  ;;  %v2433_v22 = vpop.f32.mrb[47].mxu0 }
 0x235   : > { %3833 = vmatprep.mubr.f32.mxu0 %v12935_v35  ;;  %v9375_v34 = vpop.eup %9374  ;;  %9394 = vtanh.f32 %v2517_v42  ;;  %v2520_v7 = vpop.f32.mrb[46].mxu1  ;;  %v2434_v33 = vadd.f32 %v2433_v22, %v11561_v50 }
 0x236   : > { %8262 = vmatmul.mubr.msk.f32.vlgmr.msra.gmra.mrb[96].mxu1 %vm1444_vm0, %v11585_v28  ;;  %v9377_v24 = vpop.eup %9376  ;;  %9396 = vtanh.f32 %v2432_v59  ;;  %v2521_v40 = vadd.f32 %v2520_v7, %v11561_v50  ;;  %v2522_v31 = vpop.f32.mrb[47].mxu1 }
 0x237   : > { %3922 = vmatprep.mubr.f32.mxu1 %v12935_v35  ;;  %v9379_v38 = vpop.eup %9378  ;;  %9398 = vtanh.f32 %v2434_v33  ;;  %v2523_v32 = vadd.f32 %v2522_v31, %v11561_v50 }
 0x238   : > { %8259 = vmatmul.mubr.msk.f32.gmra.mrb[98].mxu0 %vm1444_vm0, %v11596_v30  ;;  %v9381_v43 = vpop.eup %9380  ;;  %9400 = vtanh.f32 %v2521_v40 }
 0x239   : > { %3839 = vmatprep.mubr.f32.mxu0 %v12935_v35  ;;  %v9383_v41 = vpop.eup %9382  ;;  %9402 = vtanh.f32 %v2523_v32  ;;  %v8603_v23 = vpack.c.bf16 %v9381_v43, %v9373_v21 }
 0x23a   : > { %8263 = vmatmul.mubr.msk.f32.gmra.mrb[98].mxu1 %vm1444_vm0, %v11596_v30  ;;  %v9385_v25 = vpop.eup %9384  ;;  %v8601_v61 = vpack.c.bf16 %v9383_v41, %v9375_v34 }
 0x23b   : > { %3928 = vmatprep.mubr.f32.mxu1 %v12935_v35  ;;  %v9387_v12 = vpop.eup %9386  ;;  %v8611_v27 = vpack.c.bf16 %v9385_v25, %v9377_v24 }
 0x23c   : > { %8260 = vmatmul.mubr.msk.f32.gmra.mrb[100].mxu0 %vm1444_vm0, %v11609_v17  ;;  %v9389_v18 = vpop.eup %9388  ;;  %8602 = vmatprep.subr.bf16.mxu0 %v8601_v61  ;;  %v8609_v6 = vpack.c.bf16 %v9387_v12, %v9379_v38 }
 0x23d   : > { %3845 = vmatprep.mubr.f32.mxu0 %v12935_v35  ;;  %v9391_v39 = vpop.eup %9390  ;;  %8604 = vmatpush1.bf16.msra.mxu0 %v8603_v23 }
 0x23e   : > { %8264 = vmatmul.mubr.msk.f32.gmra.mrb[100].mxu1 %vm1444_vm0, %v11609_v17  ;;  %v9393_v29 = vpop.eup %9392  ;;  %8610 = vmatprep.subr.bf16.mxu1 %v8609_v6 }
 0x23f   : > { %v2591_v26 = vpop.f32.mrb[48].mxu0  ;;  %3934 = vmatprep.mubr.f32.mxu1 %v12935_v35  ;;  %v9395_v20 = vpop.eup %9394  ;;  %8612 = vmatpush1.bf16.msra.mxu1 %v8611_v27 }
 0x240   : > { %v2592_v45 = vadd.f32 %v2591_v26, %v11544_v36  ;;  %v2593_v46 = vpop.f32.mrb[49].mxu0  ;;  %8261 = vmatmul.mubr.msk.f32.gmra.mrb[102].mxu0 %vm1444_vm0, %v11624_v2  ;;  %v9397_v42 = vpop.eup %9396 }
 0x241   : > { %v2594_v3 = vadd.f32 %v2593_v46, %v11544_v36  ;;  %4005 = vmatprep.mubr.f32.mxu0 %v12935_v35  ;;  %v9399_v21 = vpop.eup %9398  ;;  %v2680_v59 = vpop.f32.mrb[48].mxu1  ;;  %v8607_v22 = vpack.c.bf16 %v9397_v42, %v9389_v18 }
 0x242   : > { %8265 = vmatmul.mubr.msk.f32.gmra.mrb[102].mxu1 %vm1444_vm0, %v11624_v2  ;;  %v9401_v34 = vpop.eup %9400  ;;  %9404 = vtanh.f32 %v2592_v45  ;;  %v2681_v7 = vadd.f32 %v2680_v59, %v11544_v36  ;;  %v2682_v33 = vpop.f32.mrb[49].mxu1  ;;  %v8605_v24 = vpack.c.bf16 %v9399_v21, %v9391_v39 }
 0x243   : > { %4094 = vmatprep.mubr.f32.mxu1 %v12935_v35  ;;  %v9403_v40 = vpop.eup %9402  ;;  %9406 = vtanh.f32 %v2594_v3  ;;  %v2683_v31 = vadd.f32 %v2682_v33, %v11544_v36  ;;  %v2597_v38 = vpop.f32.mrb[50].mxu0  ;;  %v8615_v32 = vpack.c.bf16 %v9401_v34, %v9393_v29 }
 0x244   : > { %9408 = vtanh.f32 %v2681_v7  ;;  %v2598_v43 = vadd.f32 %v2597_v38, %v11549_v4  ;;  %v2599_v41 = vpop.f32.mrb[51].mxu0  ;;  %8606 = vmatprep.subr.bf16.mxu0 %v8605_v24  ;;  %v8613_v23 = vpack.c.bf16 %v9403_v40, %v9395_v20 }
 0x245   : > { %9410 = vtanh.f32 %v2683_v31  ;;  %v2686_v25 = vpop.f32.mrb[50].mxu1  ;;  %v2600_v61 = vadd.f32 %v2599_v41, %v11549_v4  ;;  %8608 = vmatpush1.bf16.msra.mxu0 %v8607_v22 }
 0x246   : > { %9412 = vtanh.f32 %v2598_v43  ;;  %v2687_v12 = vadd.f32 %v2686_v25, %v11549_v4  ;;  %v2688_v27 = vpop.f32.mrb[51].mxu1  ;;  %8614 = vmatprep.subr.bf16.mxu1 %v8613_v23 }
 0x247   : > { %9414 = vtanh.f32 %v2600_v61  ;;  %v2689_v18 = vadd.f32 %v2688_v27, %v11549_v4  ;;  %v2603_v6 = vpop.f32.mrb[52].mxu0  ;;  %8616 = vmatpush1.bf16.msra.mxu1 %v8615_v32 }
 0x248   : > { %9416 = vtanh.f32 %v2687_v12  ;;  %v2604_v39 = vadd.f32 %v2603_v6, %v11555_v37  ;;  %v2605_v29 = vpop.f32.mrb[53].mxu0  ;;  %8266 = vmatmul.mubr.msk.f32.vlgmr.msra.gmra.mrb[104].mxu0 %vm1444_vm0, %v11585_v28 }
 0x249   : > { %9418 = vtanh.f32 %v2689_v18  ;;  %v2692_v26 = vpop.f32.mrb[52].mxu1  ;;  %v2606_v20 = vadd.f32 %v2605_v29, %v11555_v37  ;;  %4011 = vmatprep.mubr.f32.mxu0 %v12935_v35 }
 0x24a   : > { %9420 = vtanh.f32 %v2604_v39  ;;  %v2693_v45 = vadd.f32 %v2692_v26, %v11555_v37  ;;  %v2694_v46 = vpop.f32.mrb[53].mxu1  ;;  %8270 = vmatmul.mubr.msk.f32.vlgmr.msra.gmra.mrb[104].mxu1 %vm1444_vm0, %v11585_v28 }
 0x24b   : > { %9422 = vtanh.f32 %v2606_v20  ;;  %v2695_v42 = vadd.f32 %v2694_v46, %v11555_v37  ;;  %v2609_v3 = vpop.f32.mrb[54].mxu0  ;;  %4100 = vmatprep.mubr.f32.mxu1 %v12935_v35 }
 0x24c   : > { %v9405_v21 = vpop.eup %9404  ;;  %9424 = vtanh.f32 %v2693_v45  ;;  %v2610_v59 = vadd.f32 %v2609_v3, %v11561_v50  ;;  %v2611_v22 = vpop.f32.mrb[55].mxu0  ;;  %8267 = vmatmul.mubr.msk.f32.gmra.mrb[106].mxu0 %vm1444_vm0, %v11596_v30 }
 0x24d   : > { %v9407_v34 = vpop.eup %9406  ;;  %9426 = vtanh.f32 %v2695_v42  ;;  %v2698_v7 = vpop.f32.mrb[54].mxu1  ;;  %v2612_v33 = vadd.f32 %v2611_v22, %v11561_v50  ;;  %4017 = vmatprep.mubr.f32.mxu0 %v12935_v35 }
 0x24e   : > { %v9409_v28 = vpop.eup %9408  ;;  %9428 = vtanh.f32 %v2610_v59  ;;  %v2699_v24 = vadd.f32 %v2698_v7, %v11561_v50  ;;  %v2700_v40 = vpop.f32.mrb[55].mxu1  ;;  %8271 = vmatmul.mubr.msk.f32.gmra.mrb[106].mxu1 %vm1444_vm0, %v11596_v30 }
 0x24f   : > { %v9411_v31 = vpop.eup %9410  ;;  %9430 = vtanh.f32 %v2612_v33  ;;  %v2701_v38 = vadd.f32 %v2700_v40, %v11561_v50  ;;  %4106 = vmatprep.mubr.f32.mxu1 %v12935_v35 }
 0x250   : > { %v9413_v32 = vpop.eup %9412  ;;  %9432 = vtanh.f32 %v2699_v24  ;;  %8268 = vmatmul.mubr.msk.f32.gmra.mrb[108].mxu0 %vm1444_vm0, %v11609_v17 }
 0x251   : > { %v9415_v43 = vpop.eup %9414  ;;  %9434 = vtanh.f32 %v2701_v38  ;;  %v8619_v41 = vpack.c.bf16 %v9413_v32, %v9405_v21  ;;  %4023 = vmatprep.mubr.f32.mxu0 %v12935_v35 }
 0x252   : > { %v9417_v23 = vpop.eup %9416  ;;  %v8617_v25 = vpack.c.bf16 %v9415_v43, %v9407_v34  ;;  %8272 = vmatmul.mubr.msk.f32.gmra.mrb[108].mxu1 %vm1444_vm0, %v11609_v17 }
 0x253   : > { %v9419_v30 = vpop.eup %9418  ;;  %v8627_v61 = vpack.c.bf16 %v9417_v23, %v9409_v28  ;;  %4112 = vmatprep.mubr.f32.mxu1 %v12935_v35 }
 0x254   : > { %v9421_v12 = vpop.eup %9420  ;;  %8618 = vmatprep.subr.bf16.mxu0 %v8617_v25  ;;  %v8625_v27 = vpack.c.bf16 %v9419_v30, %v9411_v31  ;;  %8269 = vmatmul.mubr.msk.f32.gmra.mrb[110].mxu0 %vm1444_vm0, %v11624_v2 }
 0x255   : > { %v9423_v18 = vpop.eup %9422  ;;  %8620 = vmatpush1.bf16.msra.mxu0 %v8619_v41  ;;  %4183 = vmatprep.mubr.f32.mxu0 %v12935_v35 }
 0x256   : > { %v9425_v6 = vpop.eup %9424  ;;  %8626 = vmatprep.subr.bf16.mxu1 %v8625_v27  ;;  %8273 = vmatmul.mubr.msk.f32.gmra.mrb[110].mxu1 %vm1444_vm0, %v11624_v2 }
 0x257   : > { %v9427_v17 = vpop.eup %9426  ;;  %v2769_v39 = vpop.f32.mrb[56].mxu0  ;;  %8628 = vmatpush1.bf16.msra.mxu1 %v8627_v61  ;;  %4272 = vmatprep.mubr.f32.mxu1 %v12935_v35  ;;  %v11840_v61 = vld [vmem:[%s12772_s5 + $0x20] sm:$0xff] }
 0x258   : > { %v9429_v29 = vpop.eup %9428  ;;  %v2770_v26 = vadd.f32 %v2769_v39, %v11544_v36  ;;  %v2771_v20 = vpop.f32.mrb[57].mxu0 }
 0x259   : > { %v9431_v45 = vpop.eup %9430  ;;  %v2772_v42 = vadd.f32 %v2771_v20, %v11544_v36  ;;  %v8623_v3 = vpack.c.bf16 %v9429_v29, %v9421_v12  ;;  %v9987_v20 = vld [vmem:[%s12772_s5 + $0x28] sm:$0xff] }
 0x25a   : > { %v2858_v46 = vpop.f32.mrb[56].mxu1  ;;  %v9433_v21 = vpop.eup %9432  ;;  %9436 = vtanh.f32 %v2770_v26  ;;  %v8621_v2 = vpack.c.bf16 %v9431_v45, %v9423_v18 }
 0x25b   : > { %v2859_v59 = vadd.f32 %v2858_v46, %v11544_v36  ;;  %v2860_v22 = vpop.f32.mrb[57].mxu1  ;;  %v9435_v34 = vpop.eup %9434  ;;  %9438 = vtanh.f32 %v2772_v42  ;;  %v8631_v28 = vpack.c.bf16 %v9433_v21, %v9425_v6 }
 0x25c   : > { %v2861_v7 = vadd.f32 %v2860_v22, %v11544_v36  ;;  %v2775_v33 = vpop.f32.mrb[58].mxu0  ;;  %8622 = vmatprep.subr.bf16.mxu0 %v8621_v2  ;;  %v8629_v31 = vpack.c.bf16 %v9435_v34, %v9427_v17  ;;  %v9988_v34 = vld [vmem:[%s12772_s5 + $0x30] sm:$0xff] }
 0x25d   : > { %9440 = vtanh.f32 %v2859_v59  ;;  %v2776_v24 = vadd.f32 %v2775_v33, %v11549_v4  ;;  %v2777_v40 = vpop.f32.mrb[59].mxu0  ;;  %8624 = vmatpush1.bf16.msra.mxu0 %v8623_v3 }
 0x25e   : > { %9442 = vtanh.f32 %v2861_v7  ;;  %v2864_v38 = vpop.f32.mrb[58].mxu1  ;;  %v2778_v32 = vadd.f32 %v2777_v40, %v11549_v4  ;;  %8630 = vmatprep.subr.bf16.mxu1 %v8629_v31 }
 0x25f   : > { %9444 = vtanh.f32 %v2776_v24  ;;  %v2865_v43 = vadd.f32 %v2864_v38, %v11549_v4  ;;  %v2866_v41 = vpop.f32.mrb[59].mxu1  ;;  %v2781_v23 = vpop.f32.mrb[60].mxu0  ;;  %8632 = vmatpush1.bf16.msra.mxu1 %v8631_v28 }
 0x260   : > { %9446 = vtanh.f32 %v2778_v32  ;;  %v2867_v36 = vadd.f32 %v2866_v41, %v11549_v4  ;;  %v2782_v25 = vadd.f32 %v2781_v23, %v11555_v37  ;;  %v2783_v30 = vpop.f32.mrb[61].mxu0  ;;  %8274 = vmatmul.mubr.msk.f32.vlgmr.msra.gmra.mrb[112].mxu0 %vm1444_vm0, %v11840_v61  ;;  %v9989_v32 = vld [vmem:[%s12772_s5 + $0x38] sm:$0xff] }
 0x261   : > { %9448 = vtanh.f32 %v2865_v43  ;;  %v2784_v27 = vadd.f32 %v2783_v30, %v11555_v37  ;;  %4189 = vmatprep.mubr.f32.mxu0 %v12935_v35 }
 0x262   : > { %9450 = vtanh.f32 %v2867_v36  ;;  %v2870_v12 = vpop.f32.mrb[60].mxu1  ;;  %8278 = vmatmul.mubr.msk.f32.vlgmr.msra.gmra.mrb[112].mxu1 %vm1444_vm0, %v11840_v61 }
 0x263   : > { %9452 = vtanh.f32 %v2782_v25  ;;  %v2871_v4 = vadd.f32 %v2870_v12, %v11555_v37  ;;  %v2872_v18 = vpop.f32.mrb[61].mxu1  ;;  %v2787_v17 = vpop.f32.mrb[62].mxu0  ;;  %4278 = vmatprep.mubr.f32.mxu1 %v12935_v35 }
 0x264   : > { %9454 = vtanh.f32 %v2784_v27  ;;  %v2873_v6 = vadd.f32 %v2872_v18, %v11555_v37  ;;  %v9437_v39 = vpop.eup %9436  ;;  %v2788_v29 = vadd.f32 %v2787_v17, %v11561_v50  ;;  %v2789_v26 = vpop.f32.mrb[63].mxu0  ;;  %8275 = vmatmul.mubr.msk.f32.gmra.mrb[114].mxu0 %vm1444_vm0, %v9987_v20 }
 0x265   : > { %9456 = vtanh.f32 %v2871_v4  ;;  %v9439_v45 = vpop.eup %9438  ;;  %v2790_v42 = vadd.f32 %v2789_v26, %v11561_v50  ;;  %4195 = vmatprep.mubr.f32.mxu0 %v12935_v35 }
 0x266   : > { %9458 = vtanh.f32 %v2873_v6  ;;  %v2876_v46 = vpop.f32.mrb[62].mxu1  ;;  %8279 = vmatmul.mubr.msk.f32.gmra.mrb[114].mxu1 %vm1444_vm0, %v9987_v20 }
 0x267   : > { %v9441_v37 = vpop.eup %9440  ;;  %9460 = vtanh.f32 %v2788_v29  ;;  %v2877_v3 = vadd.f32 %v2876_v46, %v11561_v50  ;;  %v2878_v21 = vpop.f32.mrb[63].mxu1  ;;  %4284 = vmatprep.mubr.f32.mxu1 %v12935_v35 }
 0x268   : > { %v9443_v59 = vpop.eup %9442  ;;  %9462 = vtanh.f32 %v2790_v42  ;;  %v2879_v22 = vadd.f32 %v2878_v21, %v11561_v50  ;;  %8276 = vmatmul.mubr.msk.f32.gmra.mrb[116].mxu0 %vm1444_vm0, %v9988_v34  ;;  %v11899_v42 = vpop.permute.xlu1 %3026 }
 0x269   : > { %v9445_v2 = vpop.eup %9444  ;;  %9464 = vtanh.f32 %v2877_v3  ;;  %4201 = vmatprep.mubr.f32.mxu0 %v12935_v35 }
 0x26a   : > { %v9447_v7 = vpop.eup %9446  ;;  %9466 = vtanh.f32 %v2879_v22  ;;  %v8635_v33 = vpack.c.bf16 %v9445_v2, %v9437_v39  ;;  %8280 = vmatmul.mubr.msk.f32.gmra.mrb[116].mxu1 %vm1444_vm0, %v9988_v34 }
 0x26b   : > { %v9449_v28 = vpop.eup %9448  ;;  %v8633_v24 = vpack.c.bf16 %v9447_v7, %v9439_v45  ;;  %4290 = vmatprep.mubr.f32.mxu1 %v12935_v35 }
 0x26c   : > { %v9451_v50 = vpop.eup %9450  ;;  %v8643_v40 = vpack.c.bf16 %v9449_v28, %v9441_v37  ;;  %8277 = vmatmul.mubr.msk.f32.gmra.mrb[118].mxu0 %vm1444_vm0, %v9989_v32 }
 0x26d   : > { %v9453_v31 = vpop.eup %9452  ;;  %8634 = vmatprep.subr.bf16.mxu0 %v8633_v24  ;;  %v8641_v38 = vpack.c.bf16 %v9451_v50, %v9443_v59  ;;  %4361 = vmatprep.mubr.f32.mxu0 %v12935_v35 }
 0x26e   : > { %v9455_v43 = vpop.eup %9454  ;;  %8636 = vmatpush1.bf16.msra.mxu0 %v8635_v33  ;;  %8281 = vmatmul.mubr.msk.f32.gmra.mrb[118].mxu1 %vm1444_vm0, %v9989_v32 }
 0x26f   : > { %v9457_v41 = vpop.eup %9456  ;;  %8642 = vmatprep.subr.bf16.mxu1 %v8641_v38  ;;  %4450 = vmatprep.mubr.f32.mxu1 %v12935_v35 }
 0x270   : > { %v9459_v36 = vpop.eup %9458  ;;  %8644 = vmatpush1.bf16.msra.mxu1 %v8643_v40 }
 0x271   : > { %v9461_v23 = vpop.eup %9460 }
 0x272   : > { %v9463_v25 = vpop.eup %9462  ;;  %v8639_v30 = vpack.c.bf16 %v9461_v23, %v9453_v31 }
 0x273   : > { %v9465_v12 = vpop.eup %9464  ;;  %v8637_v27 = vpack.c.bf16 %v9463_v25, %v9455_v43 }
 0x274   : > { %v9467_v4 = vpop.eup %9466  ;;  %v8647_v18 = vpack.c.bf16 %v9465_v12, %v9457_v41  ;;  %v11911_v41 = vpop.permute.xlu1 %3036 }
 0x275   : > { %8638 = vmatprep.subr.bf16.mxu0 %v8637_v27  ;;  %v8645_v6 = vpack.c.bf16 %v9467_v4, %v9459_v36 }
 0x276   : > { %8640 = vmatpush1.bf16.msra.mxu0 %v8639_v30 }
 0x277   : > { %8646 = vmatprep.subr.bf16.mxu1 %v8645_v6 }
 0x278   : > { %8648 = vmatpush1.bf16.msra.mxu1 %v8647_v18 }
 0x279   : > { %8282 = vmatmul.mubr.msk.f32.vlgmr.msra.gmra.mrb[120].mxu0 %vm1444_vm0, %v11840_v61 }
 0x27a   : > { %4367 = vmatprep.mubr.f32.mxu0 %v12935_v35 }
 0x27b   : > { %8286 = vmatmul.mubr.msk.f32.vlgmr.msra.gmra.mrb[120].mxu1 %vm1444_vm0, %v11840_v61  ;;  %v11894_v61 = vpop.permute.xlu0 %3021 }
 0x27c   : > { %4456 = vmatprep.mubr.f32.mxu1 %v12935_v35 }
 0x27d   : > { %8283 = vmatmul.mubr.msk.f32.gmra.mrb[122].mxu0 %vm1444_vm0, %v9987_v20 }
 0x27e   : > { %4373 = vmatprep.mubr.f32.mxu0 %v12935_v35 }
 0x27f   : > { %8287 = vmatmul.mubr.msk.f32.gmra.mrb[122].mxu1 %vm1444_vm0, %v9987_v20  ;;  %v11905_v33 = vpop.permute.xlu0 %3031 }
 0x280   : > { %4462 = vmatprep.mubr.f32.mxu1 %v12935_v35 }
 0x281   : > { %8284 = vmatmul.mubr.msk.f32.gmra.mrb[124].mxu0 %vm1444_vm0, %v9988_v34 }
 0x282   : > { %4379 = vmatprep.mubr.f32.mxu0 %v12935_v35 }
 0x283   : > { %8288 = vmatmul.mubr.msk.f32.gmra.mrb[124].mxu1 %vm1444_vm0, %v9988_v34 }
 0x284   : > { %4468 = vmatprep.mubr.f32.mxu1 %v12935_v35 }
 0x285   : > { %8285 = vmatmul.mubr.msk.f32.gmra.mrb[126].mxu0 %vm1444_vm0, %v9989_v32 }
 0x286   : > { %4709 = vmatprep.mubr.f32.mxu0 %v12935_v35 }
 0x287   : > { %8289 = vmatmul.mubr.msk.f32.gmra.mrb[126].mxu1 %vm1444_vm0, %v9989_v32 }
 0x288   : > { %4798 = vmatprep.mubr.f32.mxu1 %v12935_v35 }
 0x2b5   : > { %v3117_v17 = vpop.f32.mrb[64].mxu0 }
 0x2b6   : > { %v3118_v39 = vadd.f32 %v3117_v17, %v11894_v61  ;;  %v3119_v29 = vpop.f32.mrb[65].mxu0 }
 0x2b7   : > { %v3206_v26 = vpop.f32.mrb[64].mxu1  ;;  %v3120_v20 = vadd.f32 %v3119_v29, %v11894_v61 }
 0x2b8   : > { %9468 = vtanh.f32 %v3118_v39  ;;  %v3207_v45 = vadd.f32 %v3206_v26, %v11894_v61  ;;  %v3208_v46 = vpop.f32.mrb[65].mxu1 }
 0x2b9   : > { %9470 = vtanh.f32 %v3120_v20  ;;  %v3209_v37 = vadd.f32 %v3208_v46, %v11894_v61  ;;  %v3123_v3 = vpop.f32.mrb[66].mxu0 }
 0x2ba   : > { %9472 = vtanh.f32 %v3207_v45  ;;  %v3124_v21 = vadd.f32 %v3123_v3, %v11899_v42  ;;  %v3125_v59 = vpop.f32.mrb[67].mxu0 }
 0x2bb   : > { %9474 = vtanh.f32 %v3209_v37  ;;  %v3212_v22 = vpop.f32.mrb[66].mxu1  ;;  %v3126_v2 = vadd.f32 %v3125_v59, %v11899_v42 }
 0x2bc   : > { %9476 = vtanh.f32 %v3124_v21  ;;  %v3213_v34 = vadd.f32 %v3212_v22, %v11899_v42  ;;  %v3214_v7 = vpop.f32.mrb[67].mxu1 }
 0x2bd   : > { %9478 = vtanh.f32 %v3126_v2  ;;  %v3215_v28 = vadd.f32 %v3214_v7, %v11899_v42  ;;  %v3129_v24 = vpop.f32.mrb[68].mxu0 }
 0x2be   : > { %9480 = vtanh.f32 %v3213_v34  ;;  %v3130_v50 = vadd.f32 %v3129_v24, %v11905_v33  ;;  %v3131_v40 = vpop.f32.mrb[69].mxu0 }
 0x2bf   : > { %9482 = vtanh.f32 %v3215_v28  ;;  %v3218_v31 = vpop.f32.mrb[68].mxu1  ;;  %v3132_v38 = vadd.f32 %v3131_v40, %v11905_v33 }
 0x2c0   : > { %9484 = vtanh.f32 %v3130_v50  ;;  %v3219_v32 = vadd.f32 %v3218_v31, %v11905_v33  ;;  %v3220_v43 = vpop.f32.mrb[69].mxu1 }
 0x2c1   : > { %9486 = vtanh.f32 %v3132_v38  ;;  %v3221_v36 = vadd.f32 %v3220_v43, %v11905_v33  ;;  %v3135_v23 = vpop.f32.mrb[70].mxu0 }
 0x2c2   : > { %v9469_v25 = vpop.eup %9468  ;;  %9488 = vtanh.f32 %v3219_v32  ;;  %v3136_v30 = vadd.f32 %v3135_v23, %v11911_v41  ;;  %v3137_v12 = vpop.f32.mrb[71].mxu0 }
 0x2c3   : > { %v9471_v27 = vpop.eup %9470  ;;  %9490 = vtanh.f32 %v3221_v36  ;;  %v3224_v4 = vpop.f32.mrb[70].mxu1  ;;  %v3138_v18 = vadd.f32 %v3137_v12, %v11911_v41 }
 0x2c4   : > { %v9473_v6 = vpop.eup %9472  ;;  %9492 = vtanh.f32 %v3136_v30  ;;  %v3225_v17 = vadd.f32 %v3224_v4, %v11911_v41  ;;  %v3226_v39 = vpop.f32.mrb[71].mxu1 }
 0x2c5   : > { %v9475_v29 = vpop.eup %9474  ;;  %9494 = vtanh.f32 %v3138_v18  ;;  %v3227_v26 = vadd.f32 %v3226_v39, %v11911_v41  ;;  %v3295_v20 = vpop.f32.mrb[72].mxu0 }
 0x2c6   : > { %v9477_v45 = vpop.eup %9476  ;;  %9496 = vtanh.f32 %v3225_v17  ;;  %v3296_v46 = vadd.f32 %v3295_v20, %v11894_v61  ;;  %v3297_v37 = vpop.f32.mrb[73].mxu0 }
 0x2c7   : > { %v9479_v3 = vpop.eup %9478  ;;  %9498 = vtanh.f32 %v3227_v26  ;;  %v3384_v21 = vpop.f32.mrb[72].mxu1  ;;  %v3298_v59 = vadd.f32 %v3297_v37, %v11894_v61  ;;  %v8651_v22 = vpack.c.bf16 %v9477_v45, %v9469_v25 }
 0x2c8   : > { %v9481_v2 = vpop.eup %9480  ;;  %9500 = vtanh.f32 %v3296_v46  ;;  %v3385_v34 = vadd.f32 %v3384_v21, %v11894_v61  ;;  %v3386_v7 = vpop.f32.mrb[73].mxu1  ;;  %v8649_v28 = vpack.c.bf16 %v9479_v3, %v9471_v27 }
 0x2c9   : > { %v9483_v24 = vpop.eup %9482  ;;  %9502 = vtanh.f32 %v3298_v59  ;;  %v3387_v50 = vadd.f32 %v3386_v7, %v11894_v61  ;;  %v3301_v40 = vpop.f32.mrb[74].mxu0  ;;  %v8659_v31 = vpack.c.bf16 %v9481_v2, %v9473_v6 }
 0x2ca   : > { %v9485_v38 = vpop.eup %9484  ;;  %9504 = vtanh.f32 %v3385_v34  ;;  %v3302_v32 = vadd.f32 %v3301_v40, %v11899_v42  ;;  %v3303_v43 = vpop.f32.mrb[75].mxu0  ;;  %8650 = vmatprep.subr.bf16.mxu0 %v8649_v28  ;;  %v8657_v36 = vpack.c.bf16 %v9483_v24, %v9475_v29 }
 0x2cb   : > { %v9487_v23 = vpop.eup %9486  ;;  %9506 = vtanh.f32 %v3387_v50  ;;  %v3390_v25 = vpop.f32.mrb[74].mxu1  ;;  %v3304_v30 = vadd.f32 %v3303_v43, %v11899_v42  ;;  %8652 = vmatpush1.bf16.msra.mxu0 %v8651_v22 }
 0x2cc   : > { %v9489_v12 = vpop.eup %9488  ;;  %9508 = vtanh.f32 %v3302_v32  ;;  %v3391_v27 = vadd.f32 %v3390_v25, %v11899_v42  ;;  %v3392_v4 = vpop.f32.mrb[75].mxu1  ;;  %8658 = vmatprep.subr.bf16.mxu1 %v8657_v36  ;;  %v11934_v32 = vld [vmem:[%s12772_s5 + $0x40] sm:$0xff] }
 0x2cd   : > { %v9491_v18 = vpop.eup %9490  ;;  %9510 = vtanh.f32 %v3304_v30  ;;  %v3393_v6 = vadd.f32 %v3392_v4, %v11899_v42  ;;  %8660 = vmatpush1.bf16.msra.mxu1 %v8659_v31 }
 0x2ce   : > { %v9493_v17 = vpop.eup %9492  ;;  %9512 = vtanh.f32 %v3391_v27  ;;  %v3307_v39 = vpop.f32.mrb[76].mxu0 }
 0x2cf   : > { %v9495_v29 = vpop.eup %9494  ;;  %9514 = vtanh.f32 %v3393_v6  ;;  %v3308_v26 = vadd.f32 %v3307_v39, %v11905_v33  ;;  %v3309_v20 = vpop.f32.mrb[77].mxu0  ;;  %v8655_v45 = vpack.c.bf16 %v9493_v17, %v9485_v38  ;;  %v11945_v6 = vld [vmem:[%s12772_s5 + $0x48] sm:$0xff] }
 0x2d0   : > { %v9497_v46 = vpop.eup %9496  ;;  %v3396_v37 = vpop.f32.mrb[76].mxu1  ;;  %v3310_v3 = vadd.f32 %v3309_v20, %v11905_v33  ;;  %v8653_v21 = vpack.c.bf16 %v9495_v29, %v9487_v23 }
 0x2d1   : > { %v9499_v59 = vpop.eup %9498  ;;  %9516 = vtanh.f32 %v3308_v26  ;;  %v3397_v22 = vadd.f32 %v3396_v37, %v11905_v33  ;;  %v3398_v2 = vpop.f32.mrb[77].mxu1  ;;  %v8663_v34 = vpack.c.bf16 %v9497_v46, %v9489_v12 }
 0x2d2   : > { %v9501_v7 = vpop.eup %9500  ;;  %9518 = vtanh.f32 %v3310_v3  ;;  %v3399_v28 = vadd.f32 %v3398_v2, %v11905_v33  ;;  %v3313_v24 = vpop.f32.mrb[78].mxu0  ;;  %8654 = vmatprep.subr.bf16.mxu0 %v8653_v21  ;;  %v8661_v50 = vpack.c.bf16 %v9499_v59, %v9491_v18 }
 0x2d3   : > { %v9503_v40 = vpop.eup %9502  ;;  %9520 = vtanh.f32 %v3397_v22  ;;  %v3314_v31 = vadd.f32 %v3313_v24, %v11911_v41  ;;  %v3315_v38 = vpop.f32.mrb[79].mxu0  ;;  %8656 = vmatpush1.bf16.msra.mxu0 %v8655_v45 }
 0x2d4   : > { %v9505_v43 = vpop.eup %9504  ;;  %9522 = vtanh.f32 %v3399_v28  ;;  %v3402_v36 = vpop.f32.mrb[78].mxu1  ;;  %v3316_v23 = vadd.f32 %v3315_v38, %v11911_v41  ;;  %8662 = vmatprep.subr.bf16.mxu1 %v8661_v50 }
 0x2d5   : > { %v9507_v25 = vpop.eup %9506  ;;  %9524 = vtanh.f32 %v3314_v31  ;;  %v3403_v30 = vadd.f32 %v3402_v36, %v11911_v41  ;;  %v3404_v12 = vpop.f32.mrb[79].mxu1  ;;  %8664 = vmatpush1.bf16.msra.mxu1 %v8663_v34 }
 0x2d6   : > { %v9509_v27 = vpop.eup %9508  ;;  %9526 = vtanh.f32 %v3316_v23  ;;  %v3405_v4 = vadd.f32 %v3404_v12, %v11911_v41  ;;  %8298 = vmatmul.mubr.msk.f32.vlgmr.msra.gmra.mrb[128].mxu0 %vm1444_vm0, %v11934_v32 }
 0x2d7   : > { %v9511_v18 = vpop.eup %9510  ;;  %9528 = vtanh.f32 %v3403_v30  ;;  %4715 = vmatprep.mubr.f32.mxu0 %v12935_v35  ;;  %v8667_v17 = vpack.c.bf16 %v9509_v27, %v9501_v7  ;;  %v11959_v7 = vld [vmem:[%s12772_s5 + $0x50] sm:$0xff]  ;;  %v11974_v27 = vld [vmem:[%s12772_s5 + $0x58] sm:$0xff] }
 0x2d8   : > { %v9513_v39 = vpop.eup %9512  ;;  %9530 = vtanh.f32 %v3405_v4  ;;  %v3473_v29 = vpop.f32.mrb[80].mxu0  ;;  %8302 = vmatmul.mubr.msk.f32.vlgmr.msra.gmra.mrb[128].mxu1 %vm1444_vm0, %v11934_v32  ;;  %v8665_v26 = vpack.c.bf16 %v9511_v18, %v9503_v40 }
 0x2d9   : > { %v9515_v20 = vpop.eup %9514  ;;  %v3474_v45 = vadd.f32 %v3473_v29, %v11894_v61  ;;  %v3475_v46 = vpop.f32.mrb[81].mxu0  ;;  %4804 = vmatprep.mubr.f32.mxu1 %v12935_v35  ;;  %v8675_v37 = vpack.c.bf16 %v9513_v39, %v9505_v43 }
 0x2da   : > { %v3562_v3 = vpop.f32.mrb[80].mxu1  ;;  %v3476_v21 = vadd.f32 %v3475_v46, %v11894_v61  ;;  %8299 = vmatmul.mubr.msk.f32.gmra.mrb[130].mxu0 %vm1444_vm0, %v11945_v6  ;;  %8666 = vmatprep.subr.bf16.mxu0 %v8665_v26  ;;  %v8673_v59 = vpack.c.bf16 %v9515_v20, %v9507_v25 }
 0x2db   : > { %v9517_v22 = vpop.eup %9516  ;;  %9532 = vtanh.f32 %v3474_v45  ;;  %v3563_v2 = vadd.f32 %v3562_v3, %v11894_v61  ;;  %v3564_v34 = vpop.f32.mrb[81].mxu1  ;;  %8668 = vmatpush1.bf16.msra.mxu0 %v8667_v17  ;;  %4721 = vmatprep.mubr.f32.mxu0 %v12935_v35 }
 0x2dc   : > { %v9519_v28 = vpop.eup %9518  ;;  %9534 = vtanh.f32 %v3476_v21  ;;  %v3565_v24 = vadd.f32 %v3564_v34, %v11894_v61  ;;  %v3479_v50 = vpop.f32.mrb[82].mxu0  ;;  %8303 = vmatmul.mubr.msk.f32.gmra.mrb[130].mxu1 %vm1444_vm0, %v11945_v6  ;;  %8674 = vmatprep.subr.bf16.mxu1 %v8673_v59 }
 0x2dd   : > { %v9521_v40 = vpop.eup %9520  ;;  %9536 = vtanh.f32 %v3563_v2  ;;  %v3480_v31 = vadd.f32 %v3479_v50, %v11899_v42  ;;  %v3481_v38 = vpop.f32.mrb[83].mxu0  ;;  %8676 = vmatpush1.bf16.msra.mxu1 %v8675_v37  ;;  %4810 = vmatprep.mubr.f32.mxu1 %v12935_v35 }
 0x2de   : > { %v9523_v43 = vpop.eup %9522  ;;  %9538 = vtanh.f32 %v3565_v24  ;;  %v3568_v36 = vpop.f32.mrb[82].mxu1  ;;  %v3482_v23 = vadd.f32 %v3481_v38, %v11899_v42  ;;  %8300 = vmatmul.mubr.msk.f32.gmra.mrb[132].mxu0 %vm1444_vm0, %v11959_v7 }
 0x2df   : > { %v9525_v25 = vpop.eup %9524  ;;  %9540 = vtanh.f32 %v3480_v31  ;;  %v3569_v30 = vadd.f32 %v3568_v36, %v11899_v42  ;;  %v3570_v12 = vpop.f32.mrb[83].mxu1  ;;  %4727 = vmatprep.mubr.f32.mxu0 %v12935_v35 }
 0x2e0   : > { %v9527_v4 = vpop.eup %9526  ;;  %9542 = vtanh.f32 %v3482_v23  ;;  %v3571_v18 = vadd.f32 %v3570_v12, %v11899_v42  ;;  %v3485_v17 = vpop.f32.mrb[84].mxu0  ;;  %8304 = vmatmul.mubr.msk.f32.gmra.mrb[132].mxu1 %vm1444_vm0, %v11959_v7  ;;  %v8671_v39 = vpack.c.bf16 %v9525_v25, %v9517_v22 }
 0x2e1   : > { %v9529_v29 = vpop.eup %9528  ;;  %9544 = vtanh.f32 %v3569_v30  ;;  %v3486_v26 = vadd.f32 %v3485_v17, %v11905_v33  ;;  %v3487_v20 = vpop.f32.mrb[85].mxu0  ;;  %4816 = vmatprep.mubr.f32.mxu1 %v12935_v35  ;;  %v8669_v45 = vpack.c.bf16 %v9527_v4, %v9519_v28 }
 0x2e2   : > { %v9531_v46 = vpop.eup %9530  ;;  %9546 = vtanh.f32 %v3571_v18  ;;  %v3574_v37 = vpop.f32.mrb[84].mxu1  ;;  %v3488_v3 = vadd.f32 %v3487_v20, %v11905_v33  ;;  %8301 = vmatmul.mubr.msk.f32.gmra.mrb[134].mxu0 %vm1444_vm0, %v11974_v27  ;;  %v8679_v21 = vpack.c.bf16 %v9529_v29, %v9521_v40 }
 0x2e3   : > { %v3575_v59 = vadd.f32 %v3574_v37, %v11905_v33  ;;  %v3576_v22 = vpop.f32.mrb[85].mxu1  ;;  %8670 = vmatprep.subr.bf16.mxu0 %v8669_v45  ;;  %v8677_v2 = vpack.c.bf16 %v9531_v46, %v9523_v43  ;;  %4887 = vmatprep.mubr.f32.mxu0 %v12935_v35  ;;  %9548 = vtanh.f32 %v3486_v26 }
 0x2e4   : > { %v3577_v34 = vadd.f32 %v3576_v22, %v11905_v33  ;;  %8305 = vmatmul.mubr.msk.f32.gmra.mrb[134].mxu1 %vm1444_vm0, %v11974_v27  ;;  %8672 = vmatpush1.bf16.msra.mxu0 %v8671_v39  ;;  %9550 = vtanh.f32 %v3488_v3 }
 0x2e5   : > { %v9533_v28 = vpop.eup %9532  ;;  %v3491_v24 = vpop.f32.mrb[86].mxu0  ;;  %8678 = vmatprep.subr.bf16.mxu1 %v8677_v2  ;;  %4976 = vmatprep.mubr.f32.mxu1 %v12935_v35  ;;  %9552 = vtanh.f32 %v3575_v59 }
 0x2e6   : > { %v9535_v50 = vpop.eup %9534  ;;  %v3492_v40 = vadd.f32 %v3491_v24, %v11911_v41  ;;  %v3493_v31 = vpop.f32.mrb[87].mxu0  ;;  %8680 = vmatpush1.bf16.msra.mxu1 %v8679_v21  ;;  %9554 = vtanh.f32 %v3577_v34 }
 0x2e7   : > { %v9537_v38 = vpop.eup %9536  ;;  %v3580_v43 = vpop.f32.mrb[86].mxu1  ;;  %v3494_v36 = vadd.f32 %v3493_v31, %v11911_v41  ;;  %8306 = vmatmul.mubr.msk.f32.vlgmr.msra.gmra.mrb[136].mxu0 %vm1444_vm0, %v11934_v32 }
 0x2e8   : > { %v9539_v23 = vpop.eup %9538  ;;  %9556 = vtanh.f32 %v3492_v40  ;;  %v3581_v25 = vadd.f32 %v3580_v43, %v11911_v41  ;;  %v3582_v30 = vpop.f32.mrb[87].mxu1  ;;  %4893 = vmatprep.mubr.f32.mxu0 %v12935_v35 }
 0x2e9   : > { %v9541_v12 = vpop.eup %9540  ;;  %9558 = vtanh.f32 %v3494_v36  ;;  %v3583_v4 = vadd.f32 %v3582_v30, %v11911_v41  ;;  %8310 = vmatmul.mubr.msk.f32.vlgmr.msra.gmra.mrb[136].mxu1 %vm1444_vm0, %v11934_v32 }
 0x2ea   : > { %v9543_v18 = vpop.eup %9542  ;;  %9560 = vtanh.f32 %v3581_v25  ;;  %4982 = vmatprep.mubr.f32.mxu1 %v12935_v35  ;;  %v8683_v17 = vpack.c.bf16 %v9541_v12, %v9533_v28 }
 0x2eb   : > { %v9545_v39 = vpop.eup %9544  ;;  %9562 = vtanh.f32 %v3583_v4  ;;  %8307 = vmatmul.mubr.msk.f32.gmra.mrb[138].mxu0 %vm1444_vm0, %v11945_v6  ;;  %v8681_v29 = vpack.c.bf16 %v9543_v18, %v9535_v50 }
 0x2ec   : > { %v9547_v26 = vpop.eup %9546  ;;  %v8691_v20 = vpack.c.bf16 %v9545_v39, %v9537_v38  ;;  %4899 = vmatprep.mubr.f32.mxu0 %v12935_v35 }
 0x2ed   : > { %8311 = vmatmul.mubr.msk.f32.gmra.mrb[138].mxu1 %vm1444_vm0, %v11945_v6  ;;  %8682 = vmatprep.subr.bf16.mxu0 %v8681_v29  ;;  %v8689_v45 = vpack.c.bf16 %v9547_v26, %v9539_v23  ;;  %v9549_v46 = vpop.eup %9548 }
 0x2ee   : > { %8684 = vmatpush1.bf16.msra.mxu0 %v8683_v17  ;;  %4988 = vmatprep.mubr.f32.mxu1 %v12935_v35  ;;  %v9551_v37 = vpop.eup %9550 }
 0x2ef   : > { %8690 = vmatprep.subr.bf16.mxu1 %v8689_v45  ;;  %8308 = vmatmul.mubr.msk.f32.gmra.mrb[140].mxu0 %vm1444_vm0, %v11959_v7  ;;  %v9553_v3 = vpop.eup %9552 }
 0x2f0   : > { %v3651_v21 = vpop.f32.mrb[88].mxu0  ;;  %8692 = vmatpush1.bf16.msra.mxu1 %v8691_v20  ;;  %4905 = vmatprep.mubr.f32.mxu0 %v12935_v35  ;;  %v9555_v59 = vpop.eup %9554 }
 0x2f1   : > { %v3652_v22 = vadd.f32 %v3651_v21, %v11894_v61  ;;  %v3653_v2 = vpop.f32.mrb[89].mxu0  ;;  %8312 = vmatmul.mubr.msk.f32.gmra.mrb[140].mxu1 %vm1444_vm0, %v11959_v7 }
 0x2f2   : > { %v9557_v34 = vpop.eup %9556  ;;  %v3740_v28 = vpop.f32.mrb[88].mxu1  ;;  %v3654_v24 = vadd.f32 %v3653_v2, %v11894_v61  ;;  %4994 = vmatprep.mubr.f32.mxu1 %v12935_v35 }
 0x2f3   : > { %v9559_v50 = vpop.eup %9558  ;;  %9564 = vtanh.f32 %v3652_v22  ;;  %v3741_v40 = vadd.f32 %v3740_v28, %v11894_v61  ;;  %v3742_v31 = vpop.f32.mrb[89].mxu1  ;;  %8309 = vmatmul.mubr.msk.f32.gmra.mrb[142].mxu0 %vm1444_vm0, %v11974_v27  ;;  %v8687_v38 = vpack.c.bf16 %v9557_v34, %v9549_v46 }
 0x2f4   : > { %v9561_v43 = vpop.eup %9560  ;;  %9566 = vtanh.f32 %v3654_v24  ;;  %v3743_v36 = vadd.f32 %v3742_v31, %v11894_v61  ;;  %v3657_v23 = vpop.f32.mrb[90].mxu0  ;;  %v8685_v25 = vpack.c.bf16 %v9559_v50, %v9551_v37  ;;  %5065 = vmatprep.mubr.f32.mxu0 %v12935_v35 }
 0x2f5   : > { %v9563_v30 = vpop.eup %9562  ;;  %9568 = vtanh.f32 %v3741_v40  ;;  %v3658_v12 = vadd.f32 %v3657_v23, %v11899_v42  ;;  %v3659_v4 = vpop.f32.mrb[91].mxu0  ;;  %8313 = vmatmul.mubr.msk.f32.gmra.mrb[142].mxu1 %vm1444_vm0, %v11974_v27  ;;  %v8695_v18 = vpack.c.bf16 %v9561_v43, %v9553_v3 }
 0x2f6   : > { %9570 = vtanh.f32 %v3743_v36  ;;  %v3746_v17 = vpop.f32.mrb[90].mxu1  ;;  %v3660_v39 = vadd.f32 %v3659_v4, %v11899_v42  ;;  %8686 = vmatprep.subr.bf16.mxu0 %v8685_v25  ;;  %v8693_v29 = vpack.c.bf16 %v9563_v30, %v9555_v59  ;;  %5154 = vmatprep.mubr.f32.mxu1 %v12935_v35 }
 0x2f7   : > { %9572 = vtanh.f32 %v3658_v12  ;;  %v3747_v26 = vadd.f32 %v3746_v17, %v11899_v42  ;;  %v3748_v20 = vpop.f32.mrb[91].mxu1  ;;  %8688 = vmatpush1.bf16.msra.mxu0 %v8687_v38 }
 0x2f8   : > { %9574 = vtanh.f32 %v3660_v39  ;;  %v3749_v45 = vadd.f32 %v3748_v20, %v11899_v42  ;;  %v3663_v46 = vpop.f32.mrb[92].mxu0  ;;  %8694 = vmatprep.subr.bf16.mxu1 %v8693_v29 }
 0x2f9   : > { %9576 = vtanh.f32 %v3747_v26  ;;  %v3664_v37 = vadd.f32 %v3663_v46, %v11905_v33  ;;  %v3665_v3 = vpop.f32.mrb[93].mxu0  ;;  %8696 = vmatpush1.bf16.msra.mxu1 %v8695_v18 }
 0x2fa   : > { %9578 = vtanh.f32 %v3749_v45  ;;  %v3752_v21 = vpop.f32.mrb[92].mxu1  ;;  %v3666_v59 = vadd.f32 %v3665_v3, %v11905_v33  ;;  %8314 = vmatmul.mubr.msk.f32.vlgmr.msra.gmra.mrb[144].mxu0 %vm1444_vm0, %v11934_v32 }
 0x2fb   : > { %9580 = vtanh.f32 %v3664_v37  ;;  %v3753_v22 = vadd.f32 %v3752_v21, %v11905_v33  ;;  %v3754_v2 = vpop.f32.mrb[93].mxu1  ;;  %5071 = vmatprep.mubr.f32.mxu0 %v12935_v35 }
 0x2fc   : > { %9582 = vtanh.f32 %v3666_v59  ;;  %v3755_v34 = vadd.f32 %v3754_v2, %v11905_v33  ;;  %v3669_v28 = vpop.f32.mrb[94].mxu0  ;;  %8318 = vmatmul.mubr.msk.f32.vlgmr.msra.gmra.mrb[144].mxu1 %vm1444_vm0, %v11934_v32 }
 0x2fd   : > { %v9565_v24 = vpop.eup %9564  ;;  %9584 = vtanh.f32 %v3753_v22  ;;  %v3670_v50 = vadd.f32 %v3669_v28, %v11911_v41  ;;  %v3671_v40 = vpop.f32.mrb[95].mxu0  ;;  %5160 = vmatprep.mubr.f32.mxu1 %v12935_v35 }
 0x2fe   : > { %v9567_v31 = vpop.eup %9566  ;;  %9586 = vtanh.f32 %v3755_v34  ;;  %v3758_v38 = vpop.f32.mrb[94].mxu1  ;;  %v3672_v43 = vadd.f32 %v3671_v40, %v11911_v41  ;;  %8315 = vmatmul.mubr.msk.f32.gmra.mrb[146].mxu0 %vm1444_vm0, %v11945_v6 }
 0x2ff   : > { %v9569_v36 = vpop.eup %9568  ;;  %9588 = vtanh.f32 %v3670_v50  ;;  %v3759_v23 = vadd.f32 %v3758_v38, %v11911_v41  ;;  %v3760_v25 = vpop.f32.mrb[95].mxu1  ;;  %5077 = vmatprep.mubr.f32.mxu0 %v12935_v35 }
 0x300   : > { %v9571_v30 = vpop.eup %9570  ;;  %9590 = vtanh.f32 %v3672_v43  ;;  %v3761_v12 = vadd.f32 %v3760_v25, %v11911_v41  ;;  %8319 = vmatmul.mubr.msk.f32.gmra.mrb[146].mxu1 %vm1444_vm0, %v11945_v6 }
 0x301   : > { %v9573_v4 = vpop.eup %9572  ;;  %9592 = vtanh.f32 %v3759_v23  ;;  %5166 = vmatprep.mubr.f32.mxu1 %v12935_v35 }
 0x302   : > { %v9575_v18 = vpop.eup %9574  ;;  %9594 = vtanh.f32 %v3761_v12  ;;  %v8699_v17 = vpack.c.bf16 %v9573_v4, %v9565_v24  ;;  %8316 = vmatmul.mubr.msk.f32.gmra.mrb[148].mxu0 %vm1444_vm0, %v11959_v7 }
 0x303   : > { %v9577_v39 = vpop.eup %9576  ;;  %v8697_v29 = vpack.c.bf16 %v9575_v18, %v9567_v31  ;;  %5083 = vmatprep.mubr.f32.mxu0 %v12935_v35 }
 0x304   : > { %v9579_v26 = vpop.eup %9578  ;;  %v8707_v20 = vpack.c.bf16 %v9577_v39, %v9569_v36  ;;  %8320 = vmatmul.mubr.msk.f32.gmra.mrb[148].mxu1 %vm1444_vm0, %v11959_v7 }
 0x305   : > { %v9581_v45 = vpop.eup %9580  ;;  %8698 = vmatprep.subr.bf16.mxu0 %v8697_v29  ;;  %v8705_v46 = vpack.c.bf16 %v9579_v26, %v9571_v30  ;;  %5172 = vmatprep.mubr.f32.mxu1 %v12935_v35 }
 0x306   : > { %v9583_v37 = vpop.eup %9582  ;;  %8700 = vmatpush1.bf16.msra.mxu0 %v8699_v17 }
 0x307   : > { %v3829_v3 = vpop.f32.mrb[96].mxu0  ;;  %v9585_v21 = vpop.eup %9584  ;;  %8706 = vmatprep.subr.bf16.mxu1 %v8705_v46  ;;  %8317 = vmatmul.mubr.msk.f32.gmra.mrb[150].mxu0 %vm1444_vm0, %v11974_v27 }
 0x308   : > { %v3830_v59 = vadd.f32 %v3829_v3, %v11894_v61  ;;  %v3831_v22 = vpop.f32.mrb[97].mxu0  ;;  %v9587_v2 = vpop.eup %9586  ;;  %8708 = vmatpush1.bf16.msra.mxu1 %v8707_v20  ;;  %5243 = vmatprep.mubr.f32.mxu0 %v12935_v35 }
 0x309   : > { %v3918_v34 = vpop.f32.mrb[96].mxu1  ;;  %v3832_v28 = vadd.f32 %v3831_v22, %v11894_v61  ;;  %v9589_v24 = vpop.eup %9588  ;;  %8321 = vmatmul.mubr.msk.f32.gmra.mrb[150].mxu1 %vm1444_vm0, %v11974_v27 }
 0x30a   : > { %9596 = vtanh.f32 %v3830_v59  ;;  %v3919_v50 = vadd.f32 %v3918_v34, %v11894_v61  ;;  %v3920_v40 = vpop.f32.mrb[97].mxu1  ;;  %v9591_v31 = vpop.eup %9590  ;;  %v8703_v36 = vpack.c.bf16 %v9589_v24, %v9581_v45  ;;  %5332 = vmatprep.mubr.f32.mxu1 %v12935_v35 }
 0x30b   : > { %9598 = vtanh.f32 %v3832_v28  ;;  %v3921_v38 = vadd.f32 %v3920_v40, %v11894_v61  ;;  %v3835_v43 = vpop.f32.mrb[98].mxu0  ;;  %v9593_v23 = vpop.eup %9592  ;;  %v8701_v12 = vpack.c.bf16 %v9591_v31, %v9583_v37 }
 0x30c   : > { %9600 = vtanh.f32 %v3919_v50  ;;  %v3836_v25 = vadd.f32 %v3835_v43, %v11899_v42  ;;  %v3837_v30 = vpop.f32.mrb[99].mxu0  ;;  %v9595_v4 = vpop.eup %9594  ;;  %v8711_v39 = vpack.c.bf16 %v9593_v23, %v9585_v21 }
 0x30d   : > { %9602 = vtanh.f32 %v3921_v38  ;;  %v3924_v18 = vpop.f32.mrb[98].mxu1  ;;  %v3838_v17 = vadd.f32 %v3837_v30, %v11899_v42  ;;  %8702 = vmatprep.subr.bf16.mxu0 %v8701_v12  ;;  %v8709_v20 = vpack.c.bf16 %v9595_v4, %v9587_v2 }
 0x30e   : > { %9604 = vtanh.f32 %v3836_v25  ;;  %v3925_v29 = vadd.f32 %v3924_v18, %v11899_v42  ;;  %v3926_v26 = vpop.f32.mrb[99].mxu1  ;;  %8704 = vmatpush1.bf16.msra.mxu0 %v8703_v36 }
 0x30f   : > { %9606 = vtanh.f32 %v3838_v17  ;;  %v3927_v45 = vadd.f32 %v3926_v26, %v11899_v42  ;;  %v3841_v46 = vpop.f32.mrb[100].mxu0  ;;  %8710 = vmatprep.subr.bf16.mxu1 %v8709_v20 }
 0x310   : > { %9608 = vtanh.f32 %v3925_v29  ;;  %v3842_v37 = vadd.f32 %v3841_v46, %v11905_v33  ;;  %v3843_v3 = vpop.f32.mrb[101].mxu0  ;;  %8712 = vmatpush1.bf16.msra.mxu1 %v8711_v39 }
 0x311   : > { %9610 = vtanh.f32 %v3927_v45  ;;  %v3930_v59 = vpop.f32.mrb[100].mxu1  ;;  %v3844_v21 = vadd.f32 %v3843_v3, %v11905_v33  ;;  %8322 = vmatmul.mubr.msk.f32.vlgmr.msra.gmra.mrb[152].mxu0 %vm1444_vm0, %v11934_v32 }
 0x312   : > { %9612 = vtanh.f32 %v3842_v37  ;;  %v3931_v22 = vadd.f32 %v3930_v59, %v11905_v33  ;;  %v3932_v34 = vpop.f32.mrb[101].mxu1  ;;  %5249 = vmatprep.mubr.f32.mxu0 %v12935_v35 }
 0x313   : > { %9614 = vtanh.f32 %v3844_v21  ;;  %v3933_v2 = vadd.f32 %v3932_v34, %v11905_v33  ;;  %v3847_v28 = vpop.f32.mrb[102].mxu0  ;;  %8326 = vmatmul.mubr.msk.f32.vlgmr.msra.gmra.mrb[152].mxu1 %vm1444_vm0, %v11934_v32 }
 0x314   : > { %v9597_v24 = vpop.eup %9596  ;;  %9616 = vtanh.f32 %v3931_v22  ;;  %v3848_v50 = vadd.f32 %v3847_v28, %v11911_v41  ;;  %v3849_v40 = vpop.f32.mrb[103].mxu0  ;;  %5338 = vmatprep.mubr.f32.mxu1 %v12935_v35 }
 0x315   : > { %v9599_v31 = vpop.eup %9598  ;;  %9618 = vtanh.f32 %v3933_v2  ;;  %v3936_v38 = vpop.f32.mrb[102].mxu1  ;;  %v3850_v43 = vadd.f32 %v3849_v40, %v11911_v41  ;;  %8323 = vmatmul.mubr.msk.f32.gmra.mrb[154].mxu0 %vm1444_vm0, %v11945_v6 }
 0x316   : > { %v9601_v36 = vpop.eup %9600  ;;  %9620 = vtanh.f32 %v3848_v50  ;;  %v3937_v23 = vadd.f32 %v3936_v38, %v11911_v41  ;;  %v3938_v25 = vpop.f32.mrb[103].mxu1  ;;  %5255 = vmatprep.mubr.f32.mxu0 %v12935_v35 }
 0x317   : > { %v9603_v30 = vpop.eup %9602  ;;  %9622 = vtanh.f32 %v3850_v43  ;;  %v3939_v12 = vadd.f32 %v3938_v25, %v11911_v41  ;;  %8327 = vmatmul.mubr.msk.f32.gmra.mrb[154].mxu1 %vm1444_vm0, %v11945_v6 }
 0x318   : > { %v9605_v4 = vpop.eup %9604  ;;  %9624 = vtanh.f32 %v3937_v23  ;;  %5344 = vmatprep.mubr.f32.mxu1 %v12935_v35 }
 0x319   : > { %v9607_v18 = vpop.eup %9606  ;;  %9626 = vtanh.f32 %v3939_v12  ;;  %v8715_v17 = vpack.c.bf16 %v9605_v4, %v9597_v24  ;;  %8324 = vmatmul.mubr.msk.f32.gmra.mrb[156].mxu0 %vm1444_vm0, %v11959_v7 }
 0x31a   : > { %v9609_v39 = vpop.eup %9608  ;;  %v8713_v29 = vpack.c.bf16 %v9607_v18, %v9599_v31  ;;  %5261 = vmatprep.mubr.f32.mxu0 %v12935_v35 }
 0x31b   : > { %v9611_v26 = vpop.eup %9610  ;;  %v8723_v20 = vpack.c.bf16 %v9609_v39, %v9601_v36  ;;  %v4007_v46 = vpop.f32.mrb[104].mxu0  ;;  %8328 = vmatmul.mubr.msk.f32.gmra.mrb[156].mxu1 %vm1444_vm0, %v11959_v7 }
 0x31c   : > { %v9613_v45 = vpop.eup %9612  ;;  %8714 = vmatprep.subr.bf16.mxu0 %v8713_v29  ;;  %v8721_v37 = vpack.c.bf16 %v9611_v26, %v9603_v30  ;;  %v4008_v59 = vadd.f32 %v4007_v46, %v11894_v61  ;;  %v4009_v21 = vpop.f32.mrb[105].mxu0  ;;  %5350 = vmatprep.mubr.f32.mxu1 %v12935_v35 }
 0x31d   : > { %v9615_v3 = vpop.eup %9614  ;;  %8716 = vmatpush1.bf16.msra.mxu0 %v8715_v17  ;;  %v4096_v34 = vpop.f32.mrb[104].mxu1  ;;  %v4010_v2 = vadd.f32 %v4009_v21, %v11894_v61 }
 0x31e   : > { %v9617_v22 = vpop.eup %9616  ;;  %8722 = vmatprep.subr.bf16.mxu1 %v8721_v37  ;;  %8325 = vmatmul.mubr.msk.f32.gmra.mrb[158].mxu0 %vm1444_vm0, %v11974_v27  ;;  %9628 = vtanh.f32 %v4008_v59  ;;  %v4097_v24 = vadd.f32 %v4096_v34, %v11894_v61  ;;  %v4098_v50 = vpop.f32.mrb[105].mxu1 }
 0x31f   : > { %v9619_v28 = vpop.eup %9618  ;;  %8724 = vmatpush1.bf16.msra.mxu1 %v8723_v20  ;;  %5421 = vmatprep.mubr.f32.mxu0 %v12935_v35  ;;  %9630 = vtanh.f32 %v4010_v2  ;;  %v4099_v31 = vadd.f32 %v4098_v50, %v11894_v61  ;;  %v4013_v38 = vpop.f32.mrb[106].mxu0 }
 0x320   : > { %v9621_v40 = vpop.eup %9620  ;;  %8329 = vmatmul.mubr.msk.f32.gmra.mrb[158].mxu1 %vm1444_vm0, %v11974_v27  ;;  %9632 = vtanh.f32 %v4097_v24  ;;  %v4014_v36 = vadd.f32 %v4013_v38, %v11899_v42  ;;  %v4015_v23 = vpop.f32.mrb[107].mxu0 }
 0x321   : > { %v9623_v43 = vpop.eup %9622  ;;  %v8719_v25 = vpack.c.bf16 %v9621_v40, %v9613_v45  ;;  %5510 = vmatprep.mubr.f32.mxu1 %v12935_v35  ;;  %9634 = vtanh.f32 %v4099_v31  ;;  %v4102_v12 = vpop.f32.mrb[106].mxu1  ;;  %v4016_v4 = vadd.f32 %v4015_v23, %v11899_v42 }
 0x322   : > { %v9625_v30 = vpop.eup %9624  ;;  %v8717_v18 = vpack.c.bf16 %v9623_v43, %v9615_v3  ;;  %9636 = vtanh.f32 %v4014_v36  ;;  %v4103_v39 = vadd.f32 %v4102_v12, %v11899_v42  ;;  %v4104_v29 = vpop.f32.mrb[107].mxu1 }
 0x323   : > { %v9627_v17 = vpop.eup %9626  ;;  %v8727_v26 = vpack.c.bf16 %v9625_v30, %v9617_v22  ;;  %9638 = vtanh.f32 %v4016_v4  ;;  %v4105_v20 = vadd.f32 %v4104_v29, %v11899_v42  ;;  %v4019_v46 = vpop.f32.mrb[108].mxu0 }
 0x324   : > { %8718 = vmatprep.subr.bf16.mxu0 %v8717_v18  ;;  %v8725_v45 = vpack.c.bf16 %v9627_v17, %v9619_v28  ;;  %9640 = vtanh.f32 %v4103_v39  ;;  %v4020_v37 = vadd.f32 %v4019_v46, %v11905_v33  ;;  %v4021_v59 = vpop.f32.mrb[109].mxu0 }
 0x325   : > { %8720 = vmatpush1.bf16.msra.mxu0 %v8719_v25  ;;  %9642 = vtanh.f32 %v4105_v20  ;;  %v4108_v21 = vpop.f32.mrb[108].mxu1  ;;  %v4022_v3 = vadd.f32 %v4021_v59, %v11905_v33 }
 0x326   : > { %8726 = vmatprep.subr.bf16.mxu1 %v8725_v45  ;;  %9644 = vtanh.f32 %v4020_v37  ;;  %v4109_v34 = vadd.f32 %v4108_v21, %v11905_v33  ;;  %v4110_v22 = vpop.f32.mrb[109].mxu1 }
 0x327   : > { %8728 = vmatpush1.bf16.msra.mxu1 %v8727_v26  ;;  %9646 = vtanh.f32 %v4022_v3  ;;  %v4111_v2 = vadd.f32 %v4110_v22, %v11905_v33  ;;  %v4025_v24 = vpop.f32.mrb[110].mxu0 }
 0x328   : > { %8330 = vmatmul.mubr.msk.f32.vlgmr.msra.gmra.mrb[160].mxu0 %vm1444_vm0, %v11934_v32  ;;  %v9629_v28 = vpop.eup %9628  ;;  %9648 = vtanh.f32 %v4109_v34  ;;  %v4026_v50 = vadd.f32 %v4025_v24, %v11911_v41  ;;  %v4027_v40 = vpop.f32.mrb[111].mxu0 }
 0x329   : > { %5427 = vmatprep.mubr.f32.mxu0 %v12935_v35  ;;  %v9631_v31 = vpop.eup %9630  ;;  %9650 = vtanh.f32 %v4111_v2  ;;  %v4114_v38 = vpop.f32.mrb[110].mxu1  ;;  %v4028_v43 = vadd.f32 %v4027_v40, %v11911_v41 }
 0x32a   : > { %8334 = vmatmul.mubr.msk.f32.vlgmr.msra.gmra.mrb[160].mxu1 %vm1444_vm0, %v11934_v32  ;;  %v9633_v36 = vpop.eup %9632  ;;  %9652 = vtanh.f32 %v4026_v50  ;;  %v4115_v23 = vadd.f32 %v4114_v38, %v11911_v41  ;;  %v4116_v25 = vpop.f32.mrb[111].mxu1 }
 0x32b   : > { %5516 = vmatprep.mubr.f32.mxu1 %v12935_v35  ;;  %v9635_v30 = vpop.eup %9634  ;;  %9654 = vtanh.f32 %v4028_v43  ;;  %v4117_v12 = vadd.f32 %v4116_v25, %v11911_v41 }
 0x32c   : > { %8331 = vmatmul.mubr.msk.f32.gmra.mrb[162].mxu0 %vm1444_vm0, %v11945_v6  ;;  %v9637_v4 = vpop.eup %9636  ;;  %9656 = vtanh.f32 %v4115_v23 }
 0x32d   : > { %5433 = vmatprep.mubr.f32.mxu0 %v12935_v35  ;;  %v9639_v18 = vpop.eup %9638  ;;  %9658 = vtanh.f32 %v4117_v12  ;;  %v8731_v17 = vpack.c.bf16 %v9637_v4, %v9629_v28 }
 0x32e   : > { %8335 = vmatmul.mubr.msk.f32.gmra.mrb[162].mxu1 %vm1444_vm0, %v11945_v6  ;;  %v9641_v39 = vpop.eup %9640  ;;  %v8729_v29 = vpack.c.bf16 %v9639_v18, %v9631_v31 }
 0x32f   : > { %5522 = vmatprep.mubr.f32.mxu1 %v12935_v35  ;;  %v9643_v26 = vpop.eup %9642  ;;  %v8739_v20 = vpack.c.bf16 %v9641_v39, %v9633_v36 }
 0x330   : > { %8332 = vmatmul.mubr.msk.f32.gmra.mrb[164].mxu0 %vm1444_vm0, %v11959_v7  ;;  %v9645_v46 = vpop.eup %9644  ;;  %8730 = vmatprep.subr.bf16.mxu0 %v8729_v29  ;;  %v8737_v45 = vpack.c.bf16 %v9643_v26, %v9635_v30 }
 0x331   : > { %5439 = vmatprep.mubr.f32.mxu0 %v12935_v35  ;;  %v9647_v37 = vpop.eup %9646  ;;  %8732 = vmatpush1.bf16.msra.mxu0 %v8731_v17 }
 0x332   : > { %8336 = vmatmul.mubr.msk.f32.gmra.mrb[164].mxu1 %vm1444_vm0, %v11959_v7  ;;  %v9649_v59 = vpop.eup %9648  ;;  %8738 = vmatprep.subr.bf16.mxu1 %v8737_v45 }
 0x333   : > { %5528 = vmatprep.mubr.f32.mxu1 %v12935_v35  ;;  %v9651_v21 = vpop.eup %9650  ;;  %v4185_v3 = vpop.f32.mrb[112].mxu0  ;;  %8740 = vmatpush1.bf16.msra.mxu1 %v8739_v20 }
 0x334   : > { %8333 = vmatmul.mubr.msk.f32.gmra.mrb[166].mxu0 %vm1444_vm0, %v11974_v27  ;;  %v9653_v34 = vpop.eup %9652  ;;  %v4186_v22 = vadd.f32 %v4185_v3, %v11894_v61  ;;  %v4187_v2 = vpop.f32.mrb[113].mxu0 }
 0x335   : > { %5599 = vmatprep.mubr.f32.mxu0 %v12935_v35  ;;  %v9655_v24 = vpop.eup %9654  ;;  %v4274_v28 = vpop.f32.mrb[112].mxu1  ;;  %v4188_v50 = vadd.f32 %v4187_v2, %v11894_v61  ;;  %v8735_v40 = vpack.c.bf16 %v9653_v34, %v9645_v46 }
 0x336   : > { %8337 = vmatmul.mubr.msk.f32.gmra.mrb[166].mxu1 %vm1444_vm0, %v11974_v27  ;;  %v9657_v31 = vpop.eup %9656  ;;  %9660 = vtanh.f32 %v4186_v22  ;;  %v4275_v38 = vadd.f32 %v4274_v28, %v11894_v61  ;;  %v4276_v43 = vpop.f32.mrb[113].mxu1  ;;  %v8733_v36 = vpack.c.bf16 %v9655_v24, %v9647_v37 }
 0x337   : > { %5688 = vmatprep.mubr.f32.mxu1 %v12935_v35  ;;  %v9659_v23 = vpop.eup %9658  ;;  %9662 = vtanh.f32 %v4188_v50  ;;  %v4277_v25 = vadd.f32 %v4276_v43, %v11894_v61  ;;  %v4191_v30 = vpop.f32.mrb[114].mxu0  ;;  %v8743_v12 = vpack.c.bf16 %v9657_v31, %v9649_v59 }
 0x338   : > { %9664 = vtanh.f32 %v4275_v38  ;;  %v4192_v4 = vadd.f32 %v4191_v30, %v11899_v42  ;;  %v4193_v18 = vpop.f32.mrb[115].mxu0  ;;  %8734 = vmatprep.subr.bf16.mxu0 %v8733_v36  ;;  %v8741_v17 = vpack.c.bf16 %v9659_v23, %v9651_v21 }
 0x339   : > { %9666 = vtanh.f32 %v4277_v25  ;;  %v4280_v39 = vpop.f32.mrb[114].mxu1  ;;  %v4194_v29 = vadd.f32 %v4193_v18, %v11899_v42  ;;  %8736 = vmatpush1.bf16.msra.mxu0 %v8735_v40 }
 0x33a   : > { %9668 = vtanh.f32 %v4192_v4  ;;  %v4281_v26 = vadd.f32 %v4280_v39, %v11899_v42  ;;  %v4282_v20 = vpop.f32.mrb[115].mxu1  ;;  %8742 = vmatprep.subr.bf16.mxu1 %v8741_v17 }
 0x33b   : > { %9670 = vtanh.f32 %v4194_v29  ;;  %v4283_v46 = vadd.f32 %v4282_v20, %v11899_v42  ;;  %v4197_v45 = vpop.f32.mrb[116].mxu0  ;;  %8744 = vmatpush1.bf16.msra.mxu1 %v8743_v12 }
 0x33c   : > { %9672 = vtanh.f32 %v4281_v26  ;;  %v4198_v37 = vadd.f32 %v4197_v45, %v11905_v33  ;;  %v4199_v59 = vpop.f32.mrb[117].mxu0  ;;  %8338 = vmatmul.mubr.msk.f32.vlgmr.msra.gmra.mrb[168].mxu0 %vm1444_vm0, %v11934_v32 }
 0x33d   : > { %9674 = vtanh.f32 %v4283_v46  ;;  %v4286_v21 = vpop.f32.mrb[116].mxu1  ;;  %v4200_v3 = vadd.f32 %v4199_v59, %v11905_v33  ;;  %5605 = vmatprep.mubr.f32.mxu0 %v12935_v35 }
 0x33e   : > { %9676 = vtanh.f32 %v4198_v37  ;;  %v4287_v34 = vadd.f32 %v4286_v21, %v11905_v33  ;;  %v4288_v22 = vpop.f32.mrb[117].mxu1  ;;  %8342 = vmatmul.mubr.msk.f32.vlgmr.msra.gmra.mrb[168].mxu1 %vm1444_vm0, %v11934_v32 }
 0x33f   : > { %9678 = vtanh.f32 %v4200_v3  ;;  %v4289_v2 = vadd.f32 %v4288_v22, %v11905_v33  ;;  %v4203_v24 = vpop.f32.mrb[118].mxu0  ;;  %5694 = vmatprep.mubr.f32.mxu1 %v12935_v35 }
 0x340   : > { %v9661_v28 = vpop.eup %9660  ;;  %9680 = vtanh.f32 %v4287_v34  ;;  %v4204_v50 = vadd.f32 %v4203_v24, %v11911_v41  ;;  %v4205_v40 = vpop.f32.mrb[119].mxu0  ;;  %8339 = vmatmul.mubr.msk.f32.gmra.mrb[170].mxu0 %vm1444_vm0, %v11945_v6 }
 0x341   : > { %v9663_v31 = vpop.eup %9662  ;;  %9682 = vtanh.f32 %v4289_v2  ;;  %v4292_v38 = vpop.f32.mrb[118].mxu1  ;;  %v4206_v43 = vadd.f32 %v4205_v40, %v11911_v41  ;;  %5611 = vmatprep.mubr.f32.mxu0 %v12935_v35 }
 0x342   : > { %v9665_v32 = vpop.eup %9664  ;;  %9684 = vtanh.f32 %v4204_v50  ;;  %v4293_v36 = vadd.f32 %v4292_v38, %v11911_v41  ;;  %v4294_v23 = vpop.f32.mrb[119].mxu1  ;;  %8343 = vmatmul.mubr.msk.f32.gmra.mrb[170].mxu1 %vm1444_vm0, %v11945_v6 }
 0x343   : > { %v9667_v25 = vpop.eup %9666  ;;  %9686 = vtanh.f32 %v4206_v43  ;;  %v4295_v30 = vadd.f32 %v4294_v23, %v11911_v41  ;;  %5700 = vmatprep.mubr.f32.mxu1 %v12935_v35 }
 0x344   : > { %v9669_v12 = vpop.eup %9668  ;;  %9688 = vtanh.f32 %v4293_v36  ;;  %8340 = vmatmul.mubr.msk.f32.gmra.mrb[172].mxu0 %vm1444_vm0, %v11959_v7 }
 0x345   : > { %v9671_v4 = vpop.eup %9670  ;;  %9690 = vtanh.f32 %v4295_v30  ;;  %v8747_v18 = vpack.c.bf16 %v9669_v12, %v9661_v28  ;;  %5617 = vmatprep.mubr.f32.mxu0 %v12935_v35 }
 0x346   : > { %v9673_v17 = vpop.eup %9672  ;;  %v8745_v39 = vpack.c.bf16 %v9671_v4, %v9663_v31  ;;  %8344 = vmatmul.mubr.msk.f32.gmra.mrb[172].mxu1 %vm1444_vm0, %v11959_v7 }
 0x347   : > { %v9675_v6 = vpop.eup %9674  ;;  %v8755_v29 = vpack.c.bf16 %v9673_v17, %v9665_v32  ;;  %5706 = vmatprep.mubr.f32.mxu1 %v12935_v35 }
 0x348   : > { %v9677_v26 = vpop.eup %9676  ;;  %8746 = vmatprep.subr.bf16.mxu0 %v8745_v39  ;;  %v8753_v20 = vpack.c.bf16 %v9675_v6, %v9667_v25  ;;  %8341 = vmatmul.mubr.msk.f32.gmra.mrb[174].mxu0 %vm1444_vm0, %v11974_v27 }
 0x349   : > { %v9679_v46 = vpop.eup %9678  ;;  %8748 = vmatpush1.bf16.msra.mxu0 %v8747_v18  ;;  %5777 = vmatprep.mubr.f32.mxu0 %v12935_v35 }
 0x34a   : > { %v9681_v45 = vpop.eup %9680  ;;  %8754 = vmatprep.subr.bf16.mxu1 %v8753_v20  ;;  %8345 = vmatmul.mubr.msk.f32.gmra.mrb[174].mxu1 %vm1444_vm0, %v11974_v27 }
 0x34b   : > { %v9683_v7 = vpop.eup %9682  ;;  %8756 = vmatpush1.bf16.msra.mxu1 %v8755_v29  ;;  %5866 = vmatprep.mubr.f32.mxu1 %v12935_v35  ;;  %v12190_v29 = vld [vmem:[%s12772_s5 + $0x40] sm:$0xff] }
 0x34c   : > { %v4363_v37 = vpop.f32.mrb[120].mxu0  ;;  %v9685_v59 = vpop.eup %9684 }
 0x34d   : > { %v4364_v21 = vadd.f32 %v4363_v37, %v11894_v61  ;;  %v4365_v3 = vpop.f32.mrb[121].mxu0  ;;  %v9687_v34 = vpop.eup %9686  ;;  %v8751_v24 = vpack.c.bf16 %v9685_v59, %v9677_v26 }
 0x34e   : > { %v4452_v22 = vpop.f32.mrb[120].mxu1  ;;  %v4366_v2 = vadd.f32 %v4365_v3, %v11894_v61  ;;  %v9689_v28 = vpop.eup %9688  ;;  %v8749_v27 = vpack.c.bf16 %v9687_v34, %v9679_v46  ;;  %v9991_v3 = vld [vmem:[%s12772_s5 + $0x48] sm:$0xff] }
 0x34f   : > { %9692 = vtanh.f32 %v4364_v21  ;;  %v4453_v50 = vadd.f32 %v4452_v22, %v11894_v61  ;;  %v4454_v40 = vpop.f32.mrb[121].mxu1  ;;  %v9691_v31 = vpop.eup %9690  ;;  %v8759_v32 = vpack.c.bf16 %v9689_v28, %v9681_v45 }
 0x350   : > { %9694 = vtanh.f32 %v4366_v2  ;;  %v4455_v38 = vadd.f32 %v4454_v40, %v11894_v61  ;;  %v4369_v43 = vpop.f32.mrb[122].mxu0  ;;  %8750 = vmatprep.subr.bf16.mxu0 %v8749_v27  ;;  %v8757_v25 = vpack.c.bf16 %v9691_v31, %v9683_v7  ;;  %v9992_v31 = vld [vmem:[%s12772_s5 + $0x50] sm:$0xff] }
 0x351   : > { %9696 = vtanh.f32 %v4453_v50  ;;  %v4370_v36 = vadd.f32 %v4369_v43, %v11899_v42  ;;  %v4371_v23 = vpop.f32.mrb[123].mxu0  ;;  %8752 = vmatpush1.bf16.msra.mxu0 %v8751_v24 }
 0x352   : > { %9698 = vtanh.f32 %v4455_v38  ;;  %v4458_v30 = vpop.f32.mrb[122].mxu1  ;;  %v4372_v12 = vadd.f32 %v4371_v23, %v11899_v42  ;;  %8758 = vmatprep.subr.bf16.mxu1 %v8757_v25 }
 0x353   : > { %9700 = vtanh.f32 %v4370_v36  ;;  %v4459_v4 = vadd.f32 %v4458_v30, %v11899_v42  ;;  %v4460_v18 = vpop.f32.mrb[123].mxu1  ;;  %8760 = vmatpush1.bf16.msra.mxu1 %v8759_v32 }
 0x354   : > { %9702 = vtanh.f32 %v4372_v12  ;;  %v4461_v61 = vadd.f32 %v4460_v18, %v11899_v42  ;;  %v4375_v17 = vpop.f32.mrb[124].mxu0  ;;  %8346 = vmatmul.mubr.msk.f32.vlgmr.msra.gmra.mrb[176].mxu0 %vm1444_vm0, %v12190_v29  ;;  %v9993_v12 = vld [vmem:[%s12772_s5 + $0x58] sm:$0xff] }
 0x355   : > { %9704 = vtanh.f32 %v4459_v4  ;;  %v4376_v39 = vadd.f32 %v4375_v17, %v11905_v33  ;;  %v4377_v6 = vpop.f32.mrb[125].mxu0  ;;  %5783 = vmatprep.mubr.f32.mxu0 %v12935_v35 }
 0x356   : > { %9706 = vtanh.f32 %v4461_v61  ;;  %v4464_v26 = vpop.f32.mrb[124].mxu1  ;;  %v4378_v20 = vadd.f32 %v4377_v6, %v11905_v33  ;;  %8350 = vmatmul.mubr.msk.f32.vlgmr.msra.gmra.mrb[176].mxu1 %vm1444_vm0, %v12190_v29 }
 0x357   : > { %9708 = vtanh.f32 %v4376_v39  ;;  %v4465_v42 = vadd.f32 %v4464_v26, %v11905_v33  ;;  %v4466_v46 = vpop.f32.mrb[125].mxu1  ;;  %5872 = vmatprep.mubr.f32.mxu1 %v12935_v35 }
 0x358   : > { %9710 = vtanh.f32 %v4378_v20  ;;  %v4467_v45 = vadd.f32 %v4466_v46, %v11905_v33  ;;  %v4381_v7 = vpop.f32.mrb[126].mxu0  ;;  %8347 = vmatmul.mubr.msk.f32.gmra.mrb[178].mxu0 %vm1444_vm0, %v9991_v3 }
 0x359   : > { %v9693_v37 = vpop.eup %9692  ;;  %9712 = vtanh.f32 %v4465_v42  ;;  %v4382_v59 = vadd.f32 %v4381_v7, %v11911_v41  ;;  %v4383_v21 = vpop.f32.mrb[127].mxu0  ;;  %5789 = vmatprep.mubr.f32.mxu0 %v12935_v35 }
 0x35a   : > { %v9695_v34 = vpop.eup %9694  ;;  %9714 = vtanh.f32 %v4467_v45  ;;  %v4470_v22 = vpop.f32.mrb[126].mxu1  ;;  %v4384_v2 = vadd.f32 %v4383_v21, %v11911_v41  ;;  %8351 = vmatmul.mubr.msk.f32.gmra.mrb[178].mxu1 %vm1444_vm0, %v9991_v3 }
 0x35b   : > { %v9697_v33 = vpop.eup %9696  ;;  %9716 = vtanh.f32 %v4382_v59  ;;  %v4471_v24 = vadd.f32 %v4470_v22, %v11911_v41  ;;  %v4472_v28 = vpop.f32.mrb[127].mxu1  ;;  %5878 = vmatprep.mubr.f32.mxu1 %v12935_v35 }
 0x35c   : > { %v9699_v50 = vpop.eup %9698  ;;  %9718 = vtanh.f32 %v4384_v2  ;;  %v4473_v40 = vadd.f32 %v4472_v28, %v11911_v41  ;;  %8348 = vmatmul.mubr.msk.f32.gmra.mrb[180].mxu0 %vm1444_vm0, %v9992_v31  ;;  %v12249_v2 = vpop.permute.xlu1 %4620 }
 0x35d   : > { %v9701_v27 = vpop.eup %9700  ;;  %9720 = vtanh.f32 %v4471_v24  ;;  %5795 = vmatprep.mubr.f32.mxu0 %v12935_v35 }
 0x35e   : > { %v9703_v38 = vpop.eup %9702  ;;  %9722 = vtanh.f32 %v4473_v40  ;;  %v8763_v43 = vpack.c.bf16 %v9701_v27, %v9693_v37  ;;  %8352 = vmatmul.mubr.msk.f32.gmra.mrb[180].mxu1 %vm1444_vm0, %v9992_v31 }
 0x35f   : > { %v9705_v32 = vpop.eup %9704  ;;  %v8761_v36 = vpack.c.bf16 %v9703_v38, %v9695_v34  ;;  %5884 = vmatprep.mubr.f32.mxu1 %v12935_v35 }
 0x360   : > { %v9707_v41 = vpop.eup %9706  ;;  %v8771_v23 = vpack.c.bf16 %v9705_v32, %v9697_v33  ;;  %8349 = vmatmul.mubr.msk.f32.gmra.mrb[182].mxu0 %vm1444_vm0, %v9993_v12 }
 0x361   : > { %v9709_v25 = vpop.eup %9708  ;;  %8762 = vmatprep.subr.bf16.mxu0 %v8761_v36  ;;  %v8769_v30 = vpack.c.bf16 %v9707_v41, %v9699_v50  ;;  %5955 = vmatprep.mubr.f32.mxu0 %v12935_v35 }
 0x362   : > { %v9711_v4 = vpop.eup %9710  ;;  %8764 = vmatpush1.bf16.msra.mxu0 %v8763_v43  ;;  %8353 = vmatmul.mubr.msk.f32.gmra.mrb[182].mxu1 %vm1444_vm0, %v9993_v12 }
 0x363   : > { %v9713_v18 = vpop.eup %9712  ;;  %8770 = vmatprep.subr.bf16.mxu1 %v8769_v30  ;;  %6044 = vmatprep.mubr.f32.mxu1 %v12935_v35 }
 0x364   : > { %v9715_v61 = vpop.eup %9714  ;;  %8772 = vmatpush1.bf16.msra.mxu1 %v8771_v23 }
 0x365   : > { %v9717_v17 = vpop.eup %9716 }
 0x366   : > { %v9719_v39 = vpop.eup %9718  ;;  %v8767_v6 = vpack.c.bf16 %v9717_v17, %v9709_v25 }
 0x367   : > { %v9721_v26 = vpop.eup %9720  ;;  %v8765_v20 = vpack.c.bf16 %v9719_v39, %v9711_v4 }
 0x368   : > { %v9723_v42 = vpop.eup %9722  ;;  %v8775_v46 = vpack.c.bf16 %v9721_v26, %v9713_v18  ;;  %v12261_v18 = vpop.permute.xlu1 %4630 }
 0x369   : > { %8766 = vmatprep.subr.bf16.mxu0 %v8765_v20  ;;  %v8773_v45 = vpack.c.bf16 %v9723_v42, %v9715_v61 }
 0x36a   : > { %8768 = vmatpush1.bf16.msra.mxu0 %v8767_v6 }
 0x36b   : > { %8774 = vmatprep.subr.bf16.mxu1 %v8773_v45 }
 0x36c   : > { %8776 = vmatpush1.bf16.msra.mxu1 %v8775_v46 }
 0x36d   : > { %8354 = vmatmul.mubr.msk.f32.vlgmr.msra.gmra.mrb[184].mxu0 %vm1444_vm0, %v12190_v29 }
 0x36e   : > { %5961 = vmatprep.mubr.f32.mxu0 %v12935_v35 }
 0x36f   : > { %8358 = vmatmul.mubr.msk.f32.vlgmr.msra.gmra.mrb[184].mxu1 %vm1444_vm0, %v12190_v29  ;;  %v12244_v29 = vpop.permute.xlu0 %4615 }
 0x370   : > { %6050 = vmatprep.mubr.f32.mxu1 %v12935_v35 }
 0x371   : > { %8355 = vmatmul.mubr.msk.f32.gmra.mrb[186].mxu0 %vm1444_vm0, %v9991_v3 }
 0x372   : > { %5967 = vmatprep.mubr.f32.mxu0 %v12935_v35 }
 0x373   : > { %8359 = vmatmul.mubr.msk.f32.gmra.mrb[186].mxu1 %vm1444_vm0, %v9991_v3  ;;  %v12255_v43 = vpop.permute.xlu0 %4625 }
 0x374   : > { %6056 = vmatprep.mubr.f32.mxu1 %v12935_v35 }
 0x375   : > { %8356 = vmatmul.mubr.msk.f32.gmra.mrb[188].mxu0 %vm1444_vm0, %v9992_v31 }
 0x376   : > { %5973 = vmatprep.mubr.f32.mxu0 %v12935_v35 }
 0x377   : > { %8360 = vmatmul.mubr.msk.f32.gmra.mrb[188].mxu1 %vm1444_vm0, %v9992_v31 }
 0x378   : > { %6062 = vmatprep.mubr.f32.mxu1 %v12935_v35 }
 0x379   : > { %8357 = vmatmul.mubr.msk.f32.gmra.mrb[190].mxu0 %vm1444_vm0, %v9993_v12 }
 0x37a   : > { %6275 = vmatprep.mubr.f32.mxu0 %v12935_v35 }
 0x37b   : > { %8361 = vmatmul.mubr.msk.f32.gmra.mrb[190].mxu1 %vm1444_vm0, %v9993_v12 }
 0x37c   : > { %6346 = vmatprep.mubr.f32.mxu1 %v12935_v35 }
 0x3a9   : > { %v4711_v7 = vpop.f32.mrb[128].mxu0 }
 0x3aa   : > { %v4712_v37 = vadd.f32 %v4711_v7, %v12244_v29  ;;  %v4713_v59 = vpop.f32.mrb[129].mxu0 }
 0x3ab   : > { %v4800_v21 = vpop.f32.mrb[128].mxu1  ;;  %v4714_v3 = vadd.f32 %v4713_v59, %v12244_v29 }
 0x3ac   : > { %9724 = vtanh.f32 %v4712_v37  ;;  %v4801_v34 = vadd.f32 %v4800_v21, %v12244_v29  ;;  %v4802_v22 = vpop.f32.mrb[129].mxu1 }
 0x3ad   : > { %9726 = vtanh.f32 %v4714_v3  ;;  %v4803_v33 = vadd.f32 %v4802_v22, %v12244_v29  ;;  %v4717_v24 = vpop.f32.mrb[130].mxu0 }
 0x3ae   : > { %9728 = vtanh.f32 %v4801_v34  ;;  %v4718_v28 = vadd.f32 %v4717_v24, %v12249_v2  ;;  %v4719_v50 = vpop.f32.mrb[131].mxu0 }
 0x3af   : > { %9730 = vtanh.f32 %v4803_v33  ;;  %v4806_v40 = vpop.f32.mrb[130].mxu1  ;;  %v4720_v27 = vadd.f32 %v4719_v50, %v12249_v2 }
 0x3b0   : > { %9732 = vtanh.f32 %v4718_v28  ;;  %v4807_v31 = vadd.f32 %v4806_v40, %v12249_v2  ;;  %v4808_v38 = vpop.f32.mrb[131].mxu1 }
 0x3b1   : > { %9734 = vtanh.f32 %v4720_v27  ;;  %v4809_v32 = vadd.f32 %v4808_v38, %v12249_v2  ;;  %v4723_v36 = vpop.f32.mrb[132].mxu0 }
 0x3b2   : > { %9736 = vtanh.f32 %v4807_v31  ;;  %v4724_v41 = vadd.f32 %v4723_v36, %v12255_v43  ;;  %v4725_v23 = vpop.f32.mrb[133].mxu0 }
 0x3b3   : > { %9738 = vtanh.f32 %v4809_v32  ;;  %v4812_v25 = vpop.f32.mrb[132].mxu1  ;;  %v4726_v30 = vadd.f32 %v4725_v23, %v12255_v43 }
 0x3b4   : > { %9740 = vtanh.f32 %v4724_v41  ;;  %v4813_v12 = vadd.f32 %v4812_v25, %v12255_v43  ;;  %v4814_v4 = vpop.f32.mrb[133].mxu1 }
 0x3b5   : > { %9742 = vtanh.f32 %v4726_v30  ;;  %v4815_v61 = vadd.f32 %v4814_v4, %v12255_v43  ;;  %v4729_v17 = vpop.f32.mrb[134].mxu0 }
 0x3b6   : > { %v9725_v39 = vpop.eup %9724  ;;  %9744 = vtanh.f32 %v4813_v12  ;;  %v4730_v6 = vadd.f32 %v4729_v17, %v12261_v18  ;;  %v4731_v26 = vpop.f32.mrb[135].mxu0 }
 0x3b7   : > { %v9727_v20 = vpop.eup %9726  ;;  %9746 = vtanh.f32 %v4815_v61  ;;  %v4818_v42 = vpop.f32.mrb[134].mxu1  ;;  %v4732_v46 = vadd.f32 %v4731_v26, %v12261_v18 }
 0x3b8   : > { %v9729_v45 = vpop.eup %9728  ;;  %9748 = vtanh.f32 %v4730_v6  ;;  %v4819_v7 = vadd.f32 %v4818_v42, %v12261_v18  ;;  %v4820_v37 = vpop.f32.mrb[135].mxu1 }
 0x3b9   : > { %v9731_v59 = vpop.eup %9730  ;;  %9750 = vtanh.f32 %v4732_v46  ;;  %v4821_v21 = vadd.f32 %v4820_v37, %v12261_v18 }
 0x3ba   : > { %v9733_v3 = vpop.eup %9732  ;;  %9752 = vtanh.f32 %v4819_v7  ;;  %v4889_v34 = vpop.f32.mrb[136].mxu0 }
 0x3bb   : > { %v9735_v22 = vpop.eup %9734  ;;  %9754 = vtanh.f32 %v4821_v21  ;;  %v4890_v33 = vadd.f32 %v4889_v34, %v12244_v29  ;;  %v4891_v24 = vpop.f32.mrb[137].mxu0  ;;  %v8779_v28 = vpack.c.bf16 %v9733_v3, %v9725_v39 }
 0x3bc   : > { %v9737_v50 = vpop.eup %9736  ;;  %v4978_v40 = vpop.f32.mrb[136].mxu1  ;;  %v4892_v27 = vadd.f32 %v4891_v24, %v12244_v29  ;;  %v8777_v31 = vpack.c.bf16 %v9735_v22, %v9727_v20 }
 0x3bd   : > { %v9739_v38 = vpop.eup %9738  ;;  %9756 = vtanh.f32 %v4890_v33  ;;  %v4979_v32 = vadd.f32 %v4978_v40, %v12244_v29  ;;  %v4980_v36 = vpop.f32.mrb[137].mxu1  ;;  %v8787_v41 = vpack.c.bf16 %v9737_v50, %v9729_v45 }
 0x3be   : > { %v9741_v23 = vpop.eup %9740  ;;  %9758 = vtanh.f32 %v4892_v27  ;;  %v4981_v25 = vadd.f32 %v4980_v36, %v12244_v29  ;;  %v4895_v30 = vpop.f32.mrb[138].mxu0  ;;  %8778 = vmatprep.subr.bf16.mxu0 %v8777_v31  ;;  %v8785_v12 = vpack.c.bf16 %v9739_v38, %v9731_v59 }
 0x3bf   : > { %v9743_v4 = vpop.eup %9742  ;;  %9760 = vtanh.f32 %v4979_v32  ;;  %v4896_v61 = vadd.f32 %v4895_v30, %v12249_v2  ;;  %v4897_v17 = vpop.f32.mrb[139].mxu0  ;;  %8780 = vmatpush1.bf16.msra.mxu0 %v8779_v28  ;;  %v12284_v30 = vld [vmem:[%s12774_s7] sm:$0x1] }
 0x3c0   : > { %v9745_v39 = vpop.eup %9744  ;;  %9762 = vtanh.f32 %v4981_v25  ;;  %v4984_v6 = vpop.f32.mrb[138].mxu1  ;;  %v4898_v26 = vadd.f32 %v4897_v17, %v12249_v2  ;;  %8786 = vmatprep.subr.bf16.mxu1 %v8785_v12 }
 0x3c1   : > { %v9747_v20 = vpop.eup %9746  ;;  %9764 = vtanh.f32 %v4896_v61  ;;  %v4985_v42 = vadd.f32 %v4984_v6, %v12249_v2  ;;  %v4986_v46 = vpop.f32.mrb[139].mxu1  ;;  %8788 = vmatpush1.bf16.msra.mxu1 %v8787_v41 }
 0x3c2   : > { %v9749_v45 = vpop.eup %9748  ;;  %9766 = vtanh.f32 %v4898_v26  ;;  %v4987_v7 = vadd.f32 %v4986_v46, %v12249_v2  ;;  %v4901_v37 = vpop.f32.mrb[140].mxu0 }
 0x3c3   : > { %v9751_v59 = vpop.eup %9750  ;;  %9768 = vtanh.f32 %v4985_v42  ;;  %v4902_v21 = vadd.f32 %v4901_v37, %v12255_v43  ;;  %v4903_v3 = vpop.f32.mrb[141].mxu0  ;;  %v8783_v34 = vpack.c.bf16 %v9749_v45, %v9741_v23 }
 0x3c4   : > { %v9753_v22 = vpop.eup %9752  ;;  %9770 = vtanh.f32 %v4987_v7  ;;  %v4990_v33 = vpop.f32.mrb[140].mxu1  ;;  %v4904_v24 = vadd.f32 %v4903_v3, %v12255_v43  ;;  %v8781_v28 = vpack.c.bf16 %v9751_v59, %v9743_v4 }
 0x3c5   : > { %v9755_v50 = vpop.eup %9754  ;;  %9772 = vtanh.f32 %v4902_v21  ;;  %v4991_v40 = vadd.f32 %v4990_v33, %v12255_v43  ;;  %v4992_v27 = vpop.f32.mrb[141].mxu1  ;;  %v8791_v31 = vpack.c.bf16 %v9753_v22, %v9745_v39 }
 0x3c6   : > { %9774 = vtanh.f32 %v4904_v24  ;;  %v4993_v38 = vadd.f32 %v4992_v27, %v12255_v43  ;;  %v4907_v32 = vpop.f32.mrb[142].mxu0  ;;  %8782 = vmatprep.subr.bf16.mxu0 %v8781_v28  ;;  %v8789_v36 = vpack.c.bf16 %v9755_v50, %v9747_v20 }
 0x3c7   : > { %v9757_v41 = vpop.eup %9756  ;;  %9776 = vtanh.f32 %v4991_v40  ;;  %v4908_v23 = vadd.f32 %v4907_v32, %v12261_v18  ;;  %v4909_v25 = vpop.f32.mrb[143].mxu0  ;;  %8784 = vmatpush1.bf16.msra.mxu0 %v8783_v34 }
 0x3c8   : > { %v9759_v12 = vpop.eup %9758  ;;  %9778 = vtanh.f32 %v4993_v38  ;;  %v4996_v4 = vpop.f32.mrb[142].mxu1  ;;  %v4910_v61 = vadd.f32 %v4909_v25, %v12261_v18  ;;  %8790 = vmatprep.subr.bf16.mxu1 %v8789_v36 }
 0x3c9   : > { %v9761_v17 = vpop.eup %9760  ;;  %9780 = vtanh.f32 %v4908_v23  ;;  %v4997_v39 = vadd.f32 %v4996_v4, %v12261_v18  ;;  %v4998_v6 = vpop.f32.mrb[143].mxu1  ;;  %8792 = vmatpush1.bf16.msra.mxu1 %v8791_v31 }
 0x3ca   : > { %v9763_v26 = vpop.eup %9762  ;;  %9782 = vtanh.f32 %v4910_v61  ;;  %v4999_v20 = vadd.f32 %v4998_v6, %v12261_v18  ;;  %8362 = vmatmul.mubr.msk.f32.vlgmr.msra.gmra.mrb[192].mxu0 %vm1444_vm0, %v12284_v30 }
 0x3cb   : > { %v9765_v42 = vpop.eup %9764  ;;  %9784 = vtanh.f32 %v4997_v39  ;;  %6417 = vmatprep.mubr.f32.mxu0 %v12935_v35 }
 0x3cc   : > { %v9767_v46 = vpop.eup %9766  ;;  %9786 = vtanh.f32 %v4999_v20  ;;  %8363 = vmatmul.mubr.msk.f32.vlgmr.msra.gmra.mrb[192].mxu1 %vm1444_vm0, %v12284_v30  ;;  %v8795_v45 = vpack.c.bf16 %v9765_v42, %v9757_v41 }
 0x3cd   : > { %v9769_v7 = vpop.eup %9768  ;;  %v5067_v37 = vpop.f32.mrb[144].mxu0  ;;  %v8793_v59 = vpack.c.bf16 %v9767_v46, %v9759_v12  ;;  %6488 = vmatprep.mubr.f32.mxu1 %v12935_v35 }
 0x3ce   : > { %v9771_v21 = vpop.eup %9770  ;;  %v5068_v3 = vadd.f32 %v5067_v37, %v12244_v29  ;;  %v5069_v34 = vpop.f32.mrb[145].mxu0  ;;  %v8803_v22 = vpack.c.bf16 %v9769_v7, %v9761_v17 }
 0x3cf   : > { %v9773_v33 = vpop.eup %9772  ;;  %v5156_v24 = vpop.f32.mrb[144].mxu1  ;;  %v5070_v28 = vadd.f32 %v5069_v34, %v12244_v29  ;;  %8794 = vmatprep.subr.bf16.mxu0 %v8793_v59  ;;  %v8801_v50 = vpack.c.bf16 %v9771_v21, %v9763_v26 }
 0x3d0   : > { %v9775_v40 = vpop.eup %9774  ;;  %9788 = vtanh.f32 %v5068_v3  ;;  %v5157_v27 = vadd.f32 %v5156_v24, %v12244_v29  ;;  %v5158_v31 = vpop.f32.mrb[145].mxu1  ;;  %8796 = vmatpush1.bf16.msra.mxu0 %v8795_v45 }
 0x3d1   : > { %v9777_v38 = vpop.eup %9776  ;;  %9790 = vtanh.f32 %v5070_v28  ;;  %v5159_v32 = vadd.f32 %v5158_v31, %v12244_v29  ;;  %v5073_v36 = vpop.f32.mrb[146].mxu0  ;;  %8802 = vmatprep.subr.bf16.mxu1 %v8801_v50 }
 0x3d2   : > { %v9779_v41 = vpop.eup %9778  ;;  %9792 = vtanh.f32 %v5157_v27  ;;  %v5074_v23 = vadd.f32 %v5073_v36, %v12249_v2  ;;  %v5075_v25 = vpop.f32.mrb[147].mxu0  ;;  %8804 = vmatpush1.bf16.msra.mxu1 %v8803_v22 }
 0x3d3   : > { %v9781_v12 = vpop.eup %9780  ;;  %9794 = vtanh.f32 %v5159_v32  ;;  %v5162_v4 = vpop.f32.mrb[146].mxu1  ;;  %v5076_v61 = vadd.f32 %v5075_v25, %v12249_v2 }
 0x3d4   : > { %v9783_v17 = vpop.eup %9782  ;;  %9796 = vtanh.f32 %v5074_v23  ;;  %v5163_v39 = vadd.f32 %v5162_v4, %v12249_v2  ;;  %v5164_v6 = vpop.f32.mrb[147].mxu1  ;;  %v8799_v26 = vpack.c.bf16 %v9781_v12, %v9773_v33 }
 0x3d5   : > { %v9785_v20 = vpop.eup %9784  ;;  %9798 = vtanh.f32 %v5076_v61  ;;  %v5165_v42 = vadd.f32 %v5164_v6, %v12249_v2  ;;  %v5079_v46 = vpop.f32.mrb[148].mxu0  ;;  %v8797_v45 = vpack.c.bf16 %v9783_v17, %v9775_v40 }
 0x3d6   : > { %v9787_v7 = vpop.eup %9786  ;;  %9800 = vtanh.f32 %v5163_v39  ;;  %v5080_v37 = vadd.f32 %v5079_v46, %v12255_v43  ;;  %v5081_v59 = vpop.f32.mrb[149].mxu0  ;;  %v8807_v21 = vpack.c.bf16 %v9785_v20, %v9777_v38 }
 0x3d7   : > { %9802 = vtanh.f32 %v5165_v42  ;;  %v5168_v3 = vpop.f32.mrb[148].mxu1  ;;  %v5082_v34 = vadd.f32 %v5081_v59, %v12255_v43  ;;  %8798 = vmatprep.subr.bf16.mxu0 %v8797_v45  ;;  %v8805_v22 = vpack.c.bf16 %v9787_v7, %v9779_v41 }
 0x3d8   : > { %v5169_v33 = vadd.f32 %v5168_v3, %v12255_v43  ;;  %v5170_v24 = vpop.f32.mrb[149].mxu1  ;;  %8800 = vmatpush1.bf16.msra.mxu0 %v8799_v26  ;;  %9804 = vtanh.f32 %v5080_v37 }
 0x3d9   : > { %v5171_v28 = vadd.f32 %v5170_v24, %v12255_v43  ;;  %8806 = vmatprep.subr.bf16.mxu1 %v8805_v22  ;;  %9806 = vtanh.f32 %v5082_v34 }
 0x3da   : > { %v9789_v50 = vpop.eup %9788  ;;  %v5085_v40 = vpop.f32.mrb[150].mxu0  ;;  %8808 = vmatpush1.bf16.msra.mxu1 %v8807_v21  ;;  %9808 = vtanh.f32 %v5169_v33 }
 0x3db   : > { %v9791_v27 = vpop.eup %9790  ;;  %v5086_v31 = vadd.f32 %v5085_v40, %v12261_v18  ;;  %v5087_v38 = vpop.f32.mrb[151].mxu0  ;;  %8364 = vmatmul.mubr.msk.f32.vlgmr.msra.gmra.mrb[194].mxu0 %vm1444_vm0, %v12284_v30  ;;  %9810 = vtanh.f32 %v5171_v28 }
 0x3dc   : > { %v9793_v32 = vpop.eup %9792  ;;  %v5174_v36 = vpop.f32.mrb[150].mxu1  ;;  %v5088_v41 = vadd.f32 %v5087_v38, %v12261_v18  ;;  %6559 = vmatprep.mubr.f32.mxu0 %v12935_v35 }
 0x3dd   : > { %v9795_v23 = vpop.eup %9794  ;;  %9812 = vtanh.f32 %v5086_v31  ;;  %v5175_v25 = vadd.f32 %v5174_v36, %v12261_v18  ;;  %v5176_v12 = vpop.f32.mrb[151].mxu1  ;;  %8365 = vmatmul.mubr.msk.f32.vlgmr.msra.gmra.mrb[194].mxu1 %vm1444_vm0, %v12284_v30 }
 0x3de   : > { %v9797_v4 = vpop.eup %9796  ;;  %9814 = vtanh.f32 %v5088_v41  ;;  %v5177_v61 = vadd.f32 %v5176_v12, %v12261_v18  ;;  %6630 = vmatprep.mubr.f32.mxu1 %v12935_v35 }
 0x3df   : > { %v9799_v17 = vpop.eup %9798  ;;  %9816 = vtanh.f32 %v5175_v25  ;;  %v8811_v39 = vpack.c.bf16 %v9797_v4, %v9789_v50 }
 0x3e0   : > { %v9801_v6 = vpop.eup %9800  ;;  %9818 = vtanh.f32 %v5177_v61  ;;  %v8809_v26 = vpack.c.bf16 %v9799_v17, %v9791_v27 }
 0x3e1   : > { %v9803_v20 = vpop.eup %9802  ;;  %v8819_v42 = vpack.c.bf16 %v9801_v6, %v9793_v32 }
 0x3e2   : > { %8810 = vmatprep.subr.bf16.mxu0 %v8809_v26  ;;  %v8817_v46 = vpack.c.bf16 %v9803_v20, %v9795_v23  ;;  %v9805_v45 = vpop.eup %9804 }
 0x3e3   : > { %8812 = vmatpush1.bf16.msra.mxu0 %v8811_v39  ;;  %v9807_v7 = vpop.eup %9806 }
 0x3e4   : > { %v5245_v37 = vpop.f32.mrb[152].mxu0  ;;  %8818 = vmatprep.subr.bf16.mxu1 %v8817_v46  ;;  %v9809_v59 = vpop.eup %9808 }
 0x3e5   : > { %v5246_v21 = vadd.f32 %v5245_v37, %v12244_v29  ;;  %v5247_v3 = vpop.f32.mrb[153].mxu0  ;;  %8820 = vmatpush1.bf16.msra.mxu1 %v8819_v42  ;;  %v9811_v34 = vpop.eup %9810 }
 0x3e6   : > { %v5334_v22 = vpop.f32.mrb[152].mxu1  ;;  %v5248_v33 = vadd.f32 %v5247_v3, %v12244_v29 }
 0x3e7   : > { %v9813_v24 = vpop.eup %9812  ;;  %9820 = vtanh.f32 %v5246_v21  ;;  %v5335_v28 = vadd.f32 %v5334_v22, %v12244_v29  ;;  %v5336_v50 = vpop.f32.mrb[153].mxu1 }
 0x3e8   : > { %v9815_v40 = vpop.eup %9814  ;;  %9822 = vtanh.f32 %v5248_v33  ;;  %v5337_v27 = vadd.f32 %v5336_v50, %v12244_v29  ;;  %v5251_v31 = vpop.f32.mrb[154].mxu0  ;;  %v8815_v38 = vpack.c.bf16 %v9813_v24, %v9805_v45 }
 0x3e9   : > { %v9817_v32 = vpop.eup %9816  ;;  %9824 = vtanh.f32 %v5335_v28  ;;  %v5252_v36 = vadd.f32 %v5251_v31, %v12249_v2  ;;  %v5253_v41 = vpop.f32.mrb[155].mxu0  ;;  %v8813_v23 = vpack.c.bf16 %v9815_v40, %v9807_v7 }
 0x3ea   : > { %v9819_v25 = vpop.eup %9818  ;;  %9826 = vtanh.f32 %v5337_v27  ;;  %v5340_v12 = vpop.f32.mrb[154].mxu1  ;;  %v5254_v4 = vadd.f32 %v5253_v41, %v12249_v2  ;;  %v8823_v61 = vpack.c.bf16 %v9817_v32, %v9809_v59 }
 0x3eb   : > { %9828 = vtanh.f32 %v5252_v36  ;;  %v5341_v17 = vadd.f32 %v5340_v12, %v12249_v2  ;;  %v5342_v39 = vpop.f32.mrb[155].mxu1  ;;  %8814 = vmatprep.subr.bf16.mxu0 %v8813_v23  ;;  %v8821_v6 = vpack.c.bf16 %v9819_v25, %v9811_v34 }
 0x3ec   : > { %9830 = vtanh.f32 %v5254_v4  ;;  %v5343_v26 = vadd.f32 %v5342_v39, %v12249_v2  ;;  %v5257_v20 = vpop.f32.mrb[156].mxu0  ;;  %8816 = vmatpush1.bf16.msra.mxu0 %v8815_v38 }
 0x3ed   : > { %9832 = vtanh.f32 %v5341_v17  ;;  %v5258_v42 = vadd.f32 %v5257_v20, %v12255_v43  ;;  %v5259_v46 = vpop.f32.mrb[157].mxu0  ;;  %8822 = vmatprep.subr.bf16.mxu1 %v8821_v6 }
 0x3ee   : > { %9834 = vtanh.f32 %v5343_v26  ;;  %v5346_v45 = vpop.f32.mrb[156].mxu1  ;;  %v5260_v7 = vadd.f32 %v5259_v46, %v12255_v43  ;;  %8824 = vmatpush1.bf16.msra.mxu1 %v8823_v61 }
 0x3ef   : > { %9836 = vtanh.f32 %v5258_v42  ;;  %v5347_v37 = vadd.f32 %v5346_v45, %v12255_v43  ;;  %v5348_v59 = vpop.f32.mrb[157].mxu1  ;;  %8366 = vmatmul.mubr.msk.f32.vlgmr.msra.gmra.mrb[196].mxu0 %vm1444_vm0, %v12284_v30 }
 0x3f0   : > { %9838 = vtanh.f32 %v5260_v7  ;;  %v5349_v21 = vadd.f32 %v5348_v59, %v12255_v43  ;;  %6701 = vmatprep.mubr.f32.mxu0 %v12935_v35 }
 0x3f1   : > { %v5263_v3 = vpop.f32.mrb[158].mxu0  ;;  %v9821_v34 = vpop.eup %9820  ;;  %9840 = vtanh.f32 %v5347_v37  ;;  %8367 = vmatmul.mubr.msk.f32.vlgmr.msra.gmra.mrb[196].mxu1 %vm1444_vm0, %v12284_v30 }
 0x3f2   : > { %v5264_v22 = vadd.f32 %v5263_v3, %v12261_v18  ;;  %v5265_v33 = vpop.f32.mrb[159].mxu0  ;;  %v9823_v24 = vpop.eup %9822  ;;  %9842 = vtanh.f32 %v5349_v21  ;;  %6772 = vmatprep.mubr.f32.mxu1 %v12935_v35 }
 0x3f3   : > { %v5352_v28 = vpop.f32.mrb[158].mxu1  ;;  %v5266_v50 = vadd.f32 %v5265_v33, %v12261_v18  ;;  %v9825_v40 = vpop.eup %9824 }
 0x3f4   : > { %9844 = vtanh.f32 %v5264_v22  ;;  %v5353_v27 = vadd.f32 %v5352_v28, %v12261_v18  ;;  %v5354_v31 = vpop.f32.mrb[159].mxu1  ;;  %v9827_v38 = vpop.eup %9826 }
 0x3f5   : > { %9846 = vtanh.f32 %v5266_v50  ;;  %v5355_v32 = vadd.f32 %v5354_v31, %v12261_v18  ;;  %v9829_v36 = vpop.eup %9828 }
 0x3f6   : > { %9848 = vtanh.f32 %v5353_v27  ;;  %v9831_v41 = vpop.eup %9830  ;;  %v8827_v23 = vpack.c.bf16 %v9829_v36, %v9821_v34 }
 0x3f7   : > { %9850 = vtanh.f32 %v5355_v32  ;;  %v9833_v25 = vpop.eup %9832  ;;  %v8825_v12 = vpack.c.bf16 %v9831_v41, %v9823_v24 }
 0x3f8   : > { %v9835_v4 = vpop.eup %9834  ;;  %v8835_v61 = vpack.c.bf16 %v9833_v25, %v9825_v40 }
 0x3f9   : > { %v9837_v17 = vpop.eup %9836  ;;  %8826 = vmatprep.subr.bf16.mxu0 %v8825_v12  ;;  %v8833_v39 = vpack.c.bf16 %v9835_v4, %v9827_v38 }
 0x3fa   : > { %v9839_v6 = vpop.eup %9838  ;;  %8828 = vmatpush1.bf16.msra.mxu0 %v8827_v23 }
 0x3fb   : > { %v5423_v26 = vpop.f32.mrb[160].mxu0  ;;  %v9841_v20 = vpop.eup %9840  ;;  %8834 = vmatprep.subr.bf16.mxu1 %v8833_v39 }
 0x3fc   : > { %v5424_v42 = vadd.f32 %v5423_v26, %v12244_v29  ;;  %v5425_v46 = vpop.f32.mrb[161].mxu0  ;;  %v9843_v45 = vpop.eup %9842  ;;  %8836 = vmatpush1.bf16.msra.mxu1 %v8835_v61 }
 0x3fd   : > { %v5512_v7 = vpop.f32.mrb[160].mxu1  ;;  %v5426_v37 = vadd.f32 %v5425_v46, %v12244_v29 }
 0x3fe   : > { %v9845_v59 = vpop.eup %9844  ;;  %9852 = vtanh.f32 %v5424_v42  ;;  %v5513_v21 = vadd.f32 %v5512_v7, %v12244_v29  ;;  %v5514_v3 = vpop.f32.mrb[161].mxu1 }
 0x3ff   : > { %v9847_v34 = vpop.eup %9846  ;;  %9854 = vtanh.f32 %v5426_v37  ;;  %v5515_v22 = vadd.f32 %v5514_v3, %v12244_v29  ;;  %v5429_v33 = vpop.f32.mrb[162].mxu0  ;;  %v8831_v24 = vpack.c.bf16 %v9845_v59, %v9837_v17 }
 0x400   : > { %v9849_v28 = vpop.eup %9848  ;;  %9856 = vtanh.f32 %v5513_v21  ;;  %v5430_v50 = vadd.f32 %v5429_v33, %v12249_v2  ;;  %v5431_v40 = vpop.f32.mrb[163].mxu0  ;;  %v8829_v27 = vpack.c.bf16 %v9847_v34, %v9839_v6 }
 0x401   : > { %v9851_v31 = vpop.eup %9850  ;;  %9858 = vtanh.f32 %v5515_v22  ;;  %v5518_v38 = vpop.f32.mrb[162].mxu1  ;;  %v5432_v32 = vadd.f32 %v5431_v40, %v12249_v2  ;;  %v8839_v36 = vpack.c.bf16 %v9849_v28, %v9841_v20 }
 0x402   : > { %9860 = vtanh.f32 %v5430_v50  ;;  %v5519_v41 = vadd.f32 %v5518_v38, %v12249_v2  ;;  %v5520_v23 = vpop.f32.mrb[163].mxu1  ;;  %8830 = vmatprep.subr.bf16.mxu0 %v8829_v27  ;;  %v8837_v25 = vpack.c.bf16 %v9851_v31, %v9843_v45 }
 0x403   : > { %9862 = vtanh.f32 %v5432_v32  ;;  %v5521_v12 = vadd.f32 %v5520_v23, %v12249_v2  ;;  %v5435_v4 = vpop.f32.mrb[164].mxu0  ;;  %8832 = vmatpush1.bf16.msra.mxu0 %v8831_v24 }
 0x404   : > { %9864 = vtanh.f32 %v5519_v41  ;;  %v5436_v61 = vadd.f32 %v5435_v4, %v12255_v43  ;;  %v5437_v17 = vpop.f32.mrb[165].mxu0  ;;  %8838 = vmatprep.subr.bf16.mxu1 %v8837_v25 }
 0x405   : > { %9866 = vtanh.f32 %v5521_v12  ;;  %v5524_v39 = vpop.f32.mrb[164].mxu1  ;;  %v5438_v6 = vadd.f32 %v5437_v17, %v12255_v43  ;;  %8840 = vmatpush1.bf16.msra.mxu1 %v8839_v36 }
 0x406   : > { %9868 = vtanh.f32 %v5436_v61  ;;  %v5525_v26 = vadd.f32 %v5524_v39, %v12255_v43  ;;  %v5526_v20 = vpop.f32.mrb[165].mxu1  ;;  %8368 = vmatmul.mubr.msk.f32.vlgmr.msra.gmra.mrb[198].mxu0 %vm1444_vm0, %v12284_v30 }
 0x407   : > { %9870 = vtanh.f32 %v5438_v6  ;;  %v5527_v42 = vadd.f32 %v5526_v20, %v12255_v43  ;;  %v5441_v46 = vpop.f32.mrb[166].mxu0  ;;  %6843 = vmatprep.mubr.f32.mxu0 %v12935_v35 }
 0x408   : > { %v9853_v45 = vpop.eup %9852  ;;  %9872 = vtanh.f32 %v5525_v26  ;;  %v5442_v7 = vadd.f32 %v5441_v46, %v12261_v18  ;;  %v5443_v37 = vpop.f32.mrb[167].mxu0  ;;  %8369 = vmatmul.mubr.msk.f32.vlgmr.msra.gmra.mrb[198].mxu1 %vm1444_vm0, %v12284_v30 }
 0x409   : > { %v9855_v59 = vpop.eup %9854  ;;  %9874 = vtanh.f32 %v5527_v42  ;;  %v5530_v21 = vpop.f32.mrb[166].mxu1  ;;  %v5444_v3 = vadd.f32 %v5443_v37, %v12261_v18  ;;  %6914 = vmatprep.mubr.f32.mxu1 %v12935_v35 }
 0x40a   : > { %v9857_v34 = vpop.eup %9856  ;;  %9876 = vtanh.f32 %v5442_v7  ;;  %v5531_v22 = vadd.f32 %v5530_v21, %v12261_v18  ;;  %v5532_v33 = vpop.f32.mrb[167].mxu1 }
 0x40b   : > { %v9859_v24 = vpop.eup %9858  ;;  %9878 = vtanh.f32 %v5444_v3  ;;  %v5533_v28 = vadd.f32 %v5532_v33, %v12261_v18 }
 0x40c   : > { %v9861_v50 = vpop.eup %9860  ;;  %9880 = vtanh.f32 %v5531_v22 }
 0x40d   : > { %v9863_v40 = vpop.eup %9862  ;;  %9882 = vtanh.f32 %v5533_v28  ;;  %v8843_v27 = vpack.c.bf16 %v9861_v50, %v9853_v45 }
 0x40e   : > { %v9865_v31 = vpop.eup %9864  ;;  %v8841_v38 = vpack.c.bf16 %v9863_v40, %v9855_v59 }
 0x40f   : > { %v9867_v32 = vpop.eup %9866  ;;  %v8851_v36 = vpack.c.bf16 %v9865_v31, %v9857_v34  ;;  %v5601_v23 = vpop.f32.mrb[168].mxu0 }
 0x410   : > { %v9869_v41 = vpop.eup %9868  ;;  %8842 = vmatprep.subr.bf16.mxu0 %v8841_v38  ;;  %v8849_v25 = vpack.c.bf16 %v9867_v32, %v9859_v24  ;;  %v5602_v4 = vadd.f32 %v5601_v23, %v12244_v29  ;;  %v5603_v61 = vpop.f32.mrb[169].mxu0 }
 0x411   : > { %v9871_v12 = vpop.eup %9870  ;;  %8844 = vmatpush1.bf16.msra.mxu0 %v8843_v27  ;;  %v5690_v39 = vpop.f32.mrb[168].mxu1  ;;  %v5604_v6 = vadd.f32 %v5603_v61, %v12244_v29 }
 0x412   : > { %v9873_v17 = vpop.eup %9872  ;;  %8850 = vmatprep.subr.bf16.mxu1 %v8849_v25  ;;  %9884 = vtanh.f32 %v5602_v4  ;;  %v5691_v20 = vadd.f32 %v5690_v39, %v12244_v29  ;;  %v5692_v42 = vpop.f32.mrb[169].mxu1 }
 0x413   : > { %v9875_v26 = vpop.eup %9874  ;;  %8852 = vmatpush1.bf16.msra.mxu1 %v8851_v36  ;;  %9886 = vtanh.f32 %v5604_v6  ;;  %v5693_v45 = vadd.f32 %v5692_v42, %v12244_v29  ;;  %v5607_v7 = vpop.f32.mrb[170].mxu0 }
 0x414   : > { %v9877_v46 = vpop.eup %9876  ;;  %9888 = vtanh.f32 %v5691_v20  ;;  %v5608_v59 = vadd.f32 %v5607_v7, %v12249_v2  ;;  %v5609_v21 = vpop.f32.mrb[171].mxu0 }
 0x415   : > { %v9879_v37 = vpop.eup %9878  ;;  %v8847_v3 = vpack.c.bf16 %v9877_v46, %v9869_v41  ;;  %9890 = vtanh.f32 %v5693_v45  ;;  %v5696_v22 = vpop.f32.mrb[170].mxu1  ;;  %v5610_v33 = vadd.f32 %v5609_v21, %v12249_v2 }
 0x416   : > { %v9881_v34 = vpop.eup %9880  ;;  %v8845_v24 = vpack.c.bf16 %v9879_v37, %v9871_v12  ;;  %9892 = vtanh.f32 %v5608_v59  ;;  %v5697_v50 = vadd.f32 %v5696_v22, %v12249_v2  ;;  %v5698_v40 = vpop.f32.mrb[171].mxu1 }
 0x417   : > { %v9883_v28 = vpop.eup %9882  ;;  %v8855_v27 = vpack.c.bf16 %v9881_v34, %v9873_v17  ;;  %9894 = vtanh.f32 %v5610_v33  ;;  %v5699_v31 = vadd.f32 %v5698_v40, %v12249_v2  ;;  %v5613_v38 = vpop.f32.mrb[172].mxu0 }
 0x418   : > { %8846 = vmatprep.subr.bf16.mxu0 %v8845_v24  ;;  %v8853_v32 = vpack.c.bf16 %v9883_v28, %v9875_v26  ;;  %9896 = vtanh.f32 %v5697_v50  ;;  %v5614_v36 = vadd.f32 %v5613_v38, %v12255_v43  ;;  %v5615_v41 = vpop.f32.mrb[173].mxu0 }
 0x419   : > { %8848 = vmatpush1.bf16.msra.mxu0 %v8847_v3  ;;  %9898 = vtanh.f32 %v5699_v31  ;;  %v5702_v23 = vpop.f32.mrb[172].mxu1  ;;  %v5616_v25 = vadd.f32 %v5615_v41, %v12255_v43 }
 0x41a   : > { %8854 = vmatprep.subr.bf16.mxu1 %v8853_v32  ;;  %9900 = vtanh.f32 %v5614_v36  ;;  %v5703_v12 = vadd.f32 %v5702_v23, %v12255_v43  ;;  %v5704_v4 = vpop.f32.mrb[173].mxu1 }
 0x41b   : > { %8856 = vmatpush1.bf16.msra.mxu1 %v8855_v27  ;;  %9902 = vtanh.f32 %v5616_v25  ;;  %v5705_v61 = vadd.f32 %v5704_v4, %v12255_v43  ;;  %v5619_v17 = vpop.f32.mrb[174].mxu0 }
 0x41c   : > { %8370 = vmatmul.mubr.msk.f32.vlgmr.msra.gmra.mrb[200].mxu0 %vm1444_vm0, %v12284_v30  ;;  %v9885_v39 = vpop.eup %9884  ;;  %9904 = vtanh.f32 %v5703_v12  ;;  %v5620_v6 = vadd.f32 %v5619_v17, %v12261_v18  ;;  %v5621_v26 = vpop.f32.mrb[175].mxu0 }
 0x41d   : > { %6985 = vmatprep.mubr.f32.mxu0 %v12935_v35  ;;  %v9887_v20 = vpop.eup %9886  ;;  %9906 = vtanh.f32 %v5705_v61  ;;  %v5708_v42 = vpop.f32.mrb[174].mxu1  ;;  %v5622_v46 = vadd.f32 %v5621_v26, %v12261_v18 }
 0x41e   : > { %8371 = vmatmul.mubr.msk.f32.vlgmr.msra.gmra.mrb[200].mxu1 %vm1444_vm0, %v12284_v30  ;;  %v9889_v45 = vpop.eup %9888  ;;  %9908 = vtanh.f32 %v5620_v6  ;;  %v5709_v7 = vadd.f32 %v5708_v42, %v12261_v18  ;;  %v5710_v37 = vpop.f32.mrb[175].mxu1 }
 0x41f   : > { %7056 = vmatprep.mubr.f32.mxu1 %v12935_v35  ;;  %v9891_v59 = vpop.eup %9890  ;;  %9910 = vtanh.f32 %v5622_v46  ;;  %v5711_v21 = vadd.f32 %v5710_v37, %v12261_v18 }
 0x420   : > { %v9893_v3 = vpop.eup %9892  ;;  %9912 = vtanh.f32 %v5709_v7 }
 0x421   : > { %v9895_v34 = vpop.eup %9894  ;;  %9914 = vtanh.f32 %v5711_v21  ;;  %v8859_v22 = vpack.c.bf16 %v9893_v3, %v9885_v39 }
 0x422   : > { %v9897_v33 = vpop.eup %9896  ;;  %v8857_v24 = vpack.c.bf16 %v9895_v34, %v9887_v20 }
 0x423   : > { %v9899_v28 = vpop.eup %9898  ;;  %v8867_v50 = vpack.c.bf16 %v9897_v33, %v9889_v45 }
 0x424   : > { %v9901_v40 = vpop.eup %9900  ;;  %8858 = vmatprep.subr.bf16.mxu0 %v8857_v24  ;;  %v8865_v27 = vpack.c.bf16 %v9899_v28, %v9891_v59 }
 0x425   : > { %v9903_v31 = vpop.eup %9902  ;;  %8860 = vmatpush1.bf16.msra.mxu0 %v8859_v22 }
 0x426   : > { %v9905_v38 = vpop.eup %9904  ;;  %8866 = vmatprep.subr.bf16.mxu1 %v8865_v27 }
 0x427   : > { %v9907_v32 = vpop.eup %9906  ;;  %v5779_v36 = vpop.f32.mrb[176].mxu0  ;;  %8868 = vmatpush1.bf16.msra.mxu1 %v8867_v50 }
 0x428   : > { %v9909_v41 = vpop.eup %9908  ;;  %v5780_v23 = vadd.f32 %v5779_v36, %v12244_v29  ;;  %v5781_v25 = vpop.f32.mrb[177].mxu0 }
 0x429   : > { %v9911_v12 = vpop.eup %9910  ;;  %v5868_v4 = vpop.f32.mrb[176].mxu1  ;;  %v5782_v61 = vadd.f32 %v5781_v25, %v12244_v29  ;;  %v8863_v17 = vpack.c.bf16 %v9909_v41, %v9901_v40 }
 0x42a   : > { %v9913_v39 = vpop.eup %9912  ;;  %9916 = vtanh.f32 %v5780_v23  ;;  %v5869_v6 = vadd.f32 %v5868_v4, %v12244_v29  ;;  %v5870_v26 = vpop.f32.mrb[177].mxu1  ;;  %v8861_v20 = vpack.c.bf16 %v9911_v12, %v9903_v31 }
 0x42b   : > { %v9915_v42 = vpop.eup %9914  ;;  %9918 = vtanh.f32 %v5782_v61  ;;  %v5871_v46 = vadd.f32 %v5870_v26, %v12244_v29  ;;  %v5785_v45 = vpop.f32.mrb[178].mxu0  ;;  %v8871_v7 = vpack.c.bf16 %v9913_v39, %v9905_v38 }
 0x42c   : > { %9920 = vtanh.f32 %v5869_v6  ;;  %v5786_v37 = vadd.f32 %v5785_v45, %v12249_v2  ;;  %v5787_v59 = vpop.f32.mrb[179].mxu0  ;;  %8862 = vmatprep.subr.bf16.mxu0 %v8861_v20  ;;  %v8869_v21 = vpack.c.bf16 %v9915_v42, %v9907_v32 }
 0x42d   : > { %9922 = vtanh.f32 %v5871_v46  ;;  %v5874_v3 = vpop.f32.mrb[178].mxu1  ;;  %v5788_v34 = vadd.f32 %v5787_v59, %v12249_v2  ;;  %8864 = vmatpush1.bf16.msra.mxu0 %v8863_v17 }
 0x42e   : > { %9924 = vtanh.f32 %v5786_v37  ;;  %v5875_v22 = vadd.f32 %v5874_v3, %v12249_v2  ;;  %v5876_v33 = vpop.f32.mrb[179].mxu1  ;;  %8870 = vmatprep.subr.bf16.mxu1 %v8869_v21 }
 0x42f   : > { %9926 = vtanh.f32 %v5788_v34  ;;  %v5877_v24 = vadd.f32 %v5876_v33, %v12249_v2  ;;  %v5791_v28 = vpop.f32.mrb[180].mxu0  ;;  %8872 = vmatpush1.bf16.msra.mxu1 %v8871_v7 }
 0x430   : > { %9928 = vtanh.f32 %v5875_v22  ;;  %v5792_v50 = vadd.f32 %v5791_v28, %v12255_v43  ;;  %v5793_v40 = vpop.f32.mrb[181].mxu0  ;;  %8372 = vmatmul.mubr.msk.f32.vlgmr.msra.gmra.mrb[202].mxu0 %vm1444_vm0, %v12284_v30 }
 0x431   : > { %9930 = vtanh.f32 %v5877_v24  ;;  %v5880_v27 = vpop.f32.mrb[180].mxu1  ;;  %v5794_v31 = vadd.f32 %v5793_v40, %v12255_v43  ;;  %7127 = vmatprep.mubr.f32.mxu0 %v12935_v35 }
 0x432   : > { %9932 = vtanh.f32 %v5792_v50  ;;  %v5881_v38 = vadd.f32 %v5880_v27, %v12255_v43  ;;  %v5882_v32 = vpop.f32.mrb[181].mxu1  ;;  %8373 = vmatmul.mubr.msk.f32.vlgmr.msra.gmra.mrb[202].mxu1 %vm1444_vm0, %v12284_v30 }
 0x433   : > { %9934 = vtanh.f32 %v5794_v31  ;;  %v5883_v36 = vadd.f32 %v5882_v32, %v12255_v43  ;;  %v5797_v41 = vpop.f32.mrb[182].mxu0  ;;  %7198 = vmatprep.mubr.f32.mxu1 %v12935_v35 }
 0x434   : > { %v9917_v23 = vpop.eup %9916  ;;  %9936 = vtanh.f32 %v5881_v38  ;;  %v5798_v25 = vadd.f32 %v5797_v41, %v12261_v18  ;;  %v5799_v12 = vpop.f32.mrb[183].mxu0 }
 0x435   : > { %v9919_v4 = vpop.eup %9918  ;;  %9938 = vtanh.f32 %v5883_v36  ;;  %v5886_v61 = vpop.f32.mrb[182].mxu1  ;;  %v5800_v17 = vadd.f32 %v5799_v12, %v12261_v18 }
 0x436   : > { %v9921_v39 = vpop.eup %9920  ;;  %9940 = vtanh.f32 %v5798_v25  ;;  %v5887_v6 = vadd.f32 %v5886_v61, %v12261_v18  ;;  %v5888_v26 = vpop.f32.mrb[183].mxu1 }
 0x437   : > { %v9923_v20 = vpop.eup %9922  ;;  %9942 = vtanh.f32 %v5800_v17  ;;  %v5889_v42 = vadd.f32 %v5888_v26, %v12261_v18 }
 0x438   : > { %v9925_v46 = vpop.eup %9924  ;;  %9944 = vtanh.f32 %v5887_v6 }
 0x439   : > { %v9927_v45 = vpop.eup %9926  ;;  %9946 = vtanh.f32 %v5889_v42  ;;  %v8875_v7 = vpack.c.bf16 %v9925_v46, %v9917_v23 }
 0x43a   : > { %v9929_v37 = vpop.eup %9928  ;;  %v8873_v59 = vpack.c.bf16 %v9927_v45, %v9919_v4 }
 0x43b   : > { %v9931_v21 = vpop.eup %9930  ;;  %v8883_v3 = vpack.c.bf16 %v9929_v37, %v9921_v39 }
 0x43c   : > { %v9933_v34 = vpop.eup %9932  ;;  %8874 = vmatprep.subr.bf16.mxu0 %v8873_v59  ;;  %v8881_v22 = vpack.c.bf16 %v9931_v21, %v9923_v20 }
 0x43d   : > { %v9935_v33 = vpop.eup %9934  ;;  %8876 = vmatpush1.bf16.msra.mxu0 %v8875_v7 }
 0x43e   : > { %v9937_v24 = vpop.eup %9936  ;;  %8882 = vmatprep.subr.bf16.mxu1 %v8881_v22 }
 0x43f   : > { %v9939_v28 = vpop.eup %9938  ;;  %8884 = vmatpush1.bf16.msra.mxu1 %v8883_v3 }
 0x440   : > { %v5957_v50 = vpop.f32.mrb[184].mxu0  ;;  %v9941_v40 = vpop.eup %9940 }
 0x441   : > { %v5958_v27 = vadd.f32 %v5957_v50, %v12244_v29  ;;  %v5959_v31 = vpop.f32.mrb[185].mxu0  ;;  %v9943_v38 = vpop.eup %9942  ;;  %v8879_v41 = vpack.c.bf16 %v9941_v40, %v9933_v34 }
 0x442   : > { %v6046_v32 = vpop.f32.mrb[184].mxu1  ;;  %v5960_v36 = vadd.f32 %v5959_v31, %v12244_v29  ;;  %v9945_v23 = vpop.eup %9944  ;;  %v8877_v4 = vpack.c.bf16 %v9943_v38, %v9935_v33 }
 0x443   : > { %9948 = vtanh.f32 %v5958_v27  ;;  %v6047_v25 = vadd.f32 %v6046_v32, %v12244_v29  ;;  %v6048_v12 = vpop.f32.mrb[185].mxu1  ;;  %v9947_v61 = vpop.eup %9946  ;;  %v8887_v6 = vpack.c.bf16 %v9945_v23, %v9937_v24 }
 0x444   : > { %9950 = vtanh.f32 %v5960_v36  ;;  %v6049_v17 = vadd.f32 %v6048_v12, %v12244_v29  ;;  %v5963_v39 = vpop.f32.mrb[186].mxu0  ;;  %8878 = vmatprep.subr.bf16.mxu0 %v8877_v4  ;;  %v8885_v42 = vpack.c.bf16 %v9947_v61, %v9939_v28 }
 0x445   : > { %9952 = vtanh.f32 %v6047_v25  ;;  %v5964_v26 = vadd.f32 %v5963_v39, %v12249_v2  ;;  %v5965_v20 = vpop.f32.mrb[187].mxu0  ;;  %8880 = vmatpush1.bf16.msra.mxu0 %v8879_v41 }
 0x446   : > { %9954 = vtanh.f32 %v6049_v17  ;;  %v6052_v46 = vpop.f32.mrb[186].mxu1  ;;  %v5966_v45 = vadd.f32 %v5965_v20, %v12249_v2  ;;  %8886 = vmatprep.subr.bf16.mxu1 %v8885_v42 }
 0x447   : > { %9956 = vtanh.f32 %v5964_v26  ;;  %v6053_v7 = vadd.f32 %v6052_v46, %v12249_v2  ;;  %v6054_v37 = vpop.f32.mrb[187].mxu1  ;;  %8888 = vmatpush1.bf16.msra.mxu1 %v8887_v6 }
 0x448   : > { %9958 = vtanh.f32 %v5966_v45  ;;  %v6055_v29 = vadd.f32 %v6054_v37, %v12249_v2  ;;  %v5969_v59 = vpop.f32.mrb[188].mxu0  ;;  %8374 = vmatmul.mubr.msk.f32.vlgmr.msra.gmra.mrb[204].mxu0 %vm1444_vm0, %v12284_v30 }
 0x449   : > { %9960 = vtanh.f32 %v6053_v7  ;;  %v5970_v21 = vadd.f32 %v5969_v59, %v12255_v43  ;;  %v5971_v3 = vpop.f32.mrb[189].mxu0  ;;  %7269 = vmatprep.mubr.f32.mxu0 %v12935_v35 }
 0x44a   : > { %9962 = vtanh.f32 %v6055_v29  ;;  %v6058_v34 = vpop.f32.mrb[188].mxu1  ;;  %v5972_v22 = vadd.f32 %v5971_v3, %v12255_v43  ;;  %8375 = vmatmul.mubr.msk.f32.vlgmr.msra.gmra.mrb[204].mxu1 %vm1444_vm0, %v12284_v30 }
 0x44b   : > { %9964 = vtanh.f32 %v5970_v21  ;;  %v6059_v33 = vadd.f32 %v6058_v34, %v12255_v43  ;;  %v6060_v24 = vpop.f32.mrb[189].mxu1  ;;  %7340 = vmatprep.mubr.f32.mxu1 %v12935_v35  ;;  %v9994_v34 = vld [vmem:[%s12774_s7] sm:$0x1] }
 0x44c   : > { %9966 = vtanh.f32 %v5972_v22  ;;  %v6061_v2 = vadd.f32 %v6060_v24, %v12255_v43  ;;  %v5975_v28 = vpop.f32.mrb[190].mxu0  ;;  %v9995_v22 = vld [vmem:[%s10357_s17] sm:$0xff]  ;;  %v6202_v24 = vpop.permute.xlu0 %6201 }
 0x44d   : > { %v9949_v50 = vpop.eup %9948  ;;  %9968 = vtanh.f32 %v6059_v33  ;;  %v5976_v40 = vadd.f32 %v5975_v28, %v12261_v18  ;;  %v5977_v27 = vpop.f32.mrb[191].mxu0  ;;  %v12433_v33 = vadd.f32 -1.0, %v9995_v22 }
 0x44e   : > { %v9951_v31 = vpop.eup %9950  ;;  %9970 = vtanh.f32 %v6061_v2  ;;  %v6064_v38 = vpop.f32.mrb[190].mxu1  ;;  %v5978_v32 = vadd.f32 %v5977_v27, %v12261_v18  ;;  %v12436_v2 = vrot.slane %v6202_v24, %v12965_v19  ;;  %v12981_v24 = vld [vmem:[#allocation20_spill] sm:$0xff] }
 0x44f   : > { %v9953_v36 = vpop.eup %9952  ;;  %9972 = vtanh.f32 %v5976_v40  ;;  %v6065_v30 = vadd.f32 %v6064_v38, %v12261_v18  ;;  %v6066_v41 = vpop.f32.mrb[191].mxu1  ;;  %v7358_v28 = vrot.slane %v12433_v33, %v12965_v19 }
 0x450   : > { %v9955_v23 = vpop.eup %9954  ;;  %9974 = vtanh.f32 %v5978_v32  ;;  %v6067_v43 = vadd.f32 %v6066_v41, %v12261_v18  ;;  %v10104_v41 = vmov 1966171168  }
 0x451   : > { %v9957_v35 = vpop.eup %9956  ;;  %9976 = vtanh.f32 %v6065_v30 }
 0x452   : > { %v9959_v25 = vpop.eup %9958  ;;  %9978 = vtanh.f32 %v6067_v43  ;;  %v8891_v12 = vpack.c.bf16 %v9957_v35, %v9949_v50  ;;  %v9996_v50 = vld [vmem:[%s10270_s15] sm:$0xff] }
 0x453   : > { %v9961_v4 = vpop.eup %9960  ;;  %v8889_v61 = vpack.c.bf16 %v9959_v25, %v9951_v31  ;;  %v12441_v40 = vadd.f32 -1.0, %v9996_v50  ;;  %v12977_v31 = vld [vmem:[#allocation10_spill] sm:$0xff]  ;;  %v7370_v25 = vrot.slane %v12433_v33, %v12962_v44  ;;  %v12982_v50 = vld [vmem:[#allocation23_spill] sm:$0xff] }
 0x454   : > { %v9963_v17 = vpop.eup %9962  ;;  %v8899_v39 = vpack.c.bf16 %v9961_v4, %v9953_v36  ;;  %v7362_v38 = vrot.slane %v12433_v33, %v12977_v31  ;;  %v7366_v36 = vrot.slane %v12433_v33, %v12968_v5 }
 0x455   : > { %v9965_v6 = vpop.eup %9964  ;;  %8890 = vmatprep.subr.bf16.mxu0 %v8889_v61  ;;  %v8897_v26 = vpack.c.bf16 %v9963_v17, %v9955_v23  ;;  %v7848_v23 = vunpack.c.l.s4 %v10104_v41  ;;  %v7590_v4 = vrot.slane %v12441_v40, %v12965_v19 }
 0x456   : > { %v9967_v20 = vpop.eup %9966  ;;  %8892 = vmatpush1.bf16.msra.mxu0 %v8891_v12 }
 0x457   : > { %v9969_v42 = vpop.eup %9968  ;;  %8898 = vmatprep.subr.bf16.mxu1 %v8897_v26 }
 0x458   : > { %v9971_v46 = vpop.eup %9970  ;;  %8900 = vmatpush1.bf16.msra.mxu1 %v8899_v39 }
 0x459   : > { %v9973_v18 = vpop.eup %9972 }
 0x45a   : > { %v9975_v45 = vpop.eup %9974  ;;  %v8895_v7 = vpack.c.bf16 %v9973_v18, %v9965_v6  ;;  %v7594_v6 = vrot.slane %v12441_v40, %v12977_v31  ;;  %v7598_v18 = vrot.slane %v12441_v40, %v12968_v5 }
 0x45b   : > { %v9977_v37 = vpop.eup %9976  ;;  %v8893_v29 = vpack.c.bf16 %v9975_v45, %v9967_v20  ;;  %v12978_v20 = vld [vmem:[#allocation22_spill] sm:$0xff]  ;;  %v7849_v45 = vunpack.c.0.s8 %v7848_v23 }
 0x45c   : > { %v9979_v59 = vpop.eup %9978  ;;  %v8903_v21 = vpack.c.bf16 %v9977_v37, %v9969_v42 }
 0x45d   : > { %8894 = vmatprep.subr.bf16.mxu0 %v8893_v29  ;;  %v8901_v3 = vpack.c.bf16 %v9979_v59, %v9971_v46  ;;  %v7602_v59 = vrot.slane %v12441_v40, %v12962_v44 }
 0x45e   : > { %8896 = vmatpush1.bf16.msra.mxu0 %v8895_v7  ;;  %v12979_v7 = vld [vmem:[#allocation17_spill] sm:$0xff] }
 0x45f   : > { %8902 = vmatprep.subr.bf16.mxu1 %v8901_v3  ;;  %v12980_v3 = vld [vmem:[#allocation24_spill] sm:$0xff] }
 0x460   : > { %8904 = vmatpush1.bf16.msra.mxu1 %v8903_v21 }
 0x461   : > { %8376 = vmatmul.mubr.msk.f32.vlgmr.msra.gmra.mrb[206].mxu0 %vm1444_vm0, %v9994_v34 }
 0x463   : > { %8377 = vmatmul.mubr.msk.f32.vlgmr.msra.gmra.mrb[206].mxu1 %vm1444_vm0, %v9994_v34 }
 0x49d   : > { %v6277_v27 = vpop.f32.mrb[192].mxu0 }
 0x49e   : > { %v6278_v32 = vadd.f32 %v6277_v27, %v12436_v2  ;;  %v6279_v30 = vpop.f32.mrb[193].mxu0 }
 0x49f   : > { %v6348_v43 = vpop.f32.mrb[192].mxu1  ;;  %v6280_v35 = vadd.f32 %v6279_v30, %v12436_v2  ;;  %v12984_v30 = vld [vmem:[#allocation19_spill] sm:$0xff] }
 0x4a0   : > { %v7515_v12 = vmul.f32 %v7358_v28, %v6278_v32  ;;  %v6349_v61 = vadd.f32 %v6348_v43, %v12436_v2  ;;  %v6350_v17 = vpop.f32.mrb[193].mxu1  ;;  %v12983_v32 = vld [vmem:[#allocation9_spill] sm:$0xff] }
 0x4a1   : > { %v7516_v39 = vmul.f32 %v7362_v38, %v6280_v35  ;;  %v6351_v26 = vadd.f32 %v6350_v17, %v12436_v2 }
 0x4a2   : > { %v7547_v42 = vmul.f32 %v7515_v12, %v12978_v20  ;;  %v7517_v46 = vmul.f32 %v7366_v36, %v6349_v61  ;;  %v12467_v36 = vsub.s32 %v7849_v45, %v12983_v32 }
 0x4a3   : > { %v7548_v37 = vmul.f32 %v7516_v39, %v12979_v7  ;;  %v7518_v29 = vmul.f32 %v7370_v25, %v6351_v26  ;;  %v12985_v25 = vld [vmem:[#allocation21_spill] sm:$0xff]  ;;  %v7374_v39 = vrot.slane %v12433_v33, %v12975_v0  ;;  %v7378_v26 = vrot.slane %v12433_v33, %v12971_v62 }
 0x4a4   : > { %v7747_v21 = vmul.f32 %v7590_v4, %v7547_v42  ;;  %v7549_v34 = vmul.f32 %v7517_v46, %v12980_v3  ;;  %v7386_v7 = vrot.slane %v12433_v33, %v12974_v60 }
 0x4a5   : > { %v7748_v22 = vmul.f32 %v7594_v6, %v7548_v37  ;;  %v7550_v28 = vmul.f32 %v7518_v29, %v12981_v24  ;;  %v7606_v29 = vrot.slane %v12441_v40, %v12975_v0 }
 0x4a6   : > { %v7779_v27 = vmul.f32 %v7747_v21, %v12982_v50  ;;  %v7749_v38 = vmul.f32 %v7598_v18, %v7549_v34  ;;  %v7610_v34 = vrot.slane %v12441_v40, %v12971_v62  ;;  %v7614_v50 = vrot.slane %v12441_v40, %v12976_v13 }
 0x4a7   : > { %v7780_v41 = vmul.f32 %v7748_v22, %v12984_v30  ;;  %v7750_v23 = vmul.f32 %v7602_v59, %v7550_v28 }
 0x4a8   : > { %v7781_v43 = vmul.f32 %v7749_v38, %v10408_v48  ;;  %v7382_v48 = vrot.slane %v12433_v33, %v12976_v13  ;;  %v7618_v38 = vrot.slane %v12441_v40, %v12974_v60 }
 0x4a9   : > { %v7843_v35 = vcombine.low %v7779_v27, %v7780_v41  ;;  %v7782_v12 = vmul.f32 %v7750_v23, %v12985_v25 }
 0x4ab   : > { %v7853_v4 = vrot.slane %v7843_v35, %v12467_v36  ;;  %v7844_v61 = vcombine.low %v7781_v43, %v7782_v12 }
 0x4ad   : > { %v7860_v17 = vrot.slane %v7844_v61, %v12467_v36 }
 0x4ae   : > { %v6419_v6 = vpop.f32.mrb[194].mxu0 }
 0x4af   : > { %v7875_v20 = vcombine.low %v7853_v4, %v7860_v17  ;;  %v6420_v42 = vadd.f32 %v6419_v6, %v12436_v2  ;;  %v6421_v46 = vpop.f32.mrb[195].mxu0  ;;  %v9997_v17 = vld [vmem:[%s10357_s17 + $0x8] sm:$0xff] }
 0x4b0   : > { %v6490_v18 = vpop.f32.mrb[194].mxu1  ;;  %v6422_v45 = vadd.f32 %v6421_v46, %v12436_v2  ;;  %v9998_v6 = vld [vmem:[%s10270_s15 + $0x8] sm:$0xff] }
 0x4b1   : > { %v7519_v37 = vmul.f32 %v7374_v39, %v6420_v42  ;;  %v6491_v59 = vadd.f32 %v6490_v18, %v12436_v2  ;;  %v6492_v21 = vpop.f32.mrb[195].mxu1 }
 0x4b2   : > { %v7520_v3 = vmul.f32 %v7378_v26, %v6422_v45  ;;  %v6493_v22 = vadd.f32 %v6492_v21, %v12436_v2 }
 0x4b3   : > { %v7551_v24 = vmul.f32 %v7519_v37, %v10424_v54  ;;  %v7521_v28 = vmul.f32 %v7382_v48, %v6491_v59 }
 0x4b4   : > { %v7552_v33 = vmul.f32 %v7520_v3, %v10411_v49  ;;  %v7522_v27 = vmul.f32 %v7386_v7, %v6493_v22 }
 0x4b5   : > { %v7751_v32 = vmul.f32 %v7606_v29, %v7551_v24  ;;  %v7553_v30 = vmul.f32 %v7521_v28, %v10430_v56  ;;  %v12504_v56 = vadd.f32 -1.0, %v9997_v17 }
 0x4b6   : > { %v7752_v41 = vmul.f32 %v7610_v34, %v7552_v33  ;;  %v7554_v23 = vmul.f32 %v7522_v27, %v10418_v52 }
 0x4b7   : > { %v7783_v54 = vmul.f32 %v7751_v32, %v10427_v55  ;;  %v7753_v43 = vmul.f32 %v7614_v50, %v7553_v30  ;;  %v7390_v55 = vrot.slane %v12504_v56, %v12965_v19  ;;  %v7394_v42 = vrot.slane %v12504_v56, %v12977_v31 }
 0x4b8   : > { %v7784_v35 = vmul.f32 %v7752_v41, %v10415_v51  ;;  %v7754_v25 = vmul.f32 %v7618_v38, %v7554_v23  ;;  %v12510_v51 = vadd.f32 -1.0, %v9998_v6  ;;  %v7398_v46 = vrot.slane %v12504_v56, %v12968_v5 }
 0x4b9   : > { %v7785_v49 = vmul.f32 %v7753_v43, %v10433_v57  ;;  %v7883_v57 = vrot.slane %v7875_v20, %v12467_v36  ;;  %v7402_v29 = vrot.slane %v12504_v56, %v12962_v44 }
 0x4ba   : > { %v7845_v12 = vcombine.low %v7783_v54, %v7784_v35  ;;  %v7786_v4 = vmul.f32 %v7754_v25, %v10421_v53  ;;  %v7622_v59 = vrot.slane %v12510_v51, %v12965_v19  ;;  %v7626_v22 = vrot.slane %v12510_v51, %v12977_v31  ;;  %v12986_v35 = vld [vmem:[#allocation25_spill] sm:$0xff] }
 0x4bb   : > { %v7630_v33 = vrot.slane %v12510_v51, %v12968_v5  ;;  %v7634_v32 = vrot.slane %v12510_v51, %v12962_v44 }
 0x4bc   : > { %v7867_v40 = vrot.slane %v7845_v12, %v12467_v36  ;;  %v7846_v61 = vcombine.low %v7785_v49, %v7786_v4  ;;  %v12987_v49 = vld [vmem:[#allocation31_spill] sm:$0xff] }
 0x4be   : > { %v7874_v39 = vrot.slane %v7846_v61, %v12467_v36 }
 0x4c0   : > { %v7876_v52 = vcombine.low %v7867_v40, %v7874_v39  ;;  %v12988_v40 = vld [vmem:[#allocation27_spill] sm:$0xff] }
 0x4c2   : > { %v7890_v26 = vrot.slane %v7876_v52, %v12467_v36  ;;  %v6561_v53 = vpop.f32.mrb[196].mxu0  ;;  %v7406_v52 = vrot.slane %v12504_v56, %v12975_v0 }
 0x4c3   : > { %v6562_v48 = vadd.f32 %v6561_v53, %v12436_v2  ;;  %v6563_v18 = vpop.f32.mrb[197].mxu0 }
 0x4c4   : > { %v7891_v45 = vcombine.low %v7883_v57, %v7890_v26  ;;  %v6632_v7 = vpop.f32.mrb[196].mxu1  ;;  %v6564_v37 = vadd.f32 %v6563_v18, %v12436_v2  ;;  %v7414_v57 = vrot.slane %v12504_v56, %v12976_v13  ;;  %v7638_v18 = vrot.slane %v12510_v51, %v12975_v0 }
 0x4c5   : > { %v7523_v20 = vmul.f32 %v7390_v55, %v6562_v48  ;;  %v6633_v21 = vadd.f32 %v6632_v7, %v12436_v2  ;;  %v6634_v3 = vpop.f32.mrb[197].mxu1  ;;  %v7418_v48 = vrot.slane %v12504_v56, %v12974_v60 }
 0x4c6   : > { %v7524_v34 = vmul.f32 %v7394_v42, %v6564_v37  ;;  %v6635_v24 = vadd.f32 %v6634_v3, %v12436_v2  ;;  %8043 = vst [vmem:[%s12538_s29] sm:$0xff] %v7891_v45 }
 0x4c7   : > { %v7555_v28 = vmul.f32 %v7523_v20, %v12931_v11  ;;  %v7525_v50 = vmul.f32 %v7398_v46, %v6633_v21 }
 0x4c8   : > { %v7556_v27 = vmul.f32 %v7524_v34, %v10436_v58  ;;  %v7526_v38 = vmul.f32 %v7402_v29, %v6635_v24  ;;  %v7642_v29 = vrot.slane %v12510_v51, %v12971_v62  ;;  %v7646_v34 = vrot.slane %v12510_v51, %v12976_v13 }
 0x4c9   : > { %v7755_v30 = vmul.f32 %v7622_v59, %v7555_v28  ;;  %v7557_v41 = vmul.f32 %v7525_v50, %v12933_v10  ;;  %v12989_v59 = vld [vmem:[#allocation36_spill] sm:$0xff]  ;;  %v7650_v28 = vrot.slane %v12510_v51, %v12974_v60 }
 0x4ca   : > { %v7756_v23 = vmul.f32 %v7626_v22, %v7556_v27  ;;  %v7558_v54 = vmul.f32 %v7526_v38, %v12929_v9 }
 0x4cb   : > { %v7787_v11 = vmul.f32 %v7755_v30, %v12932_v47  ;;  %v7757_v43 = vmul.f32 %v7630_v33, %v7557_v41  ;;  %v7410_v47 = vrot.slane %v12504_v56, %v12971_v62  ;;  %v12990_v56 = vld [vmem:[#allocation32_spill] sm:$0xff]  ;;  %v12991_v33 = vld [vmem:[#allocation38_spill] sm:$0xff]  ;;  %v12993_v41 = vld [vmem:[#allocation37_spill] sm:$0xff] }
 0x4cc   : > { %v7788_v58 = vmul.f32 %v7756_v23, %v12986_v35  ;;  %v7758_v25 = vmul.f32 %v7634_v32, %v7558_v54  ;;  %v12992_v32 = vld [vmem:[#allocation34_spill] sm:$0xff] }
 0x4cd   : > { %v7789_v12 = vmul.f32 %v7757_v43, %v12987_v49 }
 0x4ce   : > { %v7892_v4 = vcombine.low %v7787_v11, %v7788_v58  ;;  %v7790_v61 = vmul.f32 %v7758_v25, %v12988_v40  ;;  %v12994_v11 = vld [vmem:[#allocation33_spill] sm:$0xff]  ;;  %v12995_v58 = vld [vmem:[#allocation39_spill] sm:$0xff] }
 0x4d0   : > { %v7902_v10 = vrot.slane %v7892_v4, %v12467_v36  ;;  %v7893_v17 = vcombine.low %v7789_v12, %v7790_v61  ;;  %v12996_v12 = vld [vmem:[#allocation35_spill] sm:$0xff] }
 0x4d2   : > { %v7909_v9 = vrot.slane %v7893_v17, %v12467_v36 }
 0x4d4   : > { %v7924_v39 = vcombine.low %v7902_v10, %v7909_v9  ;;  %v9999_v10 = vld [vmem:[%s10357_s17 + $0x10] sm:$0xff] }
 0x4d5   : > { %v12578_v17 = vadd.f32 -1.0, %v9999_v10 }
 0x4d9   : > { %v6703_v55 = vpop.f32.mrb[198].mxu0 }
 0x4da   : > { %v6704_v6 = vadd.f32 %v6703_v55, %v12436_v2  ;;  %v6705_v26 = vpop.f32.mrb[199].mxu0 }
 0x4db   : > { %v6774_v53 = vpop.f32.mrb[198].mxu1  ;;  %v6706_v42 = vadd.f32 %v6705_v26, %v12436_v2 }
 0x4dc   : > { %v7527_v46 = vmul.f32 %v7406_v52, %v6704_v6  ;;  %v6775_v45 = vadd.f32 %v6774_v53, %v12436_v2  ;;  %v6776_v7 = vpop.f32.mrb[199].mxu1  ;;  %v7932_v52 = vrot.slane %v7924_v39, %v12467_v36  ;;  %v10000_v6 = vld [vmem:[%s10270_s15 + $0x10] sm:$0xff] }
 0x4dd   : > { %v7528_v37 = vmul.f32 %v7410_v47, %v6706_v42  ;;  %v6777_v20 = vadd.f32 %v6776_v7, %v12436_v2  ;;  %v7422_v47 = vrot.slane %v12578_v17, %v12965_v19  ;;  %v7426_v42 = vrot.slane %v12578_v17, %v12977_v31 }
 0x4de   : > { %v7559_v21 = vmul.f32 %v7527_v46, %v12989_v59  ;;  %v7529_v3 = vmul.f32 %v7414_v57, %v6775_v45  ;;  %v12585_v57 = vadd.f32 -1.0, %v10000_v6  ;;  %v7430_v46 = vrot.slane %v12578_v17, %v12968_v5 }
 0x4df   : > { %v7560_v22 = vmul.f32 %v7528_v37, %v12990_v56  ;;  %v7530_v24 = vmul.f32 %v7418_v48, %v6777_v20  ;;  %v7434_v7 = vrot.slane %v12578_v17, %v12962_v44  ;;  %v12997_v56 = vld [vmem:[#allocation44_spill] sm:$0xff]  ;;  %v7438_v6 = vrot.slane %v12578_v17, %v12975_v0 }
 0x4e0   : > { %v7759_v50 = vmul.f32 %v7638_v18, %v7559_v21  ;;  %v7561_v27 = vmul.f32 %v7529_v3, %v12991_v33  ;;  %v7658_v3 = vrot.slane %v12585_v57, %v12977_v31 }
 0x4e1   : > { %v7760_v38 = vmul.f32 %v7642_v29, %v7560_v22  ;;  %v7562_v30 = vmul.f32 %v7530_v24, %v12992_v32  ;;  %v7654_v29 = vrot.slane %v12585_v57, %v12965_v19 }
 0x4e2   : > { %v7791_v23 = vmul.f32 %v7759_v50, %v12993_v41  ;;  %v7761_v54 = vmul.f32 %v7646_v34, %v7561_v27  ;;  %v12998_v50 = vld [vmem:[#allocation40_spill] sm:$0xff] }
 0x4e3   : > { %v7792_v43 = vmul.f32 %v7760_v38, %v12994_v11  ;;  %v7762_v35 = vmul.f32 %v7650_v28, %v7562_v30  ;;  %v7662_v28 = vrot.slane %v12585_v57, %v12968_v5  ;;  %v7666_v38 = vrot.slane %v12585_v57, %v12962_v44  ;;  %v12999_v30 = vld [vmem:[#allocation46_spill] sm:$0xff] }
 0x4e4   : > { %v7793_v25 = vmul.f32 %v7761_v54, %v12995_v58  ;;  %v13000_v54 = vld [vmem:[#allocation42_spill] sm:$0xff] }
 0x4e5   : > { %v7894_v49 = vcombine.low %v7791_v23, %v7792_v43  ;;  %v7794_v4 = vmul.f32 %v7762_v35, %v12996_v12  ;;  %v13001_v43 = vld [vmem:[#allocation45_spill] sm:$0xff] }
 0x4e7   : > { %v7916_v51 = vrot.slane %v7894_v49, %v12467_v36  ;;  %v7895_v40 = vcombine.low %v7793_v25, %v7794_v4  ;;  %v13002_v25 = vld [vmem:[#allocation41_spill] sm:$0xff]  ;;  %v13003_v4 = vld [vmem:[#allocation47_spill] sm:$0xff] }
 0x4e9   : > { %v7923_v61 = vrot.slane %v7895_v40, %v12467_v36 }
 0x4eb   : > { %v7925_v9 = vcombine.low %v7916_v51, %v7923_v61  ;;  %v13004_v61 = vld [vmem:[#allocation43_spill] sm:$0xff] }
 0x4ed   : > { %v7939_v55 = vrot.slane %v7925_v9, %v12467_v36 }
 0x4ef   : > { %v7940_v26 = vcombine.low %v7932_v52, %v7939_v55  ;;  %v6845_v53 = vpop.f32.mrb[200].mxu0 }
 0x4f0   : > { %v6846_v48 = vadd.f32 %v6845_v53, %v12436_v2  ;;  %v6847_v18 = vpop.f32.mrb[201].mxu0  ;;  %v7442_v53 = vrot.slane %v12578_v17, %v12971_v62 }
 0x4f1   : > { %v6916_v39 = vpop.f32.mrb[200].mxu1  ;;  %v6848_v45 = vadd.f32 %v6847_v18, %v12436_v2  ;;  %8044 = vst [vmem:[%s12538_s29 + $0x8] sm:$0xff] %v7940_v26 }
 0x4f2   : > { %v7531_v37 = vmul.f32 %v7422_v47, %v6846_v48  ;;  %v6917_v20 = vadd.f32 %v6916_v39, %v12436_v2  ;;  %v6918_v59 = vpop.f32.mrb[201].mxu1  ;;  %v7446_v48 = vrot.slane %v12578_v17, %v12976_v13 }
 0x4f3   : > { %v7532_v21 = vmul.f32 %v7426_v42, %v6848_v45  ;;  %v6919_v34 = vadd.f32 %v6918_v59, %v12436_v2  ;;  %v7450_v45 = vrot.slane %v12578_v17, %v12974_v60  ;;  %v13006_v17 = vld [vmem:[#allocation48_spill] sm:$0xff] }
 0x4f4   : > { %v7563_v22 = vmul.f32 %v7531_v37, %v12997_v56  ;;  %v7533_v24 = vmul.f32 %v7430_v46, %v6917_v20  ;;  %v7670_v37 = vrot.slane %v12585_v57, %v12975_v0 }
 0x4f5   : > { %v7564_v33 = vmul.f32 %v7532_v21, %v12998_v50  ;;  %v7534_v27 = vmul.f32 %v7434_v7, %v6919_v34  ;;  %v7674_v21 = vrot.slane %v12585_v57, %v12971_v62  ;;  %v13005_v34 = vld [vmem:[#allocation52_spill] sm:$0xff] }
 0x4f6   : > { %v7763_v32 = vmul.f32 %v7654_v29, %v7563_v22  ;;  %v7565_v41 = vmul.f32 %v7533_v24, %v12999_v30  ;;  %v7678_v24 = vrot.slane %v12585_v57, %v12976_v13 }
 0x4f7   : > { %v7764_v23 = vmul.f32 %v7658_v3, %v7564_v33  ;;  %v7566_v11 = vmul.f32 %v7534_v27, %v13000_v54  ;;  %v7682_v33 = vrot.slane %v12585_v57, %v12974_v60  ;;  %v13009_v54 = vld [vmem:[#allocation53_spill] sm:$0xff] }
 0x4f8   : > { %v7795_v35 = vmul.f32 %v7763_v32, %v13001_v43  ;;  %v7765_v58 = vmul.f32 %v7662_v28, %v7565_v41  ;;  %v13008_v41 = vld [vmem:[#allocation50_spill] sm:$0xff] }
 0x4f9   : > { %v7796_v49 = vmul.f32 %v7764_v23, %v13002_v25  ;;  %v7766_v12 = vmul.f32 %v7666_v38, %v7566_v11  ;;  %v13007_v38 = vld [vmem:[#allocation54_spill] sm:$0xff] }
 0x4fa   : > { %v7797_v51 = vmul.f32 %v7765_v58, %v13003_v4 }
 0x4fb   : > { %v7941_v40 = vcombine.low %v7795_v35, %v7796_v49  ;;  %v7798_v10 = vmul.f32 %v7766_v12, %v13004_v61  ;;  %v13010_v35 = vld [vmem:[#allocation49_spill] sm:$0xff]  ;;  %v13011_v49 = vld [vmem:[#allocation55_spill] sm:$0xff] }
 0x4fd   : > { %v7951_v9 = vrot.slane %v7941_v40, %v12467_v36  ;;  %v7942_v52 = vcombine.low %v7797_v51, %v7798_v10  ;;  %v13012_v51 = vld [vmem:[#allocation51_spill] sm:$0xff] }
 0x4ff   : > { %v7958_v55 = vrot.slane %v7942_v52, %v12467_v36  ;;  %v10001_v52 = vld [vmem:[%s10357_s17 + $0x18] sm:$0xff] }
 0x501   : > { %v7973_v47 = vcombine.low %v7951_v9, %v7958_v55  ;;  %v12647_v55 = vadd.f32 -1.0, %v10001_v52 }
 0x503   : > { %v6987_v26 = vpop.f32.mrb[202].mxu0  ;;  %v7470_v52 = vrot.slane %v12647_v55, %v12975_v0 }
 0x504   : > { %v6988_v42 = vadd.f32 %v6987_v26, %v12436_v2  ;;  %v6989_v46 = vpop.f32.mrb[203].mxu0 }
 0x505   : > { %v7058_v18 = vpop.f32.mrb[202].mxu1  ;;  %v6990_v39 = vadd.f32 %v6989_v46, %v12436_v2 }
 0x506   : > { %v7535_v7 = vmul.f32 %v7438_v6, %v6988_v42  ;;  %v7059_v29 = vadd.f32 %v7058_v18, %v12436_v2  ;;  %v7060_v20 = vpop.f32.mrb[203].mxu1  ;;  %v7981_v6 = vrot.slane %v7973_v47, %v12467_v36  ;;  %v7454_v42 = vrot.slane %v12647_v55, %v12965_v19 }
 0x507   : > { %v7536_v59 = vmul.f32 %v7442_v53, %v6990_v39  ;;  %v7061_v3 = vadd.f32 %v7060_v20, %v12436_v2  ;;  %v7458_v39 = vrot.slane %v12647_v55, %v12977_v31  ;;  %v7466_v20 = vrot.slane %v12647_v55, %v12962_v44 }
 0x508   : > { %v7567_v56 = vmul.f32 %v7535_v7, %v13005_v34  ;;  %v7537_v22 = vmul.f32 %v7446_v48, %v7059_v29  ;;  %v10002_v48 = vld [vmem:[%s10270_s15 + $0x18] sm:$0xff]  ;;  %v7462_v7 = vrot.slane %v12647_v55, %v12968_v5  ;;  %s8062_s15 = sshll.u32 %s12538_s29, 4  ;;  %s12724_s15 = int_to_ptr.vmem [resolvable:$true] %s8062_s15 }
 0x509   : > { %v7568_v28 = vmul.f32 %v7536_v59, %v13006_v17  ;;  %v7538_v50 = vmul.f32 %v7450_v45, %v7061_v3  ;;  %v12654_v46 = vadd.f32 -1.0, %v10002_v48  ;;  %v13013_v17 = vld [vmem:[#allocation29_spill] sm:$0xff]  ;;  %s10033_s30 = scalar_lea.vmem %s12724_s15, 512  ;;  %p10040_p10 = scmp.lt.s32.totalorder %s12724_s15, %s10038_s20 }
 0x50a   : > { %v7767_v27 = vmul.f32 %v7670_v37, %v7567_v56  ;;  %v7569_v32 = vmul.f32 %v7537_v22, %v13007_v38  ;;  %p10034_p11 = scmp.ne.s32.totalorder %s12724_s15, %s10033_s30  ;;  %p10041_p2 = scmp.lt.s32.totalorder %s10039_s21, %s10033_s30 }
 0x50b   : > { %v7768_v30 = vmul.f32 %v7674_v21, %v7568_v28  ;;  %v7570_v23 = vmul.f32 %v7538_v50, %v13008_v41  ;;  %v7686_v21 = vrot.slane %v12654_v46, %v12965_v19  ;;  %v7690_v22 = vrot.slane %v12654_v46, %v12977_v31  ;;  %v13015_v41 = vld [vmem:[#allocation11_spill] sm:$0xff] }
 0x50c   : > { %v7799_v11 = vmul.f32 %v7767_v27, %v13009_v54  ;;  %v7769_v43 = vmul.f32 %v7678_v24, %v7569_v32  ;;  %v13014_v27 = vld [vmem:[#allocation56_spill] sm:$0xff]  ;;  %v7698_v19 = vrot.slane %v12654_v46, %v12962_v44  ;;  %p10035_p13 = pnand %p10034_p11, %p13023_p12  ;;  %p10042_p4 = por %p10041_p2, %p10040_p10 }
 0x50d   : > { %v7800_v58 = vmul.f32 %v7768_v30, %v13010_v35  ;;  %v7770_v25 = vmul.f32 %v7682_v33, %v7570_v23  ;;  %v7694_v33 = vrot.slane %v12654_v46, %v12968_v5 }
 0x50e   : > { %v7801_v12 = vmul.f32 %v7769_v43, %v13011_v49  ;;  %v13017_v43 = vld [vmem:[#allocation30_spill] sm:$0xff]  ;;  %p10036_p7 = pneg %p10035_p13 }
 0x50f   : > { %v7943_v4 = vcombine.low %v7799_v11, %v7800_v58  ;;  %v7802_v57 = vmul.f32 %v7770_v25, %v13012_v51  ;;  %v13016_v11 = vld [vmem:[#allocation26_spill] sm:$0xff]  ;;  %v13018_v25 = vld [vmem:[#allocation57_spill] sm:$0xff] }
 0x510   : > { %p10043_p5 = pnand %p10042_p4, %p10036_p7 }
 0x511   : > { %v7965_v40 = vrot.slane %v7943_v4, %v12467_v36  ;;  %v7944_v61 = vcombine.low %v7801_v12, %v7802_v57  ;;  %v13019_v4 = vld [vmem:[#allocation12_spill] sm:$0xff] }
 0x512   : > { %v13020_v57 = vld [vmem:[#allocation28_spill] sm:$0xff] }
 0x513   : > { %v7972_v10 = vrot.slane %v7944_v61, %v12467_v36 }
 0x515   : > { %v7974_v9 = vcombine.low %v7965_v40, %v7972_v10 }
 0x517   : > { %v7988_v26 = vrot.slane %v7974_v9, %v12467_v36 }
 0x519   : > { %v7989_v53 = vcombine.low %v7981_v6, %v7988_v26  ;;  %v7474_v26 = vrot.slane %v12647_v55, %v12971_v62 }
 0x51b   : > { %v7129_v18 = vpop.f32.mrb[204].mxu0  ;;  %8045 = vst [vmem:[%s12538_s29 + $0x10] sm:$0xff] %v7989_v53 }
 0x51c   : > { %v7130_v45 = vadd.f32 %v7129_v18, %v12436_v2  ;;  %v7131_v47 = vpop.f32.mrb[205].mxu0 }
 0x51d   : > { %v7200_v37 = vpop.f32.mrb[204].mxu1  ;;  %v7132_v29 = vadd.f32 %v7131_v47, %v12436_v2  ;;  %v7702_v47 = vrot.slane %v12654_v46, %v12975_v0  ;;  %v7714_v0 = vrot.slane %v12654_v46, %v12974_v60 }
 0x51e   : > { %v7539_v59 = vmul.f32 %v7454_v42, %v7130_v45  ;;  %v7201_v3 = vadd.f32 %v7200_v37, %v12436_v2  ;;  %v7202_v34 = vpop.f32.mrb[205].mxu1  ;;  %v7478_v42 = vrot.slane %v12647_v55, %v12976_v13  ;;  %v7482_v45 = vrot.slane %v12647_v55, %v12974_v60  ;;  %v13021_v55 = vld [vmem:[#allocation13_spill] sm:$0xff] }
 0x51f   : > { %v7540_v56 = vmul.f32 %v7458_v39, %v7132_v29  ;;  %v7203_v24 = vadd.f32 %v7202_v34, %v12436_v2 }
 0x520   : > { %v7571_v28 = vmul.f32 %v7539_v59, %v13013_v17  ;;  %v7541_v50 = vmul.f32 %v7462_v7, %v7201_v3  ;;  %v7706_v59 = vrot.slane %v12654_v46, %v12971_v62 }
 0x521   : > { %v7572_v38 = vmul.f32 %v7540_v56, %v13014_v27  ;;  %v7542_v32 = vmul.f32 %v7466_v20, %v7203_v24  ;;  %v7710_v56 = vrot.slane %v12654_v46, %v12976_v13 }
 0x522   : > { %v7771_v30 = vmul.f32 %v7686_v21, %v7571_v28  ;;  %v7573_v23 = vmul.f32 %v7541_v50, %v13015_v41 }
 0x523   : > { %v7772_v54 = vmul.f32 %v7690_v22, %v7572_v38  ;;  %v7574_v31 = vmul.f32 %v7542_v32, %v13016_v11 }
 0x524   : > { %v7803_v35 = vmul.f32 %v7771_v30, %v13017_v43  ;;  %v7773_v58 = vmul.f32 %v7694_v33, %v7573_v23  ;;  %v13022_v33 = vld [vmem:[#allocation14_spill] sm:$0xff] }
 0x525   : > { %v7804_v49 = vmul.f32 %v7772_v54, %v13018_v25  ;;  %v7774_v12 = vmul.f32 %v7698_v19, %v7574_v31 }
 0x526   : > { %v7805_v5 = vmul.f32 %v7773_v58, %v13019_v4 }
 0x527   : > { %v7990_v51 = vcombine.low %v7803_v35, %v7804_v49  ;;  %v7806_v40 = vmul.f32 %v7774_v12, %v13020_v57 }
 0x529   : > { %v8000_v61 = vrot.slane %v7990_v51, %v12467_v36  ;;  %v7991_v44 = vcombine.low %v7805_v5, %v7806_v40 }
 0x52b   : > { %v8007_v10 = vrot.slane %v7991_v44, %v12467_v36 }
 0x52d   : > { %v8022_v9 = vcombine.low %v8000_v61, %v8007_v10 }
 0x534   : > { %v7271_v6 = vpop.f32.mrb[206].mxu0 }
 0x535   : > { %v7272_v53 = vadd.f32 %v7271_v6, %v12436_v2  ;;  %v7273_v48 = vpop.f32.mrb[207].mxu0 }
 0x536   : > { %v7342_v18 = vpop.f32.mrb[206].mxu1  ;;  %v7274_v39 = vadd.f32 %v7273_v48, %v12436_v2 }
 0x537   : > { %v7543_v7 = vmul.f32 %v7470_v52, %v7272_v53  ;;  %v7343_v37 = vadd.f32 %v7342_v18, %v12436_v2  ;;  %v7344_v29 = vpop.f32.mrb[207].mxu1 }
 0x538   : > { %v7544_v20 = vmul.f32 %v7474_v26, %v7274_v39  ;;  %v7345_v21 = vadd.f32 %v7344_v29, %v12436_v2 }
 0x539   : > { %v7575_v3 = vmul.f32 %v7543_v7, %v11396_v15  ;;  %v7545_v34 = vmul.f32 %v7478_v42, %v7343_v37 }
 0x53a   : > { %v7576_v22 = vmul.f32 %v7544_v20, %v13021_v55  ;;  %v7546_v24 = vmul.f32 %v7482_v45, %v7345_v21 }
 0x53b   : > { %v7775_v17 = vmul.f32 %v7702_v47, %v7575_v3  ;;  %v7577_v28 = vmul.f32 %v7545_v34, %v11429_v63 }
 0x53c   : > { %v7776_v62 = vmul.f32 %v7706_v59, %v7576_v22  ;;  %v7578_v2 = vmul.f32 %v7546_v24, %v11380_v16 }
 0x53d   : > { %v7807_v15 = vmul.f32 %v7775_v17, %v11424_v14  ;;  %v7777_v50 = vmul.f32 %v7710_v56, %v7577_v28  ;;  %v8030_v14 = vrot.slane %v8022_v9, %v12467_v36 }
 0x53e   : > { %v7808_v27 = vmul.f32 %v7776_v62, %v13022_v33  ;;  %v7778_v13 = vmul.f32 %v7714_v0, %v7578_v2 }
 0x53f   : > { %v7809_v38 = vmul.f32 %v7777_v50, %v11446_v8 }
 0x540   : > { %v7992_v32 = vcombine.low %v7807_v15, %v7808_v27  ;;  %v7810_v60 = vmul.f32 %v7778_v13, %v11384_v1 }
 0x542   : > { %v8014_v46 = vrot.slane %v7992_v32, %v12467_v36  ;;  %v7993_v63 = vcombine.low %v7809_v38, %v7810_v60 }
 0x544   : > { %v8021_v19 = vrot.slane %v7993_v63, %v12467_v36 }
 0x546   : > { %v8023_v16 = vcombine.low %v8014_v46, %v8021_v19 }
 0x548   : > { %v8037_v30 = vrot.slane %v8023_v16, %v12467_v36 }
 0x54a   : > { %v8038_v41 = vcombine.low %v8030_v14, %v8037_v30 }
 0x54c   : > { %8046 = vst [vmem:[%s12538_s29 + $0x18] sm:$0xff] %v8038_v41 }
 0x54d   : > { %10046 = shalt.err (!%p10043_p5)
}
 0x54e   : > { %s10047_s18 = scalar_lea.hbm %s12722_s28, 512  ;;  %s10051_s29 = scalar_lea.hbm %s12776_s9, 1024 }
 0x54f   : > { %p10048_p8 = scmp.ne.s32.totalorder %s12722_s28, %s10047_s18  ;;  %p10052_p1 = scmp.lt.u32.totalorder %s12722_s28, %s12776_s9 }
 0x550   : > { %p10053_p3 = scmp.lt.u32.totalorder %s10051_s29, %s10047_s18  ;;  %p10055_p11 = scmp.lt.u32.totalorder %s10047_s18, %s12722_s28 }
 0x551   : > { %p10049_p9 = pnand %p10048_p8, %p13023_p12 }
 0x552   : > { %p10054_p6 = por %p10053_p3, %p10052_p1 }
 0x553   : > { %p10050_p0 = pneg %p10049_p9 }
 0x554   : > { %p10056_p13 = por %p10055_p11, %p10054_p6 }
 0x556   : > { %p10057_p7 = pnand %p10056_p13, %p10050_p0 }
 0x558   : > { %10060 = shalt.err (!%p10057_p7)
}
 0x559   : > { %8907 = dma.vmem_to_hbm [thread:$0]  (%p13023_p12), %s12724_s15, 512, %s12722_s28, %s8048_s24  }
 0x55a PF: > { %s8074_s10 = sand.u32 1, %s10087_s11   ;;  %p13024_p10 = scmp.ne.s32.totalorder %s12876_s23, 0 }
 0x55b   : > { %p13025_p2 = scmp.ge.s32.totalorder %s10099_s14, 2  ;;  %s8075_s30 = scalar_lea.sflag [#allocation5], %s8074_s10 }
 0x55d   : > { %p8914_p4 = pnand %p13025_p2, %p13024_p10 }
 0x55f   : > { %10082 = dma.done.wait (!%p8914_p4), %s8075_s30, 512  }
 0x560   : > { %10084 = vsyncadd (!%p8914_p4), %s8075_s30, 4294966784  ;;  %p24_p5 = scmp.ge.s32.totalorder %s10184_s16, 4   ;;  %s13026_s11 = smov %s10091_s12 }
 0x561   : > { %s13027_s12 = smov %s10095_s13  ;;  %s13028_s13 = smov %s10196_s19 }
 0x562   : > { %s13029_s14 = smov %s10184_s16  ;;  %26 = sbr.rel (!%p24_p5) target bundleno = 8 (0x8), region = 108 }
 0x569   :  { %8080 = vsyncpa [#allocation4], 1 }
 0x56a   :  { %8082 = vsyncpa [#allocation4 + $0x1], 1 }
 0x56b   :  { %8083 = vsyncpa [#allocation5], 1 }
 0x56c   :  { %8085 = vsyncpa [#allocation5 + $0x1], 1 }

</bundles_post_ra>
